<compile_context>
chip_gen: v7x
topology: tpu7x:2x2x1
jax: 0.10.0
libtpu: 0.0.40
codegen_flags: <defaults>
</compile_context>

<pallas_src>
import functools

import jax
import jax.numpy as jnp
from jax import lax
from jax.experimental import pallas as pl
from jax.experimental.pallas import tpu as pltpu


def _round_up(x, m):
    return (x + m - 1) // m * m


def _pack_gates(w, H, Hp):
    """(rows, 4H) with PyTorch gate cols [i|f|g|o] -> (rows, 4Hp) with cols
    [0.5*i | 0.5*f | 0.5*o | g], each gate on its own 128-aligned slab.

    The 0.5 pre-scale folds sigmoid's input scaling into the weights so the
    kernel evaluates sigmoid(z) = 0.5*tanh(0.5*z)+0.5 with a single tanh over
    the contiguous i/f/o slab.
    """
    i = w[:, 0 * H:1 * H] * 0.5
    f = w[:, 1 * H:2 * H] * 0.5
    g = w[:, 2 * H:3 * H]
    o = w[:, 3 * H:4 * H] * 0.5
    pad = None if H == Hp else jnp.zeros((w.shape[0], Hp - H), w.dtype)
    parts = []
    for blk in (i, f, o, g):
        parts.append(blk)
        if pad is not None:
            parts.append(pad)
    return jnp.concatenate(parts, axis=1)


def _pad_rows(w, rows_pad):
    r = w.shape[0]
    if r == rows_pad:
        return w
    return jnp.pad(w, ((0, rows_pad - r), (0, 0)))


# ----------------------------------------------------------------------------
# Per-layer LSTM kernel.
# Grid iterates sequentially over time-chunks of TT steps; (h, c) persist in
# VMEM scratch between chunks and in registers within a chunk.
# ----------------------------------------------------------------------------
def _lstm_layer_kernel(x_ref, h0_ref, c0_ref, wih_ref, whh_ref, b_ref,
                       y_ref, hN_ref, cN_ref,
                       xg_sc, h_sc, c_sc,
                       *, tt_steps, b_pad, h_pad, t_real, guard):
    chunk = pl.program_id(0)
    Bp, Hp = b_pad, h_pad

    @pl.when(chunk == 0)
    def _():
        h_sc[...] = h0_ref[...]
        c_sc[...] = c0_ref[...]

    # Hoisted, time-independent input projection for the whole chunk:
    # one (TT*Bp, D) @ (D, 4Hp) bf16 MXU matmul (f32 accumulate) + bias.
    xg_sc[...] = (jnp.dot(x_ref[...].astype(jnp.bfloat16), wih_ref[...],
                          preferred_element_type=jnp.float32)
                  + b_ref[...])

    # Recurrent weights loaded once per chunk (kept off the per-step chain).
    whh = whh_ref[...]

    def step(s, carry):
        h_prev, c_prev = carry
        off = pl.multiple_of(s * Bp, 8)
        gates = (xg_sc[pl.ds(off, Bp), :]
                 + jnp.dot(h_prev.astype(jnp.bfloat16), whh,
                           preferred_element_type=jnp.float32))
        # Gate slabs packed [i|f|o|g]; i/f/o columns were pre-scaled by 0.5 so
        # sigmoid(z) = 0.5*tanh(0.5*z)+0.5 is one EUP tanh over (Bp, 3Hp).
        ifo = 0.5 * jnp.tanh(gates[:, :3 * Hp]) + 0.5
        i_g = ifo[:, 0 * Hp:1 * Hp]
        f_g = ifo[:, 1 * Hp:2 * Hp]
        o_g = ifo[:, 2 * Hp:3 * Hp]
        g_g = jnp.tanh(gates[:, 3 * Hp:4 * Hp])
        c_new = f_g * c_prev + i_g * g_g
        h_new = o_g * jnp.tanh(c_new)
        if guard:
            # Time axis was padded up to a multiple of TT: freeze the state on
            # padded steps so h_n/c_n equal the state at the real last step.
            valid = (chunk * tt_steps + s) < t_real
            h_new = jnp.where(valid, h_new, h_prev)
            c_new = jnp.where(valid, c_new, c_prev)
        y_ref[pl.ds(off, Bp), :] = h_new
        return h_new, c_new

    # h/c carried in registers across the chunk; scratch only at chunk edges.
    h_fin, c_fin = lax.fori_loop(0, tt_steps, step,
                                 (h_sc[...], c_sc[...]), unroll=True)
    h_sc[...] = h_fin
    c_sc[...] = c_fin

    @pl.when(chunk == pl.num_programs(0) - 1)
    def _():
        hN_ref[...] = h_fin
        cN_ref[...] = c_fin


def lstm_layer(x_flat, h0, c0, w_ih_t, w_hh_t, bias, *, tt, t_real,
               vmem_limit_bytes):
    """One LSTM layer over the full (padded) sequence.

    x_flat: (Tp*Bp, D) f32, time-major, batch padded to Bp, time padded to Tp
    h0, c0: (Bp, Hp) f32
    w_ih_t: (D, 4Hp) bf16, w_hh_t: (Hp, 4Hp) bf16, bias: (1, 4Hp) f32
    returns: y (Tp*Bp, Hp) f32, h_n (Bp, Hp), c_n (Bp, Hp)
    """
    TB, D = x_flat.shape
    Bp, Hp = h0.shape
    T_total = TB // Bp
    assert T_total % tt == 0
    n_chunks = T_total // tt

    kernel = functools.partial(
        _lstm_layer_kernel, tt_steps=tt, b_pad=Bp, h_pad=Hp,
        t_real=t_real, guard=(T_total != t_real))

    out_shape = (
        jax.ShapeDtypeStruct((T_total * Bp, Hp), jnp.float32),  # per-step h
        jax.ShapeDtypeStruct((Bp, Hp), jnp.float32),            # h_n
        jax.ShapeDtypeStruct((Bp, Hp), jnp.float32),            # c_n
    )

    y, h_n, c_n = pl.pallas_call(
        kernel,
        out_shape=out_shape,
        grid=(n_chunks,),
        in_specs=[
            pl.BlockSpec((tt * Bp, D), lambda c: (c, 0)),       # x chunk
            pl.BlockSpec((Bp, Hp), lambda c: (0, 0)),           # h0
            pl.BlockSpec((Bp, Hp), lambda c: (0, 0)),           # c0
            pl.BlockSpec((D, 4 * Hp), lambda c: (0, 0)),        # W_ih^T (bf16)
            pl.BlockSpec((Hp, 4 * Hp), lambda c: (0, 0)),       # W_hh^T (bf16)
            pl.BlockSpec((1, 4 * Hp), lambda c: (0, 0)),        # bias
        ],
        out_specs=(
            pl.BlockSpec((tt * Bp, Hp), lambda c: (c, 0)),      # y chunk
            pl.BlockSpec((Bp, Hp), lambda c: (0, 0)),           # h_n
            pl.BlockSpec((Bp, Hp), lambda c: (0, 0)),           # c_n
        ),
        scratch_shapes=[
            pltpu.VMEM((tt * Bp, 4 * Hp), jnp.float32),  # hoisted x-projection
            pltpu.VMEM((Bp, Hp), jnp.float32),           # h carry
            pltpu.VMEM((Bp, Hp), jnp.float32),           # c carry
        ],
        compiler_params=pltpu.CompilerParams(
            dimension_semantics=("arbitrary",),
            vmem_limit_bytes=vmem_limit_bytes),
    )(x_flat, h0, c0, w_ih_t, w_hh_t, bias)
    return y, h_n, c_n


# ----------------------------------------------------------------------------
# Linear output head: row-tiled (N, K) @ (K, D) + (1, D), bf16 MXU / f32 acc
# ----------------------------------------------------------------------------
def _linear_kernel(x_ref, w_ref, b_ref, o_ref):
    o_ref[...] = (jnp.dot(x_ref[...].astype(jnp.bfloat16), w_ref[...],
                          preferred_element_type=jnp.float32)
                  + b_ref[...])


def linear(x, w_t_bf16, b, *, block_rows=512):
    N, K = x.shape
    D = w_t_bf16.shape[-1]
    br = min(block_rows, _round_up(N, 8))
    Np = _round_up(N, br)
    if Np != N:
        x = jnp.pad(x, ((0, Np - N), (0, 0)))
    out = pl.pallas_call(
        _linear_kernel,
        out_shape=jax.ShapeDtypeStruct((Np, D), jnp.float32),
        grid=(Np // br,),
        in_specs=[
            pl.BlockSpec((br, K), lambda i: (i, 0)),
            pl.BlockSpec((K, D), lambda i: (0, 0)),
            pl.BlockSpec((1, D), lambda i: (0, 0)),
        ],
        out_specs=pl.BlockSpec((br, D), lambda i: (i, 0)),
        compiler_params=pltpu.CompilerParams(
            dimension_semantics=("parallel",)),
    )(x, w_t_bf16, b)
    return out[:N]


# ----------------------------------------------------------------------------
# VMEM-budget-derived time-chunk size (works across v5e / v6e / v7x)
# ----------------------------------------------------------------------------
_VMEM_LIMIT_BYTES = 48 * 1024 * 1024   # < v7x 64 MiB physical, > v5e 16 MiB default
_VMEM_TT_BUDGET = 36 * 1024 * 1024     # headroom under the scoped limit


def _choose_tt(T, Bp, D, Hp):
    f32, bf16 = 4, 2
    # Bytes that scale with TT: xg scratch + double-buffered x-in / y-out chunks.
    per_step = Bp * (4 * Hp * f32 + 2 * D * f32 + 2 * Hp * f32)
    # Roughly fixed: double-buffered bf16 weights, bias, h/c blocks, slack.
    fixed = (2 * bf16 * (D + Hp) * 4 * Hp + 2 * f32 * 4 * Hp
             + 10 * f32 * Bp * Hp + (1 << 20))
    tt = (_VMEM_TT_BUDGET - fixed) // max(per_step, 1)
    tt = int(max(1, min(tt, 64, T)))
    # Balance chunk sizes so the padded time tail is smaller than one chunk.
    n_chunks = -(-T // tt)
    return -(-T // n_chunks)


# ----------------------------------------------------------------------------
# Full module forward (padding/transpose glue in plain JAX; hot paths Pallas)
# ----------------------------------------------------------------------------
def lstm_module_forward(params, x_btd, lstm_state):
    """Equivalent of LSTM.forward(input, lstm_state).

    x_btd: (B, T, input_size) float32 (batch_first)
    lstm_state: (h0, c0) each (num_layers, B, hidden_size)
    returns: (output (B*T, input_size), (h_n, c_n))
    """
    h0_all, c0_all = lstm_state
    B, T, D_in = x_btd.shape
    H = h0_all.shape[-1]

    # Feed the full real batch through the recurrent matmul; pad only to the
    # 8-row sublane granule. Hidden padded to a 128-lane multiple so each gate
    # sits on its own lane-aligned slab.
    Bp = _round_up(max(B, 8), 8)
    Hp = _round_up(H, 128)
    TT = _choose_tt(T, Bp, max(D_in, Hp), Hp)
    n_chunks = -(-T // TT)
    Tp = n_chunks * TT

    # batch_first -> time-major, pad time (to TT multiple) + batch, flatten 2-D
    x = jnp.transpose(x_btd, (1, 0, 2))                      # (T, B, D)
    x = jnp.pad(x, ((0, Tp - T), (0, Bp - B), (0, 0)))       # (Tp, Bp, D)
    x = x.reshape(Tp * Bp, D_in)

    h_finals, c_finals = [], []
    for k, lp in enumerate(params["lstm_layers"]):
        d_in = x.shape[-1]
        wih = _pad_rows(_pack_gates(lp["w_ih_t"], H, Hp), d_in).astype(jnp.bfloat16)
        whh = _pad_rows(_pack_gates(lp["w_hh_t"], H, Hp), Hp).astype(jnp.bfloat16)
        b = _pack_gates(lp["bias"], H, Hp)
        h0 = jnp.pad(h0_all[k], ((0, Bp - B), (0, Hp - H)))
        c0 = jnp.pad(c0_all[k], ((0, Bp - B), (0, Hp - H)))
        x, h_n, c_n = lstm_layer(x, h0, c0, wih, whh, b, tt=TT, t_real=T,
                                 vmem_limit_bytes=_VMEM_LIMIT_BYTES)
        h_finals.append(h_n[:B, :H])
        c_finals.append(c_n[:B, :H])

    # Linear head on time-major rows first (drop padded time steps); only the
    # small (T, Bp, input_size) head output is transposed to batch-first.
    y = x.reshape(Tp, Bp, Hp)[:T].reshape(T * Bp, Hp)
    w_out = _pad_rows(params["out_w_t"], Hp).astype(jnp.bfloat16)
    out_tm = linear(y, w_out, params["out_b"])               # (T*Bp, input_size)
    out = jnp.transpose(out_tm.reshape(T, Bp, D_in), (1, 0, 2))[:B]
    out = out.reshape(B * T, D_in)

    h_n = jnp.stack(h_finals, axis=0)
    c_n = jnp.stack(c_finals, axis=0)
    return out, (h_n, c_n)


# ----------------------------------------------------------------------------
# Pure-JAX f32 reference for verification (unpadded, standard gate order)
# ----------------------------------------------------------------------------
def lstm_module_reference(params, x_btd, lstm_state):
    h0_all, c0_all = lstm_state
    B, T, _ = x_btd.shape
    H = h0_all.shape[-1]
    x = jnp.transpose(x_btd, (1, 0, 2))
    h_finals, c_finals = [], []
    for k, layer_p in enumerate(params["lstm_layers"]):
        w_ih_t, w_hh_t, bias = layer_p["w_ih_t"], layer_p["w_hh_t"], layer_p["bias"]

        def step(carry, x_t):
            h, c = carry
            gates = x_t @ w_ih_t + h @ w_hh_t + bias
            i = jax.nn.sigmoid(gates[:, 0 * H:1 * H])
            f = jax.nn.sigmoid(gates[:, 1 * H:2 * H])
            g = jnp.tanh(gates[:, 2 * H:3 * H])
            o = jax.nn.sigmoid(gates[:, 3 * H:4 * H])
            c_new = f * c + i * g
            h_new = o * jnp.tanh(c_new)
            return (h_new, c_new), h_new

        (h_n, c_n), ys = jax.lax.scan(step, (h0_all[k], c0_all[k]), x)
        x = ys
        h_finals.append(h_n)
        c_finals.append(c_n)
    y = jnp.transpose(x, (1, 0, 2)).reshape(B * T, -1)
    out = y @ params["out_w_t"] + params["out_b"]
    return out, (jnp.stack(h_finals), jnp.stack(c_finals))


# ----------------------------------------------------------------------------
# Deterministic parameter init (mirrors nn.LSTM / nn.Linear shapes)
# ----------------------------------------------------------------------------
def init_params(key, input_size, hidden_size, num_layers):
    H = hidden_size
    bound = 1.0 / jnp.sqrt(jnp.float32(H))
    layers = []
    for k in range(num_layers):
        d_in = input_size if k == 0 else hidden_size
        key, k1, k2, k3, k4 = jax.random.split(key, 5)
        w_ih = jax.random.uniform(k1, (4 * H, d_in), jnp.float32, -bound, bound)
        w_hh = jax.random.uniform(k2, (4 * H, H), jnp.float32, -bound, bound)
        b_ih = jax.random.uniform(k3, (4 * H,), jnp.float32, -bound, bound)
        b_hh = jax.random.uniform(k4, (4 * H,), jnp.float32, -bound, bound)
        layers.append(dict(
            w_ih_t=w_ih.T,                              # (d_in, 4H)
            w_hh_t=w_hh.T,                              # (H, 4H)
            bias=(b_ih + b_hh).reshape(1, 4 * H),       # (1, 4H)
        ))
    key, k5, k6 = jax.random.split(key, 3)
    lin_bound = 1.0 / jnp.sqrt(jnp.float32(H))
    out_w = jax.random.uniform(k5, (input_size, H), jnp.float32, -lin_bound, lin_bound)
    out_b = jax.random.uniform(k6, (input_size,), jnp.float32, -lin_bound, lin_bound)
    return dict(
        lstm_layers=layers,
        out_w_t=out_w.T,                 # (H, input_size)
        out_b=out_b.reshape(1, -1),      # (1, input_size)
    )


if __name__ == "__main__":
    input_size, hidden_size, num_layers = 16, 32, 2
    batch, seq = 2, 8

    root = jax.random.PRNGKey(0)
    k_param, k_x = jax.random.split(root)

    params = init_params(k_param, input_size, hidden_size, num_layers)
    x = jax.random.normal(k_x, (batch, seq, input_size), jnp.float32)

    # init_lstm_state(num_inputs=batch): zeros of (num_layers, batch, hidden)
    h0 = jnp.zeros((num_layers, batch, hidden_size), jnp.float32)
    c0 = jnp.zeros((num_layers, batch, hidden_size), jnp.float32)

    fwd = jax.jit(lstm_module_forward)
    out, (h_n, c_n) = fwd(params, x, (h0, c0))
    jax.block_until_ready((out, h_n, c_n))

    # Sanity check against an f32 pure-JAX reference (kernel uses bf16 MXU
    # operands with f32 accumulation, hence the looser tolerance).
    ref_out, (ref_h, ref_c) = lstm_module_reference(params, x, (h0, c0))
    assert out.shape == (batch * seq, input_size)
    assert h_n.shape == (num_layers, batch, hidden_size)
    assert c_n.shape == (num_layers, batch, hidden_size)
    assert jnp.allclose(out, ref_out, atol=3e-2, rtol=3e-2), "output mismatch"
    assert jnp.allclose(h_n, ref_h, atol=3e-2, rtol=3e-2), "h_n mismatch"
    assert jnp.allclose(c_n, ref_c, atol=3e-2, rtol=3e-2), "c_n mismatch"

    print("KERNEL_OK")
</pallas_src>

<mosaic_0001>
module attributes {stable_mosaic.version = 11 : i64} {
  func.func @_lstm_layer_kernel(%arg0: i32, %arg1: memref<64x128xf32, #tpu.memory_space<vmem>>, %arg2: memref<8x128xf32, #tpu.memory_space<vmem>>, %arg3: memref<8x128xf32, #tpu.memory_space<vmem>>, %arg4: memref<128x512xbf16, #tpu.memory_space<vmem>>, %arg5: memref<128x512xbf16, #tpu.memory_space<vmem>>, %arg6: memref<1x512xf32, #tpu.memory_space<vmem>>, %arg7: memref<64x128xf32, #tpu.memory_space<vmem>>, %arg8: memref<8x128xf32, #tpu.memory_space<vmem>>, %arg9: memref<8x128xf32, #tpu.memory_space<vmem>>, %arg10: memref<64x512xf32, #tpu.memory_space<vmem>>, %arg11: memref<8x128xf32, #tpu.memory_space<vmem>>, %arg12: memref<8x128xf32, #tpu.memory_space<vmem>>) attributes {dimension_semantics = [#tpu.dimension_semantics<arbitrary>], iteration_bounds = array<i64: 1>, scalar_prefetch = 0 : i64, scratch_operands = 3 : i64, tpu.core_type = #tpu.core_type<tc>, window_params = [{transform_indices = @transform_0, window_bounds = array<i64: 64, 128>}, {pipeline_mode = #tpu.pipeline_mode<synchronous>, transform_indices = @transform_1, window_bounds = array<i64: 8, 128>}, {pipeline_mode = #tpu.pipeline_mode<synchronous>, transform_indices = @transform_2, window_bounds = array<i64: 8, 128>}, {pipeline_mode = #tpu.pipeline_mode<synchronous>, transform_indices = @transform_3, window_bounds = array<i64: 128, 512>}, {pipeline_mode = #tpu.pipeline_mode<synchronous>, transform_indices = @transform_4, window_bounds = array<i64: 128, 512>}, {pipeline_mode = #tpu.pipeline_mode<synchronous>, transform_indices = @transform_5, window_bounds = array<i64: 1, 512>}, {transform_indices = @transform_6, window_bounds = array<i64: 64, 128>}, {pipeline_mode = #tpu.pipeline_mode<synchronous>, transform_indices = @transform_7, window_bounds = array<i64: 8, 128>}, {pipeline_mode = #tpu.pipeline_mode<synchronous>, transform_indices = @transform_8, window_bounds = array<i64: 8, 128>}]} {
    %c0_i32 = arith.constant 0 : i32
    %0 = arith.cmpi eq, %arg0, %c0_i32 : i32
    %1 = arith.extui %0 : i1 to i32
    %c0_i32_0 = arith.constant 0 : i32
    %2 = arith.cmpi ne, %1, %c0_i32_0 : i32
    scf.if %2 {
      %c0_69 = arith.constant 0 : index
      %c0_70 = arith.constant 0 : index
      %219 = vector.load %arg2[%c0_69, %c0_70] : memref<8x128xf32, #tpu.memory_space<vmem>>, vector<8x128xf32>
      %c0_71 = arith.constant 0 : index
      %c0_72 = arith.constant 0 : index
      %220 = vector.load %arg11[%c0_71, %c0_72] : memref<8x128xf32, #tpu.memory_space<vmem>>, vector<8x128xf32>
      tpu.vector_store %arg11[%c0_71, %c0_72], %219 {strides = array<i32>} : memref<8x128xf32, #tpu.memory_space<vmem>>, vector<8x128xf32>,
      %c0_73 = arith.constant 0 : index
      %c0_74 = arith.constant 0 : index
      %221 = vector.load %arg3[%c0_73, %c0_74] : memref<8x128xf32, #tpu.memory_space<vmem>>, vector<8x128xf32>
      %c0_75 = arith.constant 0 : index
      %c0_76 = arith.constant 0 : index
      %222 = vector.load %arg12[%c0_75, %c0_76] : memref<8x128xf32, #tpu.memory_space<vmem>>, vector<8x128xf32>
      tpu.vector_store %arg12[%c0_75, %c0_76], %221 {strides = array<i32>} : memref<8x128xf32, #tpu.memory_space<vmem>>, vector<8x128xf32>,
    } else {
    }
    %c0 = arith.constant 0 : index
    %c0_1 = arith.constant 0 : index
    %3 = vector.load %arg1[%c0, %c0_1] : memref<64x128xf32, #tpu.memory_space<vmem>>, vector<64x128xf32>
    %4 = arith.truncf %3 : vector<64x128xf32> to vector<64x128xbf16>
    %c0_2 = arith.constant 0 : index
    %c0_3 = arith.constant 0 : index
    %5 = vector.load %arg4[%c0_2, %c0_3] : memref<128x512xbf16, #tpu.memory_space<vmem>>, vector<128x512xbf16>
    %cst = arith.constant dense<0.000000e+00> : vector<64x512xf32>
    %6 = tpu.matmul %4, %5, %cst {dimension_numbers = #tpu.dot_dimension_numbers<[1], [0], [0], [1], [0, 0, 1, 1], [], []>} : vector<64x128xbf16>, vector<128x512xbf16>, vector<64x512xf32> -> vector<64x512xf32>
    %c0_4 = arith.constant 0 : index
    %c0_5 = arith.constant 0 : index
    %7 = vector.load %arg6[%c0_4, %c0_5] : memref<1x512xf32, #tpu.memory_space<vmem>>, vector<1x512xf32>
    %8 = vector.broadcast %7 : vector<1x512xf32> to vector<64x512xf32>
    %9 = arith.addf %6, %8 : vector<64x512xf32>
    %c0_6 = arith.constant 0 : index
    %c0_7 = arith.constant 0 : index
    %10 = vector.load %arg10[%c0_6, %c0_7] : memref<64x512xf32, #tpu.memory_space<vmem>>, vector<64x512xf32>
    tpu.vector_store %arg10[%c0_6, %c0_7], %9 {strides = array<i32>} : memref<64x512xf32, #tpu.memory_space<vmem>>, vector<64x512xf32>,
    %c0_8 = arith.constant 0 : index
    %c0_9 = arith.constant 0 : index
    %11 = vector.load %arg5[%c0_8, %c0_9] : memref<128x512xbf16, #tpu.memory_space<vmem>>, vector<128x512xbf16>
    %c0_10 = arith.constant 0 : index
    %c0_11 = arith.constant 0 : index
    %12 = vector.load %arg11[%c0_10, %c0_11] : memref<8x128xf32, #tpu.memory_space<vmem>>, vector<8x128xf32>
    %c0_12 = arith.constant 0 : index
    %c0_13 = arith.constant 0 : index
    %13 = vector.load %arg12[%c0_12, %c0_13] : memref<8x128xf32, #tpu.memory_space<vmem>>, vector<8x128xf32>
    %c0_i32_14 = arith.constant 0 : i32
    %c8_i32 = arith.constant 8 : i32
    %14 = arith.muli %c0_i32_14, %c8_i32 : i32
    %15 = tpu.assume_multiple %14, 8 : i32
    %16 = arith.index_cast %15 : i32 to index
    %c0_15 = arith.constant 0 : index
    %17 = vector.load %arg10[%16, %c0_15] : memref<64x512xf32, #tpu.memory_space<vmem>>, vector<8x512xf32>
    %18 = arith.truncf %12 : vector<8x128xf32> to vector<8x128xbf16>
    %cst_16 = arith.constant dense<0.000000e+00> : vector<8x512xf32>
    %19 = tpu.matmul %18, %11, %cst_16 {dimension_numbers = #tpu.dot_dimension_numbers<[1], [0], [0], [1], [0, 0, 1, 1], [], []>} : vector<8x128xbf16>, vector<128x512xbf16>, vector<8x512xf32> -> vector<8x512xf32>
    %20 = arith.addf %17, %19 : vector<8x512xf32>
    %21 = vector.extract_strided_slice %20 {offsets = [0, 0], sizes = [8, 384], strides = [1, 1]} : vector<8x512xf32> to vector<8x384xf32>
    %22 = math.tanh %21 : vector<8x384xf32>
    %cst_17 = arith.constant 5.000000e-01 : f32
    %23 = vector.broadcast %cst_17 : f32 to vector<8x384xf32>
    %24 = arith.mulf %23, %22 : vector<8x384xf32>
    %cst_18 = arith.constant 5.000000e-01 : f32
    %25 = vector.broadcast %cst_18 : f32 to vector<8x384xf32>
    %26 = arith.addf %24, %25 : vector<8x384xf32>
    %27 = vector.extract_strided_slice %26 {offsets = [0, 0], sizes = [8, 128], strides = [1, 1]} : vector<8x384xf32> to vector<8x128xf32>
    %28 = vector.extract_strided_slice %26 {offsets = [0, 128], sizes = [8, 128], strides = [1, 1]} : vector<8x384xf32> to vector<8x128xf32>
    %29 = vector.extract_strided_slice %26 {offsets = [0, 256], sizes = [8, 128], strides = [1, 1]} : vector<8x384xf32> to vector<8x128xf32>
    %30 = vector.extract_strided_slice %20 {offsets = [0, 384], sizes = [8, 128], strides = [1, 1]} : vector<8x512xf32> to vector<8x128xf32>
    %31 = math.tanh %30 : vector<8x128xf32>
    %32 = arith.mulf %28, %13 : vector<8x128xf32>
    %33 = arith.mulf %27, %31 : vector<8x128xf32>
    %34 = arith.addf %32, %33 : vector<8x128xf32>
    %35 = math.tanh %34 : vector<8x128xf32>
    %36 = arith.mulf %29, %35 : vector<8x128xf32>
    %37 = arith.index_cast %15 : i32 to index
    %c0_19 = arith.constant 0 : index
    %38 = vector.load %arg7[%37, %c0_19] : memref<64x128xf32, #tpu.memory_space<vmem>>, vector<8x128xf32>
    tpu.vector_store %arg7[%37, %c0_19], %36 {strides = array<i32>} : memref<64x128xf32, #tpu.memory_space<vmem>>, vector<8x128xf32>,
    %c1_i32 = arith.constant 1 : i32
    %c8_i32_20 = arith.constant 8 : i32
    %39 = arith.muli %c1_i32, %c8_i32_20 : i32
    %40 = tpu.assume_multiple %39, 8 : i32
    %41 = arith.index_cast %40 : i32 to index
    %c0_21 = arith.constant 0 : index
    %42 = vector.load %arg10[%41, %c0_21] : memref<64x512xf32, #tpu.memory_space<vmem>>, vector<8x512xf32>
    %43 = arith.truncf %36 : vector<8x128xf32> to vector<8x128xbf16>
    %cst_22 = arith.constant dense<0.000000e+00> : vector<8x512xf32>
    %44 = tpu.matmul %43, %11, %cst_22 {dimension_numbers = #tpu.dot_dimension_numbers<[1], [0], [0], [1], [0, 0, 1, 1], [], []>} : vector<8x128xbf16>, vector<128x512xbf16>, vector<8x512xf32> -> vector<8x512xf32>
    %45 = arith.addf %42, %44 : vector<8x512xf32>
    %46 = vector.extract_strided_slice %45 {offsets = [0, 0], sizes = [8, 384], strides = [1, 1]} : vector<8x512xf32> to vector<8x384xf32>
    %47 = math.tanh %46 : vector<8x384xf32>
    %cst_23 = arith.constant 5.000000e-01 : f32
    %48 = vector.broadcast %cst_23 : f32 to vector<8x384xf32>
    %49 = arith.mulf %48, %47 : vector<8x384xf32>
    %cst_24 = arith.constant 5.000000e-01 : f32
    %50 = vector.broadcast %cst_24 : f32 to vector<8x384xf32>
    %51 = arith.addf %49, %50 : vector<8x384xf32>
    %52 = vector.extract_strided_slice %51 {offsets = [0, 0], sizes = [8, 128], strides = [1, 1]} : vector<8x384xf32> to vector<8x128xf32>
    %53 = vector.extract_strided_slice %51 {offsets = [0, 128], sizes = [8, 128], strides = [1, 1]} : vector<8x384xf32> to vector<8x128xf32>
    %54 = vector.extract_strided_slice %51 {offsets = [0, 256], sizes = [8, 128], strides = [1, 1]} : vector<8x384xf32> to vector<8x128xf32>
    %55 = vector.extract_strided_slice %45 {offsets = [0, 384], sizes = [8, 128], strides = [1, 1]} : vector<8x512xf32> to vector<8x128xf32>
    %56 = math.tanh %55 : vector<8x128xf32>
    %57 = arith.mulf %53, %34 : vector<8x128xf32>
    %58 = arith.mulf %52, %56 : vector<8x128xf32>
    %59 = arith.addf %57, %58 : vector<8x128xf32>
    %60 = math.tanh %59 : vector<8x128xf32>
    %61 = arith.mulf %54, %60 : vector<8x128xf32>
    %62 = arith.index_cast %40 : i32 to index
    %c0_25 = arith.constant 0 : index
    %63 = vector.load %arg7[%62, %c0_25] : memref<64x128xf32, #tpu.memory_space<vmem>>, vector<8x128xf32>
    tpu.vector_store %arg7[%62, %c0_25], %61 {strides = array<i32>} : memref<64x128xf32, #tpu.memory_space<vmem>>, vector<8x128xf32>,
    %c2_i32 = arith.constant 2 : i32
    %c8_i32_26 = arith.constant 8 : i32
    %64 = arith.muli %c2_i32, %c8_i32_26 : i32
    %65 = tpu.assume_multiple %64, 8 : i32
    %66 = arith.index_cast %65 : i32 to index
    %c0_27 = arith.constant 0 : index
    %67 = vector.load %arg10[%66, %c0_27] : memref<64x512xf32, #tpu.memory_space<vmem>>, vector<8x512xf32>
    %68 = arith.truncf %61 : vector<8x128xf32> to vector<8x128xbf16>
    %cst_28 = arith.constant dense<0.000000e+00> : vector<8x512xf32>
    %69 = tpu.matmul %68, %11, %cst_28 {dimension_numbers = #tpu.dot_dimension_numbers<[1], [0], [0], [1], [0, 0, 1, 1], [], []>} : vector<8x128xbf16>, vector<128x512xbf16>, vector<8x512xf32> -> vector<8x512xf32>
    %70 = arith.addf %67, %69 : vector<8x512xf32>
    %71 = vector.extract_strided_slice %70 {offsets = [0, 0], sizes = [8, 384], strides = [1, 1]} : vector<8x512xf32> to vector<8x384xf32>
    %72 = math.tanh %71 : vector<8x384xf32>
    %cst_29 = arith.constant 5.000000e-01 : f32
    %73 = vector.broadcast %cst_29 : f32 to vector<8x384xf32>
    %74 = arith.mulf %73, %72 : vector<8x384xf32>
    %cst_30 = arith.constant 5.000000e-01 : f32
    %75 = vector.broadcast %cst_30 : f32 to vector<8x384xf32>
    %76 = arith.addf %74, %75 : vector<8x384xf32>
    %77 = vector.extract_strided_slice %76 {offsets = [0, 0], sizes = [8, 128], strides = [1, 1]} : vector<8x384xf32> to vector<8x128xf32>
    %78 = vector.extract_strided_slice %76 {offsets = [0, 128], sizes = [8, 128], strides = [1, 1]} : vector<8x384xf32> to vector<8x128xf32>
    %79 = vector.extract_strided_slice %76 {offsets = [0, 256], sizes = [8, 128], strides = [1, 1]} : vector<8x384xf32> to vector<8x128xf32>
    %80 = vector.extract_strided_slice %70 {offsets = [0, 384], sizes = [8, 128], strides = [1, 1]} : vector<8x512xf32> to vector<8x128xf32>
    %81 = math.tanh %80 : vector<8x128xf32>
    %82 = arith.mulf %78, %59 : vector<8x128xf32>
    %83 = arith.mulf %77, %81 : vector<8x128xf32>
    %84 = arith.addf %82, %83 : vector<8x128xf32>
    %85 = math.tanh %84 : vector<8x128xf32>
    %86 = arith.mulf %79, %85 : vector<8x128xf32>
    %87 = arith.index_cast %65 : i32 to index
    %c0_31 = arith.constant 0 : index
    %88 = vector.load %arg7[%87, %c0_31] : memref<64x128xf32, #tpu.memory_space<vmem>>, vector<8x128xf32>
    tpu.vector_store %arg7[%87, %c0_31], %86 {strides = array<i32>} : memref<64x128xf32, #tpu.memory_space<vmem>>, vector<8x128xf32>,
    %c3_i32 = arith.constant 3 : i32
    %c8_i32_32 = arith.constant 8 : i32
    %89 = arith.muli %c3_i32, %c8_i32_32 : i32
    %90 = tpu.assume_multiple %89, 8 : i32
    %91 = arith.index_cast %90 : i32 to index
    %c0_33 = arith.constant 0 : index
    %92 = vector.load %arg10[%91, %c0_33] : memref<64x512xf32, #tpu.memory_space<vmem>>, vector<8x512xf32>
    %93 = arith.truncf %86 : vector<8x128xf32> to vector<8x128xbf16>
    %cst_34 = arith.constant dense<0.000000e+00> : vector<8x512xf32>
    %94 = tpu.matmul %93, %11, %cst_34 {dimension_numbers = #tpu.dot_dimension_numbers<[1], [0], [0], [1], [0, 0, 1, 1], [], []>} : vector<8x128xbf16>, vector<128x512xbf16>, vector<8x512xf32> -> vector<8x512xf32>
    %95 = arith.addf %92, %94 : vector<8x512xf32>
    %96 = vector.extract_strided_slice %95 {offsets = [0, 0], sizes = [8, 384], strides = [1, 1]} : vector<8x512xf32> to vector<8x384xf32>
    %97 = math.tanh %96 : vector<8x384xf32>
    %cst_35 = arith.constant 5.000000e-01 : f32
    %98 = vector.broadcast %cst_35 : f32 to vector<8x384xf32>
    %99 = arith.mulf %98, %97 : vector<8x384xf32>
    %cst_36 = arith.constant 5.000000e-01 : f32
    %100 = vector.broadcast %cst_36 : f32 to vector<8x384xf32>
    %101 = arith.addf %99, %100 : vector<8x384xf32>
    %102 = vector.extract_strided_slice %101 {offsets = [0, 0], sizes = [8, 128], strides = [1, 1]} : vector<8x384xf32> to vector<8x128xf32>
    %103 = vector.extract_strided_slice %101 {offsets = [0, 128], sizes = [8, 128], strides = [1, 1]} : vector<8x384xf32> to vector<8x128xf32>
    %104 = vector.extract_strided_slice %101 {offsets = [0, 256], sizes = [8, 128], strides = [1, 1]} : vector<8x384xf32> to vector<8x128xf32>
    %105 = vector.extract_strided_slice %95 {offsets = [0, 384], sizes = [8, 128], strides = [1, 1]} : vector<8x512xf32> to vector<8x128xf32>
    %106 = math.tanh %105 : vector<8x128xf32>
    %107 = arith.mulf %103, %84 : vector<8x128xf32>
    %108 = arith.mulf %102, %106 : vector<8x128xf32>
    %109 = arith.addf %107, %108 : vector<8x128xf32>
    %110 = math.tanh %109 : vector<8x128xf32>
    %111 = arith.mulf %104, %110 : vector<8x128xf32>
    %112 = arith.index_cast %90 : i32 to index
    %c0_37 = arith.constant 0 : index
    %113 = vector.load %arg7[%112, %c0_37] : memref<64x128xf32, #tpu.memory_space<vmem>>, vector<8x128xf32>
    tpu.vector_store %arg7[%112, %c0_37], %111 {strides = array<i32>} : memref<64x128xf32, #tpu.memory_space<vmem>>, vector<8x128xf32>,
    %c4_i32 = arith.constant 4 : i32
    %c8_i32_38 = arith.constant 8 : i32
    %114 = arith.muli %c4_i32, %c8_i32_38 : i32
    %115 = tpu.assume_multiple %114, 8 : i32
    %116 = arith.index_cast %115 : i32 to index
    %c0_39 = arith.constant 0 : index
    %117 = vector.load %arg10[%116, %c0_39] : memref<64x512xf32, #tpu.memory_space<vmem>>, vector<8x512xf32>
    %118 = arith.truncf %111 : vector<8x128xf32> to vector<8x128xbf16>
    %cst_40 = arith.constant dense<0.000000e+00> : vector<8x512xf32>
    %119 = tpu.matmul %118, %11, %cst_40 {dimension_numbers = #tpu.dot_dimension_numbers<[1], [0], [0], [1], [0, 0, 1, 1], [], []>} : vector<8x128xbf16>, vector<128x512xbf16>, vector<8x512xf32> -> vector<8x512xf32>
    %120 = arith.addf %117, %119 : vector<8x512xf32>
    %121 = vector.extract_strided_slice %120 {offsets = [0, 0], sizes = [8, 384], strides = [1, 1]} : vector<8x512xf32> to vector<8x384xf32>
    %122 = math.tanh %121 : vector<8x384xf32>
    %cst_41 = arith.constant 5.000000e-01 : f32
    %123 = vector.broadcast %cst_41 : f32 to vector<8x384xf32>
    %124 = arith.mulf %123, %122 : vector<8x384xf32>
    %cst_42 = arith.constant 5.000000e-01 : f32
    %125 = vector.broadcast %cst_42 : f32 to vector<8x384xf32>
    %126 = arith.addf %124, %125 : vector<8x384xf32>
    %127 = vector.extract_strided_slice %126 {offsets = [0, 0], sizes = [8, 128], strides = [1, 1]} : vector<8x384xf32> to vector<8x128xf32>
    %128 = vector.extract_strided_slice %126 {offsets = [0, 128], sizes = [8, 128], strides = [1, 1]} : vector<8x384xf32> to vector<8x128xf32>
    %129 = vector.extract_strided_slice %126 {offsets = [0, 256], sizes = [8, 128], strides = [1, 1]} : vector<8x384xf32> to vector<8x128xf32>
    %130 = vector.extract_strided_slice %120 {offsets = [0, 384], sizes = [8, 128], strides = [1, 1]} : vector<8x512xf32> to vector<8x128xf32>
    %131 = math.tanh %130 : vector<8x128xf32>
    %132 = arith.mulf %128, %109 : vector<8x128xf32>
    %133 = arith.mulf %127, %131 : vector<8x128xf32>
    %134 = arith.addf %132, %133 : vector<8x128xf32>
    %135 = math.tanh %134 : vector<8x128xf32>
    %136 = arith.mulf %129, %135 : vector<8x128xf32>
    %137 = arith.index_cast %115 : i32 to index
    %c0_43 = arith.constant 0 : index
    %138 = vector.load %arg7[%137, %c0_43] : memref<64x128xf32, #tpu.memory_space<vmem>>, vector<8x128xf32>
    tpu.vector_store %arg7[%137, %c0_43], %136 {strides = array<i32>} : memref<64x128xf32, #tpu.memory_space<vmem>>, vector<8x128xf32>,
    %c5_i32 = arith.constant 5 : i32
    %c8_i32_44 = arith.constant 8 : i32
    %139 = arith.muli %c5_i32, %c8_i32_44 : i32
    %140 = tpu.assume_multiple %139, 8 : i32
    %141 = arith.index_cast %140 : i32 to index
    %c0_45 = arith.constant 0 : index
    %142 = vector.load %arg10[%141, %c0_45] : memref<64x512xf32, #tpu.memory_space<vmem>>, vector<8x512xf32>
    %143 = arith.truncf %136 : vector<8x128xf32> to vector<8x128xbf16>
    %cst_46 = arith.constant dense<0.000000e+00> : vector<8x512xf32>
    %144 = tpu.matmul %143, %11, %cst_46 {dimension_numbers = #tpu.dot_dimension_numbers<[1], [0], [0], [1], [0, 0, 1, 1], [], []>} : vector<8x128xbf16>, vector<128x512xbf16>, vector<8x512xf32> -> vector<8x512xf32>
    %145 = arith.addf %142, %144 : vector<8x512xf32>
    %146 = vector.extract_strided_slice %145 {offsets = [0, 0], sizes = [8, 384], strides = [1, 1]} : vector<8x512xf32> to vector<8x384xf32>
    %147 = math.tanh %146 : vector<8x384xf32>
    %cst_47 = arith.constant 5.000000e-01 : f32
    %148 = vector.broadcast %cst_47 : f32 to vector<8x384xf32>
    %149 = arith.mulf %148, %147 : vector<8x384xf32>
    %cst_48 = arith.constant 5.000000e-01 : f32
    %150 = vector.broadcast %cst_48 : f32 to vector<8x384xf32>
    %151 = arith.addf %149, %150 : vector<8x384xf32>
    %152 = vector.extract_strided_slice %151 {offsets = [0, 0], sizes = [8, 128], strides = [1, 1]} : vector<8x384xf32> to vector<8x128xf32>
    %153 = vector.extract_strided_slice %151 {offsets = [0, 128], sizes = [8, 128], strides = [1, 1]} : vector<8x384xf32> to vector<8x128xf32>
    %154 = vector.extract_strided_slice %151 {offsets = [0, 256], sizes = [8, 128], strides = [1, 1]} : vector<8x384xf32> to vector<8x128xf32>
    %155 = vector.extract_strided_slice %145 {offsets = [0, 384], sizes = [8, 128], strides = [1, 1]} : vector<8x512xf32> to vector<8x128xf32>
    %156 = math.tanh %155 : vector<8x128xf32>
    %157 = arith.mulf %153, %134 : vector<8x128xf32>
    %158 = arith.mulf %152, %156 : vector<8x128xf32>
    %159 = arith.addf %157, %158 : vector<8x128xf32>
    %160 = math.tanh %159 : vector<8x128xf32>
    %161 = arith.mulf %154, %160 : vector<8x128xf32>
    %162 = arith.index_cast %140 : i32 to index
    %c0_49 = arith.constant 0 : index
    %163 = vector.load %arg7[%162, %c0_49] : memref<64x128xf32, #tpu.memory_space<vmem>>, vector<8x128xf32>
    tpu.vector_store %arg7[%162, %c0_49], %161 {strides = array<i32>} : memref<64x128xf32, #tpu.memory_space<vmem>>, vector<8x128xf32>,
    %c6_i32 = arith.constant 6 : i32
    %c8_i32_50 = arith.constant 8 : i32
    %164 = arith.muli %c6_i32, %c8_i32_50 : i32
    %165 = tpu.assume_multiple %164, 8 : i32
    %166 = arith.index_cast %165 : i32 to index
    %c0_51 = arith.constant 0 : index
    %167 = vector.load %arg10[%166, %c0_51] : memref<64x512xf32, #tpu.memory_space<vmem>>, vector<8x512xf32>
    %168 = arith.truncf %161 : vector<8x128xf32> to vector<8x128xbf16>
    %cst_52 = arith.constant dense<0.000000e+00> : vector<8x512xf32>
    %169 = tpu.matmul %168, %11, %cst_52 {dimension_numbers = #tpu.dot_dimension_numbers<[1], [0], [0], [1], [0, 0, 1, 1], [], []>} : vector<8x128xbf16>, vector<128x512xbf16>, vector<8x512xf32> -> vector<8x512xf32>
    %170 = arith.addf %167, %169 : vector<8x512xf32>
    %171 = vector.extract_strided_slice %170 {offsets = [0, 0], sizes = [8, 384], strides = [1, 1]} : vector<8x512xf32> to vector<8x384xf32>
    %172 = math.tanh %171 : vector<8x384xf32>
    %cst_53 = arith.constant 5.000000e-01 : f32
    %173 = vector.broadcast %cst_53 : f32 to vector<8x384xf32>
    %174 = arith.mulf %173, %172 : vector<8x384xf32>
    %cst_54 = arith.constant 5.000000e-01 : f32
    %175 = vector.broadcast %cst_54 : f32 to vector<8x384xf32>
    %176 = arith.addf %174, %175 : vector<8x384xf32>
    %177 = vector.extract_strided_slice %176 {offsets = [0, 0], sizes = [8, 128], strides = [1, 1]} : vector<8x384xf32> to vector<8x128xf32>
    %178 = vector.extract_strided_slice %176 {offsets = [0, 128], sizes = [8, 128], strides = [1, 1]} : vector<8x384xf32> to vector<8x128xf32>
    %179 = vector.extract_strided_slice %176 {offsets = [0, 256], sizes = [8, 128], strides = [1, 1]} : vector<8x384xf32> to vector<8x128xf32>
    %180 = vector.extract_strided_slice %170 {offsets = [0, 384], sizes = [8, 128], strides = [1, 1]} : vector<8x512xf32> to vector<8x128xf32>
    %181 = math.tanh %180 : vector<8x128xf32>
    %182 = arith.mulf %178, %159 : vector<8x128xf32>
    %183 = arith.mulf %177, %181 : vector<8x128xf32>
    %184 = arith.addf %182, %183 : vector<8x128xf32>
    %185 = math.tanh %184 : vector<8x128xf32>
    %186 = arith.mulf %179, %185 : vector<8x128xf32>
    %187 = arith.index_cast %165 : i32 to index
    %c0_55 = arith.constant 0 : index
    %188 = vector.load %arg7[%187, %c0_55] : memref<64x128xf32, #tpu.memory_space<vmem>>, vector<8x128xf32>
    tpu.vector_store %arg7[%187, %c0_55], %186 {strides = array<i32>} : memref<64x128xf32, #tpu.memory_space<vmem>>, vector<8x128xf32>,
    %c7_i32 = arith.constant 7 : i32
    %c8_i32_56 = arith.constant 8 : i32
    %189 = arith.muli %c7_i32, %c8_i32_56 : i32
    %190 = tpu.assume_multiple %189, 8 : i32
    %191 = arith.index_cast %190 : i32 to index
    %c0_57 = arith.constant 0 : index
    %192 = vector.load %arg10[%191, %c0_57] : memref<64x512xf32, #tpu.memory_space<vmem>>, vector<8x512xf32>
    %193 = arith.truncf %186 : vector<8x128xf32> to vector<8x128xbf16>
    %cst_58 = arith.constant dense<0.000000e+00> : vector<8x512xf32>
    %194 = tpu.matmul %193, %11, %cst_58 {dimension_numbers = #tpu.dot_dimension_numbers<[1], [0], [0], [1], [0, 0, 1, 1], [], []>} : vector<8x128xbf16>, vector<128x512xbf16>, vector<8x512xf32> -> vector<8x512xf32>
    %195 = arith.addf %192, %194 : vector<8x512xf32>
    %196 = vector.extract_strided_slice %195 {offsets = [0, 0], sizes = [8, 384], strides = [1, 1]} : vector<8x512xf32> to vector<8x384xf32>
    %197 = math.tanh %196 : vector<8x384xf32>
    %cst_59 = arith.constant 5.000000e-01 : f32
    %198 = vector.broadcast %cst_59 : f32 to vector<8x384xf32>
    %199 = arith.mulf %198, %197 : vector<8x384xf32>
    %cst_60 = arith.constant 5.000000e-01 : f32
    %200 = vector.broadcast %cst_60 : f32 to vector<8x384xf32>
    %201 = arith.addf %199, %200 : vector<8x384xf32>
    %202 = vector.extract_strided_slice %201 {offsets = [0, 0], sizes = [8, 128], strides = [1, 1]} : vector<8x384xf32> to vector<8x128xf32>
    %203 = vector.extract_strided_slice %201 {offsets = [0, 128], sizes = [8, 128], strides = [1, 1]} : vector<8x384xf32> to vector<8x128xf32>
    %204 = vector.extract_strided_slice %201 {offsets = [0, 256], sizes = [8, 128], strides = [1, 1]} : vector<8x384xf32> to vector<8x128xf32>
    %205 = vector.extract_strided_slice %195 {offsets = [0, 384], sizes = [8, 128], strides = [1, 1]} : vector<8x512xf32> to vector<8x128xf32>
    %206 = math.tanh %205 : vector<8x128xf32>
    %207 = arith.mulf %203, %184 : vector<8x128xf32>
    %208 = arith.mulf %202, %206 : vector<8x128xf32>
    %209 = arith.addf %207, %208 : vector<8x128xf32>
    %210 = math.tanh %209 : vector<8x128xf32>
    %211 = arith.mulf %204, %210 : vector<8x128xf32>
    %212 = arith.index_cast %190 : i32 to index
    %c0_61 = arith.constant 0 : index
    %213 = vector.load %arg7[%212, %c0_61] : memref<64x128xf32, #tpu.memory_space<vmem>>, vector<8x128xf32>
    tpu.vector_store %arg7[%212, %c0_61], %211 {strides = array<i32>} : memref<64x128xf32, #tpu.memory_space<vmem>>, vector<8x128xf32>,
    %c8_i32_62 = arith.constant 8 : i32
    %c0_63 = arith.constant 0 : index
    %c0_64 = arith.constant 0 : index
    %214 = vector.load %arg11[%c0_63, %c0_64] : memref<8x128xf32, #tpu.memory_space<vmem>>, vector<8x128xf32>
    tpu.vector_store %arg11[%c0_63, %c0_64], %211 {strides = array<i32>} : memref<8x128xf32, #tpu.memory_space<vmem>>, vector<8x128xf32>,
    %c0_65 = arith.constant 0 : index
    %c0_66 = arith.constant 0 : index
    %215 = vector.load %arg12[%c0_65, %c0_66] : memref<8x128xf32, #tpu.memory_space<vmem>>, vector<8x128xf32>
    tpu.vector_store %arg12[%c0_65, %c0_66], %209 {strides = array<i32>} : memref<8x128xf32, #tpu.memory_space<vmem>>, vector<8x128xf32>,
    %c0_i32_67 = arith.constant 0 : i32
    %216 = arith.cmpi eq, %arg0, %c0_i32_67 : i32
    %217 = arith.extui %216 : i1 to i32
    %c0_i32_68 = arith.constant 0 : i32
    %218 = arith.cmpi ne, %217, %c0_i32_68 : i32
    scf.if %218 {
      %c0_69 = arith.constant 0 : index
      %c0_70 = arith.constant 0 : index
      %219 = vector.load %arg8[%c0_69, %c0_70] : memref<8x128xf32, #tpu.memory_space<vmem>>, vector<8x128xf32>
      tpu.vector_store %arg8[%c0_69, %c0_70], %211 {strides = array<i32>} : memref<8x128xf32, #tpu.memory_space<vmem>>, vector<8x128xf32>,
      %c0_71 = arith.constant 0 : index
      %c0_72 = arith.constant 0 : index
      %220 = vector.load %arg9[%c0_71, %c0_72] : memref<8x128xf32, #tpu.memory_space<vmem>>, vector<8x128xf32>
      tpu.vector_store %arg9[%c0_71, %c0_72], %209 {strides = array<i32>} : memref<8x128xf32, #tpu.memory_space<vmem>>, vector<8x128xf32>,
    } else {
    }
    return
  }
  func.func @transform_0(%arg0: i32) -> (i32, i32) {
    %c0_i32 = arith.constant 0 : i32
    %c0_i32_0 = arith.constant 0 : i32
    return %arg0, %c0_i32 : i32, i32
  }
  func.func @transform_1(%arg0: i32) -> (i32, i32) {
    %c0_i32 = arith.constant 0 : i32
    %c0_i32_0 = arith.constant 0 : i32
    %c0_i32_1 = arith.constant 0 : i32
    return %c0_i32, %c0_i32_0 : i32, i32
  }
  func.func @transform_2(%arg0: i32) -> (i32, i32) {
    %c0_i32 = arith.constant 0 : i32
    %c0_i32_0 = arith.constant 0 : i32
    %c0_i32_1 = arith.constant 0 : i32
    return %c0_i32, %c0_i32_0 : i32, i32
  }
  func.func @transform_3(%arg0: i32) -> (i32, i32) {
    %c0_i32 = arith.constant 0 : i32
    %c0_i32_0 = arith.constant 0 : i32
    %c0_i32_1 = arith.constant 0 : i32
    return %c0_i32, %c0_i32_0 : i32, i32
  }
  func.func @transform_4(%arg0: i32) -> (i32, i32) {
    %c0_i32 = arith.constant 0 : i32
    %c0_i32_0 = arith.constant 0 : i32
    %c0_i32_1 = arith.constant 0 : i32
    return %c0_i32, %c0_i32_0 : i32, i32
  }
  func.func @transform_5(%arg0: i32) -> (i32, i32) {
    %c0_i32 = arith.constant 0 : i32
    %c0_i32_0 = arith.constant 0 : i32
    %c0_i32_1 = arith.constant 0 : i32
    return %c0_i32, %c0_i32_0 : i32, i32
  }
  func.func @transform_6(%arg0: i32) -> (i32, i32) {
    %c0_i32 = arith.constant 0 : i32
    %c0_i32_0 = arith.constant 0 : i32
    return %arg0, %c0_i32 : i32, i32
  }
  func.func @transform_7(%arg0: i32) -> (i32, i32) {
    %c0_i32 = arith.constant 0 : i32
    %c0_i32_0 = arith.constant 0 : i32
    %c0_i32_1 = arith.constant 0 : i32
    return %c0_i32, %c0_i32_0 : i32, i32
  }
  func.func @transform_8(%arg0: i32) -> (i32, i32) {
    %c0_i32 = arith.constant 0 : i32
    %c0_i32_0 = arith.constant 0 : i32
    %c0_i32_1 = arith.constant 0 : i32
    return %c0_i32, %c0_i32_0 : i32, i32
  }
}

module attributes {stable_mosaic.version = 11 : i64} {
  func.func @_lstm_layer_kernel(%arg0: i32, %arg1: memref<64x16xf32, #tpu.memory_space<vmem>>, %arg2: memref<8x128xf32, #tpu.memory_space<vmem>>, %arg3: memref<8x128xf32, #tpu.memory_space<vmem>>, %arg4: memref<16x512xbf16, #tpu.memory_space<vmem>>, %arg5: memref<128x512xbf16, #tpu.memory_space<vmem>>, %arg6: memref<1x512xf32, #tpu.memory_space<vmem>>, %arg7: memref<64x128xf32, #tpu.memory_space<vmem>>, %arg8: memref<8x128xf32, #tpu.memory_space<vmem>>, %arg9: memref<8x128xf32, #tpu.memory_space<vmem>>, %arg10: memref<64x512xf32, #tpu.memory_space<vmem>>, %arg11: memref<8x128xf32, #tpu.memory_space<vmem>>, %arg12: memref<8x128xf32, #tpu.memory_space<vmem>>) attributes {dimension_semantics = [#tpu.dimension_semantics<arbitrary>], iteration_bounds = array<i64: 1>, scalar_prefetch = 0 : i64, scratch_operands = 3 : i64, tpu.core_type = #tpu.core_type<tc>, window_params = [{transform_indices = @transform_0, window_bounds = array<i64: 64, 16>}, {pipeline_mode = #tpu.pipeline_mode<synchronous>, transform_indices = @transform_1, window_bounds = array<i64: 8, 128>}, {pipeline_mode = #tpu.pipeline_mode<synchronous>, transform_indices = @transform_2, window_bounds = array<i64: 8, 128>}, {pipeline_mode = #tpu.pipeline_mode<synchronous>, transform_indices = @transform_3, window_bounds = array<i64: 16, 512>}, {pipeline_mode = #tpu.pipeline_mode<synchronous>, transform_indices = @transform_4, window_bounds = array<i64: 128, 512>}, {pipeline_mode = #tpu.pipeline_mode<synchronous>, transform_indices = @transform_5, window_bounds = array<i64: 1, 512>}, {transform_indices = @transform_6, window_bounds = array<i64: 64, 128>}, {pipeline_mode = #tpu.pipeline_mode<synchronous>, transform_indices = @transform_7, window_bounds = array<i64: 8, 128>}, {pipeline_mode = #tpu.pipeline_mode<synchronous>, transform_indices = @transform_8, window_bounds = array<i64: 8, 128>}]} {
    %c0_i32 = arith.constant 0 : i32
    %0 = arith.cmpi eq, %arg0, %c0_i32 : i32
    %1 = arith.extui %0 : i1 to i32
    %c0_i32_0 = arith.constant 0 : i32
    %2 = arith.cmpi ne, %1, %c0_i32_0 : i32
    scf.if %2 {
      %c0_69 = arith.constant 0 : index
      %c0_70 = arith.constant 0 : index
      %219 = vector.load %arg2[%c0_69, %c0_70] : memref<8x128xf32, #tpu.memory_space<vmem>>, vector<8x128xf32>
      %c0_71 = arith.constant 0 : index
      %c0_72 = arith.constant 0 : index
      %220 = vector.load %arg11[%c0_71, %c0_72] : memref<8x128xf32, #tpu.memory_space<vmem>>, vector<8x128xf32>
      tpu.vector_store %arg11[%c0_71, %c0_72], %219 {strides = array<i32>} : memref<8x128xf32, #tpu.memory_space<vmem>>, vector<8x128xf32>,
      %c0_73 = arith.constant 0 : index
      %c0_74 = arith.constant 0 : index
      %221 = vector.load %arg3[%c0_73, %c0_74] : memref<8x128xf32, #tpu.memory_space<vmem>>, vector<8x128xf32>
      %c0_75 = arith.constant 0 : index
      %c0_76 = arith.constant 0 : index
      %222 = vector.load %arg12[%c0_75, %c0_76] : memref<8x128xf32, #tpu.memory_space<vmem>>, vector<8x128xf32>
      tpu.vector_store %arg12[%c0_75, %c0_76], %221 {strides = array<i32>} : memref<8x128xf32, #tpu.memory_space<vmem>>, vector<8x128xf32>,
    } else {
    }
    %c0 = arith.constant 0 : index
    %c0_1 = arith.constant 0 : index
    %3 = vector.load %arg1[%c0, %c0_1] : memref<64x16xf32, #tpu.memory_space<vmem>>, vector<64x16xf32>
    %4 = arith.truncf %3 : vector<64x16xf32> to vector<64x16xbf16>
    %c0_2 = arith.constant 0 : index
    %c0_3 = arith.constant 0 : index
    %5 = vector.load %arg4[%c0_2, %c0_3] : memref<16x512xbf16, #tpu.memory_space<vmem>>, vector<16x512xbf16>
    %cst = arith.constant dense<0.000000e+00> : vector<64x512xf32>
    %6 = tpu.matmul %4, %5, %cst {dimension_numbers = #tpu.dot_dimension_numbers<[1], [0], [0], [1], [0, 0, 1, 1], [], []>} : vector<64x16xbf16>, vector<16x512xbf16>, vector<64x512xf32> -> vector<64x512xf32>
    %c0_4 = arith.constant 0 : index
    %c0_5 = arith.constant 0 : index
    %7 = vector.load %arg6[%c0_4, %c0_5] : memref<1x512xf32, #tpu.memory_space<vmem>>, vector<1x512xf32>
    %8 = vector.broadcast %7 : vector<1x512xf32> to vector<64x512xf32>
    %9 = arith.addf %6, %8 : vector<64x512xf32>
    %c0_6 = arith.constant 0 : index
    %c0_7 = arith.constant 0 : index
    %10 = vector.load %arg10[%c0_6, %c0_7] : memref<64x512xf32, #tpu.memory_space<vmem>>, vector<64x512xf32>
    tpu.vector_store %arg10[%c0_6, %c0_7], %9 {strides = array<i32>} : memref<64x512xf32, #tpu.memory_space<vmem>>, vector<64x512xf32>,
    %c0_8 = arith.constant 0 : index
    %c0_9 = arith.constant 0 : index
    %11 = vector.load %arg5[%c0_8, %c0_9] : memref<128x512xbf16, #tpu.memory_space<vmem>>, vector<128x512xbf16>
    %c0_10 = arith.constant 0 : index
    %c0_11 = arith.constant 0 : index
    %12 = vector.load %arg11[%c0_10, %c0_11] : memref<8x128xf32, #tpu.memory_space<vmem>>, vector<8x128xf32>
    %c0_12 = arith.constant 0 : index
    %c0_13 = arith.constant 0 : index
    %13 = vector.load %arg12[%c0_12, %c0_13] : memref<8x128xf32, #tpu.memory_space<vmem>>, vector<8x128xf32>
    %c0_i32_14 = arith.constant 0 : i32
    %c8_i32 = arith.constant 8 : i32
    %14 = arith.muli %c0_i32_14, %c8_i32 : i32
    %15 = tpu.assume_multiple %14, 8 : i32
    %16 = arith.index_cast %15 : i32 to index
    %c0_15 = arith.constant 0 : index
    %17 = vector.load %arg10[%16, %c0_15] : memref<64x512xf32, #tpu.memory_space<vmem>>, vector<8x512xf32>
    %18 = arith.truncf %12 : vector<8x128xf32> to vector<8x128xbf16>
    %cst_16 = arith.constant dense<0.000000e+00> : vector<8x512xf32>
    %19 = tpu.matmul %18, %11, %cst_16 {dimension_numbers = #tpu.dot_dimension_numbers<[1], [0], [0], [1], [0, 0, 1, 1], [], []>} : vector<8x128xbf16>, vector<128x512xbf16>, vector<8x512xf32> -> vector<8x512xf32>
    %20 = arith.addf %17, %19 : vector<8x512xf32>
    %21 = vector.extract_strided_slice %20 {offsets = [0, 0], sizes = [8, 384], strides = [1, 1]} : vector<8x512xf32> to vector<8x384xf32>
    %22 = math.tanh %21 : vector<8x384xf32>
    %cst_17 = arith.constant 5.000000e-01 : f32
    %23 = vector.broadcast %cst_17 : f32 to vector<8x384xf32>
    %24 = arith.mulf %23, %22 : vector<8x384xf32>
    %cst_18 = arith.constant 5.000000e-01 : f32
    %25 = vector.broadcast %cst_18 : f32 to vector<8x384xf32>
    %26 = arith.addf %24, %25 : vector<8x384xf32>
    %27 = vector.extract_strided_slice %26 {offsets = [0, 0], sizes = [8, 128], strides = [1, 1]} : vector<8x384xf32> to vector<8x128xf32>
    %28 = vector.extract_strided_slice %26 {offsets = [0, 128], sizes = [8, 128], strides = [1, 1]} : vector<8x384xf32> to vector<8x128xf32>
    %29 = vector.extract_strided_slice %26 {offsets = [0, 256], sizes = [8, 128], strides = [1, 1]} : vector<8x384xf32> to vector<8x128xf32>
    %30 = vector.extract_strided_slice %20 {offsets = [0, 384], sizes = [8, 128], strides = [1, 1]} : vector<8x512xf32> to vector<8x128xf32>
    %31 = math.tanh %30 : vector<8x128xf32>
    %32 = arith.mulf %28, %13 : vector<8x128xf32>
    %33 = arith.mulf %27, %31 : vector<8x128xf32>
    %34 = arith.addf %32, %33 : vector<8x128xf32>
    %35 = math.tanh %34 : vector<8x128xf32>
    %36 = arith.mulf %29, %35 : vector<8x128xf32>
    %37 = arith.index_cast %15 : i32 to index
    %c0_19 = arith.constant 0 : index
    %38 = vector.load %arg7[%37, %c0_19] : memref<64x128xf32, #tpu.memory_space<vmem>>, vector<8x128xf32>
    tpu.vector_store %arg7[%37, %c0_19], %36 {strides = array<i32>} : memref<64x128xf32, #tpu.memory_space<vmem>>, vector<8x128xf32>,
    %c1_i32 = arith.constant 1 : i32
    %c8_i32_20 = arith.constant 8 : i32
    %39 = arith.muli %c1_i32, %c8_i32_20 : i32
    %40 = tpu.assume_multiple %39, 8 : i32
    %41 = arith.index_cast %40 : i32 to index
    %c0_21 = arith.constant 0 : index
    %42 = vector.load %arg10[%41, %c0_21] : memref<64x512xf32, #tpu.memory_space<vmem>>, vector<8x512xf32>
    %43 = arith.truncf %36 : vector<8x128xf32> to vector<8x128xbf16>
    %cst_22 = arith.constant dense<0.000000e+00> : vector<8x512xf32>
    %44 = tpu.matmul %43, %11, %cst_22 {dimension_numbers = #tpu.dot_dimension_numbers<[1], [0], [0], [1], [0, 0, 1, 1], [], []>} : vector<8x128xbf16>, vector<128x512xbf16>, vector<8x512xf32> -> vector<8x512xf32>
    %45 = arith.addf %42, %44 : vector<8x512xf32>
    %46 = vector.extract_strided_slice %45 {offsets = [0, 0], sizes = [8, 384], strides = [1, 1]} : vector<8x512xf32> to vector<8x384xf32>
    %47 = math.tanh %46 : vector<8x384xf32>
    %cst_23 = arith.constant 5.000000e-01 : f32
    %48 = vector.broadcast %cst_23 : f32 to vector<8x384xf32>
    %49 = arith.mulf %48, %47 : vector<8x384xf32>
    %cst_24 = arith.constant 5.000000e-01 : f32
    %50 = vector.broadcast %cst_24 : f32 to vector<8x384xf32>
    %51 = arith.addf %49, %50 : vector<8x384xf32>
    %52 = vector.extract_strided_slice %51 {offsets = [0, 0], sizes = [8, 128], strides = [1, 1]} : vector<8x384xf32> to vector<8x128xf32>
    %53 = vector.extract_strided_slice %51 {offsets = [0, 128], sizes = [8, 128], strides = [1, 1]} : vector<8x384xf32> to vector<8x128xf32>
    %54 = vector.extract_strided_slice %51 {offsets = [0, 256], sizes = [8, 128], strides = [1, 1]} : vector<8x384xf32> to vector<8x128xf32>
    %55 = vector.extract_strided_slice %45 {offsets = [0, 384], sizes = [8, 128], strides = [1, 1]} : vector<8x512xf32> to vector<8x128xf32>
    %56 = math.tanh %55 : vector<8x128xf32>
    %57 = arith.mulf %53, %34 : vector<8x128xf32>
    %58 = arith.mulf %52, %56 : vector<8x128xf32>
    %59 = arith.addf %57, %58 : vector<8x128xf32>
    %60 = math.tanh %59 : vector<8x128xf32>
    %61 = arith.mulf %54, %60 : vector<8x128xf32>
    %62 = arith.index_cast %40 : i32 to index
    %c0_25 = arith.constant 0 : index
    %63 = vector.load %arg7[%62, %c0_25] : memref<64x128xf32, #tpu.memory_space<vmem>>, vector<8x128xf32>
    tpu.vector_store %arg7[%62, %c0_25], %61 {strides = array<i32>} : memref<64x128xf32, #tpu.memory_space<vmem>>, vector<8x128xf32>,
    %c2_i32 = arith.constant 2 : i32
    %c8_i32_26 = arith.constant 8 : i32
    %64 = arith.muli %c2_i32, %c8_i32_26 : i32
    %65 = tpu.assume_multiple %64, 8 : i32
    %66 = arith.index_cast %65 : i32 to index
    %c0_27 = arith.constant 0 : index
    %67 = vector.load %arg10[%66, %c0_27] : memref<64x512xf32, #tpu.memory_space<vmem>>, vector<8x512xf32>
    %68 = arith.truncf %61 : vector<8x128xf32> to vector<8x128xbf16>
    %cst_28 = arith.constant dense<0.000000e+00> : vector<8x512xf32>
    %69 = tpu.matmul %68, %11, %cst_28 {dimension_numbers = #tpu.dot_dimension_numbers<[1], [0], [0], [1], [0, 0, 1, 1], [], []>} : vector<8x128xbf16>, vector<128x512xbf16>, vector<8x512xf32> -> vector<8x512xf32>
    %70 = arith.addf %67, %69 : vector<8x512xf32>
    %71 = vector.extract_strided_slice %70 {offsets = [0, 0], sizes = [8, 384], strides = [1, 1]} : vector<8x512xf32> to vector<8x384xf32>
    %72 = math.tanh %71 : vector<8x384xf32>
    %cst_29 = arith.constant 5.000000e-01 : f32
    %73 = vector.broadcast %cst_29 : f32 to vector<8x384xf32>
    %74 = arith.mulf %73, %72 : vector<8x384xf32>
    %cst_30 = arith.constant 5.000000e-01 : f32
    %75 = vector.broadcast %cst_30 : f32 to vector<8x384xf32>
    %76 = arith.addf %74, %75 : vector<8x384xf32>
    %77 = vector.extract_strided_slice %76 {offsets = [0, 0], sizes = [8, 128], strides = [1, 1]} : vector<8x384xf32> to vector<8x128xf32>
    %78 = vector.extract_strided_slice %76 {offsets = [0, 128], sizes = [8, 128], strides = [1, 1]} : vector<8x384xf32> to vector<8x128xf32>
    %79 = vector.extract_strided_slice %76 {offsets = [0, 256], sizes = [8, 128], strides = [1, 1]} : vector<8x384xf32> to vector<8x128xf32>
    %80 = vector.extract_strided_slice %70 {offsets = [0, 384], sizes = [8, 128], strides = [1, 1]} : vector<8x512xf32> to vector<8x128xf32>
    %81 = math.tanh %80 : vector<8x128xf32>
    %82 = arith.mulf %78, %59 : vector<8x128xf32>
    %83 = arith.mulf %77, %81 : vector<8x128xf32>
    %84 = arith.addf %82, %83 : vector<8x128xf32>
    %85 = math.tanh %84 : vector<8x128xf32>
    %86 = arith.mulf %79, %85 : vector<8x128xf32>
    %87 = arith.index_cast %65 : i32 to index
    %c0_31 = arith.constant 0 : index
    %88 = vector.load %arg7[%87, %c0_31] : memref<64x128xf32, #tpu.memory_space<vmem>>, vector<8x128xf32>
    tpu.vector_store %arg7[%87, %c0_31], %86 {strides = array<i32>} : memref<64x128xf32, #tpu.memory_space<vmem>>, vector<8x128xf32>,
    %c3_i32 = arith.constant 3 : i32
    %c8_i32_32 = arith.constant 8 : i32
    %89 = arith.muli %c3_i32, %c8_i32_32 : i32
    %90 = tpu.assume_multiple %89, 8 : i32
    %91 = arith.index_cast %90 : i32 to index
    %c0_33 = arith.constant 0 : index
    %92 = vector.load %arg10[%91, %c0_33] : memref<64x512xf32, #tpu.memory_space<vmem>>, vector<8x512xf32>
    %93 = arith.truncf %86 : vector<8x128xf32> to vector<8x128xbf16>
    %cst_34 = arith.constant dense<0.000000e+00> : vector<8x512xf32>
    %94 = tpu.matmul %93, %11, %cst_34 {dimension_numbers = #tpu.dot_dimension_numbers<[1], [0], [0], [1], [0, 0, 1, 1], [], []>} : vector<8x128xbf16>, vector<128x512xbf16>, vector<8x512xf32> -> vector<8x512xf32>
    %95 = arith.addf %92, %94 : vector<8x512xf32>
    %96 = vector.extract_strided_slice %95 {offsets = [0, 0], sizes = [8, 384], strides = [1, 1]} : vector<8x512xf32> to vector<8x384xf32>
    %97 = math.tanh %96 : vector<8x384xf32>
    %cst_35 = arith.constant 5.000000e-01 : f32
    %98 = vector.broadcast %cst_35 : f32 to vector<8x384xf32>
    %99 = arith.mulf %98, %97 : vector<8x384xf32>
    %cst_36 = arith.constant 5.000000e-01 : f32
    %100 = vector.broadcast %cst_36 : f32 to vector<8x384xf32>
    %101 = arith.addf %99, %100 : vector<8x384xf32>
    %102 = vector.extract_strided_slice %101 {offsets = [0, 0], sizes = [8, 128], strides = [1, 1]} : vector<8x384xf32> to vector<8x128xf32>
    %103 = vector.extract_strided_slice %101 {offsets = [0, 128], sizes = [8, 128], strides = [1, 1]} : vector<8x384xf32> to vector<8x128xf32>
    %104 = vector.extract_strided_slice %101 {offsets = [0, 256], sizes = [8, 128], strides = [1, 1]} : vector<8x384xf32> to vector<8x128xf32>
    %105 = vector.extract_strided_slice %95 {offsets = [0, 384], sizes = [8, 128], strides = [1, 1]} : vector<8x512xf32> to vector<8x128xf32>
    %106 = math.tanh %105 : vector<8x128xf32>
    %107 = arith.mulf %103, %84 : vector<8x128xf32>
    %108 = arith.mulf %102, %106 : vector<8x128xf32>
    %109 = arith.addf %107, %108 : vector<8x128xf32>
    %110 = math.tanh %109 : vector<8x128xf32>
    %111 = arith.mulf %104, %110 : vector<8x128xf32>
    %112 = arith.index_cast %90 : i32 to index
    %c0_37 = arith.constant 0 : index
    %113 = vector.load %arg7[%112, %c0_37] : memref<64x128xf32, #tpu.memory_space<vmem>>, vector<8x128xf32>
    tpu.vector_store %arg7[%112, %c0_37], %111 {strides = array<i32>} : memref<64x128xf32, #tpu.memory_space<vmem>>, vector<8x128xf32>,
    %c4_i32 = arith.constant 4 : i32
    %c8_i32_38 = arith.constant 8 : i32
    %114 = arith.muli %c4_i32, %c8_i32_38 : i32
    %115 = tpu.assume_multiple %114, 8 : i32
    %116 = arith.index_cast %115 : i32 to index
    %c0_39 = arith.constant 0 : index
    %117 = vector.load %arg10[%116, %c0_39] : memref<64x512xf32, #tpu.memory_space<vmem>>, vector<8x512xf32>
    %118 = arith.truncf %111 : vector<8x128xf32> to vector<8x128xbf16>
    %cst_40 = arith.constant dense<0.000000e+00> : vector<8x512xf32>
    %119 = tpu.matmul %118, %11, %cst_40 {dimension_numbers = #tpu.dot_dimension_numbers<[1], [0], [0], [1], [0, 0, 1, 1], [], []>} : vector<8x128xbf16>, vector<128x512xbf16>, vector<8x512xf32> -> vector<8x512xf32>
    %120 = arith.addf %117, %119 : vector<8x512xf32>
    %121 = vector.extract_strided_slice %120 {offsets = [0, 0], sizes = [8, 384], strides = [1, 1]} : vector<8x512xf32> to vector<8x384xf32>
    %122 = math.tanh %121 : vector<8x384xf32>
    %cst_41 = arith.constant 5.000000e-01 : f32
    %123 = vector.broadcast %cst_41 : f32 to vector<8x384xf32>
    %124 = arith.mulf %123, %122 : vector<8x384xf32>
    %cst_42 = arith.constant 5.000000e-01 : f32
    %125 = vector.broadcast %cst_42 : f32 to vector<8x384xf32>
    %126 = arith.addf %124, %125 : vector<8x384xf32>
    %127 = vector.extract_strided_slice %126 {offsets = [0, 0], sizes = [8, 128], strides = [1, 1]} : vector<8x384xf32> to vector<8x128xf32>
    %128 = vector.extract_strided_slice %126 {offsets = [0, 128], sizes = [8, 128], strides = [1, 1]} : vector<8x384xf32> to vector<8x128xf32>
    %129 = vector.extract_strided_slice %126 {offsets = [0, 256], sizes = [8, 128], strides = [1, 1]} : vector<8x384xf32> to vector<8x128xf32>
    %130 = vector.extract_strided_slice %120 {offsets = [0, 384], sizes = [8, 128], strides = [1, 1]} : vector<8x512xf32> to vector<8x128xf32>
    %131 = math.tanh %130 : vector<8x128xf32>
    %132 = arith.mulf %128, %109 : vector<8x128xf32>
    %133 = arith.mulf %127, %131 : vector<8x128xf32>
    %134 = arith.addf %132, %133 : vector<8x128xf32>
    %135 = math.tanh %134 : vector<8x128xf32>
    %136 = arith.mulf %129, %135 : vector<8x128xf32>
    %137 = arith.index_cast %115 : i32 to index
    %c0_43 = arith.constant 0 : index
    %138 = vector.load %arg7[%137, %c0_43] : memref<64x128xf32, #tpu.memory_space<vmem>>, vector<8x128xf32>
    tpu.vector_store %arg7[%137, %c0_43], %136 {strides = array<i32>} : memref<64x128xf32, #tpu.memory_space<vmem>>, vector<8x128xf32>,
    %c5_i32 = arith.constant 5 : i32
    %c8_i32_44 = arith.constant 8 : i32
    %139 = arith.muli %c5_i32, %c8_i32_44 : i32
    %140 = tpu.assume_multiple %139, 8 : i32
    %141 = arith.index_cast %140 : i32 to index
    %c0_45 = arith.constant 0 : index
    %142 = vector.load %arg10[%141, %c0_45] : memref<64x512xf32, #tpu.memory_space<vmem>>, vector<8x512xf32>
    %143 = arith.truncf %136 : vector<8x128xf32> to vector<8x128xbf16>
    %cst_46 = arith.constant dense<0.000000e+00> : vector<8x512xf32>
    %144 = tpu.matmul %143, %11, %cst_46 {dimension_numbers = #tpu.dot_dimension_numbers<[1], [0], [0], [1], [0, 0, 1, 1], [], []>} : vector<8x128xbf16>, vector<128x512xbf16>, vector<8x512xf32> -> vector<8x512xf32>
    %145 = arith.addf %142, %144 : vector<8x512xf32>
    %146 = vector.extract_strided_slice %145 {offsets = [0, 0], sizes = [8, 384], strides = [1, 1]} : vector<8x512xf32> to vector<8x384xf32>
    %147 = math.tanh %146 : vector<8x384xf32>
    %cst_47 = arith.constant 5.000000e-01 : f32
    %148 = vector.broadcast %cst_47 : f32 to vector<8x384xf32>
    %149 = arith.mulf %148, %147 : vector<8x384xf32>
    %cst_48 = arith.constant 5.000000e-01 : f32
    %150 = vector.broadcast %cst_48 : f32 to vector<8x384xf32>
    %151 = arith.addf %149, %150 : vector<8x384xf32>
    %152 = vector.extract_strided_slice %151 {offsets = [0, 0], sizes = [8, 128], strides = [1, 1]} : vector<8x384xf32> to vector<8x128xf32>
    %153 = vector.extract_strided_slice %151 {offsets = [0, 128], sizes = [8, 128], strides = [1, 1]} : vector<8x384xf32> to vector<8x128xf32>
    %154 = vector.extract_strided_slice %151 {offsets = [0, 256], sizes = [8, 128], strides = [1, 1]} : vector<8x384xf32> to vector<8x128xf32>
    %155 = vector.extract_strided_slice %145 {offsets = [0, 384], sizes = [8, 128], strides = [1, 1]} : vector<8x512xf32> to vector<8x128xf32>
    %156 = math.tanh %155 : vector<8x128xf32>
    %157 = arith.mulf %153, %134 : vector<8x128xf32>
    %158 = arith.mulf %152, %156 : vector<8x128xf32>
    %159 = arith.addf %157, %158 : vector<8x128xf32>
    %160 = math.tanh %159 : vector<8x128xf32>
    %161 = arith.mulf %154, %160 : vector<8x128xf32>
    %162 = arith.index_cast %140 : i32 to index
    %c0_49 = arith.constant 0 : index
    %163 = vector.load %arg7[%162, %c0_49] : memref<64x128xf32, #tpu.memory_space<vmem>>, vector<8x128xf32>
    tpu.vector_store %arg7[%162, %c0_49], %161 {strides = array<i32>} : memref<64x128xf32, #tpu.memory_space<vmem>>, vector<8x128xf32>,
    %c6_i32 = arith.constant 6 : i32
    %c8_i32_50 = arith.constant 8 : i32
    %164 = arith.muli %c6_i32, %c8_i32_50 : i32
    %165 = tpu.assume_multiple %164, 8 : i32
    %166 = arith.index_cast %165 : i32 to index
    %c0_51 = arith.constant 0 : index
    %167 = vector.load %arg10[%166, %c0_51] : memref<64x512xf32, #tpu.memory_space<vmem>>, vector<8x512xf32>
    %168 = arith.truncf %161 : vector<8x128xf32> to vector<8x128xbf16>
    %cst_52 = arith.constant dense<0.000000e+00> : vector<8x512xf32>
    %169 = tpu.matmul %168, %11, %cst_52 {dimension_numbers = #tpu.dot_dimension_numbers<[1], [0], [0], [1], [0, 0, 1, 1], [], []>} : vector<8x128xbf16>, vector<128x512xbf16>, vector<8x512xf32> -> vector<8x512xf32>
    %170 = arith.addf %167, %169 : vector<8x512xf32>
    %171 = vector.extract_strided_slice %170 {offsets = [0, 0], sizes = [8, 384], strides = [1, 1]} : vector<8x512xf32> to vector<8x384xf32>
    %172 = math.tanh %171 : vector<8x384xf32>
    %cst_53 = arith.constant 5.000000e-01 : f32
    %173 = vector.broadcast %cst_53 : f32 to vector<8x384xf32>
    %174 = arith.mulf %173, %172 : vector<8x384xf32>
    %cst_54 = arith.constant 5.000000e-01 : f32
    %175 = vector.broadcast %cst_54 : f32 to vector<8x384xf32>
    %176 = arith.addf %174, %175 : vector<8x384xf32>
    %177 = vector.extract_strided_slice %176 {offsets = [0, 0], sizes = [8, 128], strides = [1, 1]} : vector<8x384xf32> to vector<8x128xf32>
    %178 = vector.extract_strided_slice %176 {offsets = [0, 128], sizes = [8, 128], strides = [1, 1]} : vector<8x384xf32> to vector<8x128xf32>
    %179 = vector.extract_strided_slice %176 {offsets = [0, 256], sizes = [8, 128], strides = [1, 1]} : vector<8x384xf32> to vector<8x128xf32>
    %180 = vector.extract_strided_slice %170 {offsets = [0, 384], sizes = [8, 128], strides = [1, 1]} : vector<8x512xf32> to vector<8x128xf32>
    %181 = math.tanh %180 : vector<8x128xf32>
    %182 = arith.mulf %178, %159 : vector<8x128xf32>
    %183 = arith.mulf %177, %181 : vector<8x128xf32>
    %184 = arith.addf %182, %183 : vector<8x128xf32>
    %185 = math.tanh %184 : vector<8x128xf32>
    %186 = arith.mulf %179, %185 : vector<8x128xf32>
    %187 = arith.index_cast %165 : i32 to index
    %c0_55 = arith.constant 0 : index
    %188 = vector.load %arg7[%187, %c0_55] : memref<64x128xf32, #tpu.memory_space<vmem>>, vector<8x128xf32>
    tpu.vector_store %arg7[%187, %c0_55], %186 {strides = array<i32>} : memref<64x128xf32, #tpu.memory_space<vmem>>, vector<8x128xf32>,
    %c7_i32 = arith.constant 7 : i32
    %c8_i32_56 = arith.constant 8 : i32
    %189 = arith.muli %c7_i32, %c8_i32_56 : i32
    %190 = tpu.assume_multiple %189, 8 : i32
    %191 = arith.index_cast %190 : i32 to index
    %c0_57 = arith.constant 0 : index
    %192 = vector.load %arg10[%191, %c0_57] : memref<64x512xf32, #tpu.memory_space<vmem>>, vector<8x512xf32>
    %193 = arith.truncf %186 : vector<8x128xf32> to vector<8x128xbf16>
    %cst_58 = arith.constant dense<0.000000e+00> : vector<8x512xf32>
    %194 = tpu.matmul %193, %11, %cst_58 {dimension_numbers = #tpu.dot_dimension_numbers<[1], [0], [0], [1], [0, 0, 1, 1], [], []>} : vector<8x128xbf16>, vector<128x512xbf16>, vector<8x512xf32> -> vector<8x512xf32>
    %195 = arith.addf %192, %194 : vector<8x512xf32>
    %196 = vector.extract_strided_slice %195 {offsets = [0, 0], sizes = [8, 384], strides = [1, 1]} : vector<8x512xf32> to vector<8x384xf32>
    %197 = math.tanh %196 : vector<8x384xf32>
    %cst_59 = arith.constant 5.000000e-01 : f32
    %198 = vector.broadcast %cst_59 : f32 to vector<8x384xf32>
    %199 = arith.mulf %198, %197 : vector<8x384xf32>
    %cst_60 = arith.constant 5.000000e-01 : f32
    %200 = vector.broadcast %cst_60 : f32 to vector<8x384xf32>
    %201 = arith.addf %199, %200 : vector<8x384xf32>
    %202 = vector.extract_strided_slice %201 {offsets = [0, 0], sizes = [8, 128], strides = [1, 1]} : vector<8x384xf32> to vector<8x128xf32>
    %203 = vector.extract_strided_slice %201 {offsets = [0, 128], sizes = [8, 128], strides = [1, 1]} : vector<8x384xf32> to vector<8x128xf32>
    %204 = vector.extract_strided_slice %201 {offsets = [0, 256], sizes = [8, 128], strides = [1, 1]} : vector<8x384xf32> to vector<8x128xf32>
    %205 = vector.extract_strided_slice %195 {offsets = [0, 384], sizes = [8, 128], strides = [1, 1]} : vector<8x512xf32> to vector<8x128xf32>
    %206 = math.tanh %205 : vector<8x128xf32>
    %207 = arith.mulf %203, %184 : vector<8x128xf32>
    %208 = arith.mulf %202, %206 : vector<8x128xf32>
    %209 = arith.addf %207, %208 : vector<8x128xf32>
    %210 = math.tanh %209 : vector<8x128xf32>
    %211 = arith.mulf %204, %210 : vector<8x128xf32>
    %212 = arith.index_cast %190 : i32 to index
    %c0_61 = arith.constant 0 : index
    %213 = vector.load %arg7[%212, %c0_61] : memref<64x128xf32, #tpu.memory_space<vmem>>, vector<8x128xf32>
    tpu.vector_store %arg7[%212, %c0_61], %211 {strides = array<i32>} : memref<64x128xf32, #tpu.memory_space<vmem>>, vector<8x128xf32>,
    %c8_i32_62 = arith.constant 8 : i32
    %c0_63 = arith.constant 0 : index
    %c0_64 = arith.constant 0 : index
    %214 = vector.load %arg11[%c0_63, %c0_64] : memref<8x128xf32, #tpu.memory_space<vmem>>, vector<8x128xf32>
    tpu.vector_store %arg11[%c0_63, %c0_64], %211 {strides = array<i32>} : memref<8x128xf32, #tpu.memory_space<vmem>>, vector<8x128xf32>,
    %c0_65 = arith.constant 0 : index
    %c0_66 = arith.constant 0 : index
    %215 = vector.load %arg12[%c0_65, %c0_66] : memref<8x128xf32, #tpu.memory_space<vmem>>, vector<8x128xf32>
    tpu.vector_store %arg12[%c0_65, %c0_66], %209 {strides = array<i32>} : memref<8x128xf32, #tpu.memory_space<vmem>>, vector<8x128xf32>,
    %c0_i32_67 = arith.constant 0 : i32
    %216 = arith.cmpi eq, %arg0, %c0_i32_67 : i32
    %217 = arith.extui %216 : i1 to i32
    %c0_i32_68 = arith.constant 0 : i32
    %218 = arith.cmpi ne, %217, %c0_i32_68 : i32
    scf.if %218 {
      %c0_69 = arith.constant 0 : index
      %c0_70 = arith.constant 0 : index
      %219 = vector.load %arg8[%c0_69, %c0_70] : memref<8x128xf32, #tpu.memory_space<vmem>>, vector<8x128xf32>
      tpu.vector_store %arg8[%c0_69, %c0_70], %211 {strides = array<i32>} : memref<8x128xf32, #tpu.memory_space<vmem>>, vector<8x128xf32>,
      %c0_71 = arith.constant 0 : index
      %c0_72 = arith.constant 0 : index
      %220 = vector.load %arg9[%c0_71, %c0_72] : memref<8x128xf32, #tpu.memory_space<vmem>>, vector<8x128xf32>
      tpu.vector_store %arg9[%c0_71, %c0_72], %209 {strides = array<i32>} : memref<8x128xf32, #tpu.memory_space<vmem>>, vector<8x128xf32>,
    } else {
    }
    return
  }
  func.func @transform_0(%arg0: i32) -> (i32, i32) {
    %c0_i32 = arith.constant 0 : i32
    %c0_i32_0 = arith.constant 0 : i32
    return %arg0, %c0_i32 : i32, i32
  }
  func.func @transform_1(%arg0: i32) -> (i32, i32) {
    %c0_i32 = arith.constant 0 : i32
    %c0_i32_0 = arith.constant 0 : i32
    %c0_i32_1 = arith.constant 0 : i32
    return %c0_i32, %c0_i32_0 : i32, i32
  }
  func.func @transform_2(%arg0: i32) -> (i32, i32) {
    %c0_i32 = arith.constant 0 : i32
    %c0_i32_0 = arith.constant 0 : i32
    %c0_i32_1 = arith.constant 0 : i32
    return %c0_i32, %c0_i32_0 : i32, i32
  }
  func.func @transform_3(%arg0: i32) -> (i32, i32) {
    %c0_i32 = arith.constant 0 : i32
    %c0_i32_0 = arith.constant 0 : i32
    %c0_i32_1 = arith.constant 0 : i32
    return %c0_i32, %c0_i32_0 : i32, i32
  }
  func.func @transform_4(%arg0: i32) -> (i32, i32) {
    %c0_i32 = arith.constant 0 : i32
    %c0_i32_0 = arith.constant 0 : i32
    %c0_i32_1 = arith.constant 0 : i32
    return %c0_i32, %c0_i32_0 : i32, i32
  }
  func.func @transform_5(%arg0: i32) -> (i32, i32) {
    %c0_i32 = arith.constant 0 : i32
    %c0_i32_0 = arith.constant 0 : i32
    %c0_i32_1 = arith.constant 0 : i32
    return %c0_i32, %c0_i32_0 : i32, i32
  }
  func.func @transform_6(%arg0: i32) -> (i32, i32) {
    %c0_i32 = arith.constant 0 : i32
    %c0_i32_0 = arith.constant 0 : i32
    return %arg0, %c0_i32 : i32, i32
  }
  func.func @transform_7(%arg0: i32) -> (i32, i32) {
    %c0_i32 = arith.constant 0 : i32
    %c0_i32_0 = arith.constant 0 : i32
    %c0_i32_1 = arith.constant 0 : i32
    return %c0_i32, %c0_i32_0 : i32, i32
  }
  func.func @transform_8(%arg0: i32) -> (i32, i32) {
    %c0_i32 = arith.constant 0 : i32
    %c0_i32_0 = arith.constant 0 : i32
    %c0_i32_1 = arith.constant 0 : i32
    return %c0_i32, %c0_i32_0 : i32, i32
  }
}

module attributes {stable_mosaic.version = 11 : i64} {
  func.func @_linear_kernel(%arg0: i32, %arg1: memref<64x128xf32, #tpu.memory_space<vmem>>, %arg2: memref<128x16xbf16, #tpu.memory_space<vmem>>, %arg3: memref<1x16xf32, #tpu.memory_space<vmem>>, %arg4: memref<64x16xf32, #tpu.memory_space<vmem>>) attributes {dimension_semantics = [#tpu.dimension_semantics<parallel>], iteration_bounds = array<i64: 1>, scalar_prefetch = 0 : i64, scratch_operands = 0 : i64, tpu.core_type = #tpu.core_type<tc>, window_params = [{transform_indices = @transform_0, window_bounds = array<i64: 64, 128>}, {pipeline_mode = #tpu.pipeline_mode<synchronous>, transform_indices = @transform_1, window_bounds = array<i64: 128, 16>}, {pipeline_mode = #tpu.pipeline_mode<synchronous>, transform_indices = @transform_2, window_bounds = array<i64: 1, 16>}, {transform_indices = @transform_3, window_bounds = array<i64: 64, 16>}]} {
    %c0 = arith.constant 0 : index
    %c0_0 = arith.constant 0 : index
    %0 = vector.load %arg1[%c0, %c0_0] : memref<64x128xf32, #tpu.memory_space<vmem>>, vector<64x128xf32>
    %1 = arith.truncf %0 : vector<64x128xf32> to vector<64x128xbf16>
    %c0_1 = arith.constant 0 : index
    %c0_2 = arith.constant 0 : index
    %2 = vector.load %arg2[%c0_1, %c0_2] : memref<128x16xbf16, #tpu.memory_space<vmem>>, vector<128x16xbf16>
    %cst = arith.constant dense<0.000000e+00> : vector<64x16xf32>
    %3 = tpu.matmul %1, %2, %cst {dimension_numbers = #tpu.dot_dimension_numbers<[1], [0], [0], [1], [0, 0, 1, 1], [], []>} : vector<64x128xbf16>, vector<128x16xbf16>, vector<64x16xf32> -> vector<64x16xf32>
    %c0_3 = arith.constant 0 : index
    %c0_4 = arith.constant 0 : index
    %4 = vector.load %arg3[%c0_3, %c0_4] : memref<1x16xf32, #tpu.memory_space<vmem>>, vector<1x16xf32>
    %5 = vector.broadcast %4 : vector<1x16xf32> to vector<64x16xf32>
    %6 = arith.addf %3, %5 : vector<64x16xf32>
    %c0_5 = arith.constant 0 : index
    %c0_6 = arith.constant 0 : index
    %7 = vector.load %arg4[%c0_5, %c0_6] : memref<64x16xf32, #tpu.memory_space<vmem>>, vector<64x16xf32>
    tpu.vector_store %arg4[%c0_5, %c0_6], %6 {strides = array<i32>} : memref<64x16xf32, #tpu.memory_space<vmem>>, vector<64x16xf32>,
    return
  }
  func.func @transform_0(%arg0: i32) -> (i32, i32) {
    %c0_i32 = arith.constant 0 : i32
    %c0_i32_0 = arith.constant 0 : i32
    return %arg0, %c0_i32 : i32, i32
  }
  func.func @transform_1(%arg0: i32) -> (i32, i32) {
    %c0_i32 = arith.constant 0 : i32
    %c0_i32_0 = arith.constant 0 : i32
    %c0_i32_1 = arith.constant 0 : i32
    return %c0_i32, %c0_i32_0 : i32, i32
  }
  func.func @transform_2(%arg0: i32) -> (i32, i32) {
    %c0_i32 = arith.constant 0 : i32
    %c0_i32_0 = arith.constant 0 : i32
    %c0_i32_1 = arith.constant 0 : i32
    return %c0_i32, %c0_i32_0 : i32, i32
  }
  func.func @transform_3(%arg0: i32) -> (i32, i32) {
    %c0_i32 = arith.constant 0 : i32
    %c0_i32_0 = arith.constant 0 : i32
    return %arg0, %c0_i32 : i32, i32
  }
}

</mosaic_0001>

<bundles_post_ra>
// kernel: lstm_module_forward.5
= control target key start
LH: loop header
LB: loop body
LE: loop exit
PB: predicated region body
PF: predicated region fallthrough
CT: control target
= control target key end

     0   :  { %vm163_vm0 = vcmask 130048   ;;  %s348_s1 = inlined_call_operand.vmem [shape: bf16[128,16], index: 1, kind: input, shape index: {}]   ;;  %s349_s0 = inlined_call_operand.vmem [shape: f32[64,128], index: 0, kind: input, shape index: {}]   ;;  %s350_s2 = inlined_call_operand.vmem [shape: f32[1,16], index: 2, kind: input, shape index: {}]   ;;  %s351_s3 = inlined_call_operand.vmem [shape: f32[64,16], index: 3, kind: output, shape index: {}]  }
   0x1   :  { %v237_v0 = vld [vmem:[%s348_s1] sm:$0xff]   ;;  %v238_v1 = vld [vmem:[%s348_s1 + $0x8] sm:$0xff]   ;;  %v239_v2 = vld [vmem:[%s348_s1 + $0x10] sm:$0xff]  }
   0x2   :  { %197 = vmatprep.subr.bf16.mxu0 %v237_v0  ;;  %221 = vmatprep.subr.bf16.mxu1 %v237_v0  ;;  %v240_v3 = vld [vmem:[%s348_s1 + $0x18] sm:$0xff]   ;;  %v15_v4 = vld [vmem:[%s349_s0] sm:$0xff]  ;;  %v16_v5 = vld [vmem:[%s349_s0 + $0x8] sm:$0xff] }
   0x3   :  { %198 = vmatpush3.bf16.msra.mxu0 %v237_v0  ;;  %229 = vmatpush3.bf16.msra.mxu1 %v237_v0  ;;  %v19_v6 = vld [vmem:[%s349_s0 + $0x20] sm:$0xff]  ;;  %v23_v7 = vpack.c.bf16 %v16_v5, %v15_v4  ;;  %v20_v8 = vld [vmem:[%s349_s0 + $0x28] sm:$0xff]  ;;  %v243_v12 = vld [vmem:[%s348_s1 + $0x30] sm:$0xff]  }
   0x4   :  { %199 = vmatprep.subr.bf16.mxu0 %v238_v1  ;;  %222 = vmatprep.subr.bf16.mxu1 %v238_v1  ;;  %v25_v9 = vpack.c.bf16 %v20_v8, %v19_v6  ;;  %v241_v10 = vld [vmem:[%s348_s1 + $0x20] sm:$0xff]   ;;  %v242_v11 = vld [vmem:[%s348_s1 + $0x28] sm:$0xff]   ;;  %v244_v13 = vld [vmem:[%s348_s1 + $0x38] sm:$0xff]  }
   0x5   :  { %213 = vmatprep.mubr.bf16.mxu0 %v23_v7  ;;  %v17_v14 = vld [vmem:[%s349_s0 + $0x10] sm:$0xff]  ;;  %v18_v15 = vld [vmem:[%s349_s0 + $0x18] sm:$0xff]  ;;  %v176_v20 = vld [vmem:[%s350_s2] ss:$0 sm:$0xff] }
   0x6   :  { %217 = vmatprep.mubr.bf16.mxu1 %v25_v9  ;;  %v21_v16 = vld [vmem:[%s349_s0 + $0x30] sm:$0xff]  ;;  %v22_v17 = vld [vmem:[%s349_s0 + $0x38] sm:$0xff]  ;;  %v24_v18 = vpack.c.bf16 %v18_v15, %v17_v14 }
   0x7   :  { %200 = vmatpush3.bf16.msra.mxu0 %v238_v1  ;;  %230 = vmatpush3.bf16.msra.mxu1 %v238_v1  ;;  %v26_v19 = vpack.c.bf16 %v22_v17, %v21_v16 }
   0x8   :  { %201 = vmatprep.subr.bf16.mxu0 %v239_v2  ;;  %223 = vmatprep.subr.bf16.mxu1 %v239_v2 }
   0xb   :  { %202 = vmatpush3.bf16.msra.mxu0 %v239_v2  ;;  %231 = vmatpush3.bf16.msra.mxu1 %v239_v2 }
   0xc   :  { %203 = vmatprep.subr.bf16.mxu0 %v240_v3  ;;  %224 = vmatprep.subr.bf16.mxu1 %v240_v3 }
   0xf   :  { %204 = vmatpush3.bf16.msra.mxu0 %v240_v3  ;;  %232 = vmatpush3.bf16.msra.mxu1 %v240_v3 }
  0x10   :  { %205 = vmatprep.subr.bf16.mxu0 %v241_v10  ;;  %225 = vmatprep.subr.bf16.mxu1 %v241_v10 }
  0x13   :  { %206 = vmatpush3.bf16.msra.mxu0 %v241_v10  ;;  %233 = vmatpush3.bf16.msra.mxu1 %v241_v10 }
  0x14   :  { %207 = vmatprep.subr.bf16.mxu0 %v242_v11  ;;  %226 = vmatprep.subr.bf16.mxu1 %v242_v11 }
  0x17   :  { %208 = vmatpush3.bf16.msra.mxu0 %v242_v11  ;;  %234 = vmatpush3.bf16.msra.mxu1 %v242_v11 }
  0x18   :  { %209 = vmatprep.subr.bf16.mxu0 %v243_v12  ;;  %227 = vmatprep.subr.bf16.mxu1 %v243_v12 }
  0x1b   :  { %210 = vmatpush3.bf16.msra.mxu0 %v243_v12  ;;  %235 = vmatpush3.bf16.msra.mxu1 %v243_v12 }
  0x1c   :  { %211 = vmatprep.subr.bf16.mxu0 %v244_v13  ;;  %228 = vmatprep.subr.bf16.mxu1 %v244_v13 }
  0x1f   :  { %212 = vmatpush3.bf16.msra.mxu0 %v244_v13  ;;  %236 = vmatpush3.bf16.msra.mxu1 %v244_v13 }
  0x22   :  { %214 = vmatmul.mubr.bf16.vlgmr.msra.gmra.mrb[0].mxu0 %v24_v18  ;;  %218 = vmatmul.mubr.bf16.vlgmr.msra.gmra.mrb[0].mxu1 %v26_v19 }
  0xf5   :  { %v215_v21 = vpop.f32.mrb[0].mxu0  ;;  %v219_v22 = vpop.f32.mrb[0].mxu1 }
  0xf6   :  { %v141_v23 = vadd.f32 %v215_v21, %v176_v20  ;;  %v157_v24 = vadd.f32 %v219_v22, %v176_v20  ;;  %v132_v25 = vpop.f32.mrb[1].mxu0  ;;  %v148_v26 = vpop.f32.mrb[1].mxu1 }
  0xf7   :  { %v133_v27 = vadd.f32 %v176_v20, %v132_v25  ;;  %v149_v28 = vadd.f32 %v176_v20, %v148_v26  ;;  %v216_v29 = vpop.f32.mrb[2].mxu0  ;;  %v220_v30 = vpop.f32.mrb[2].mxu1 }
  0xf8   :  { %166 = vst.msk [vmem:[%s351_s3 + $0x10] sm:$0xff] %vm163_vm0, %v141_v23  ;;  %170 = vst.msk [vmem:[%s351_s3 + $0x30] sm:$0xff] %vm163_vm0, %v157_v24  ;;  %v144_v31 = vadd.f32 %v216_v29, %v176_v20  ;;  %v160_v32 = vadd.f32 %v220_v30, %v176_v20  ;;  %v135_v33 = vpop.f32.mrb[3].mxu0  ;;  %v151_v34 = vpop.f32.mrb[3].mxu1 }
  0xf9   :  { %164 = vst.msk [vmem:[%s351_s3] sm:$0xff] %vm163_vm0, %v133_v27  ;;  %168 = vst.msk [vmem:[%s351_s3 + $0x20] sm:$0xff] %vm163_vm0, %v149_v28  ;;  %v136_v35 = vadd.f32 %v176_v20, %v135_v33  ;;  %v152_v36 = vadd.f32 %v176_v20, %v151_v34 }
  0xfa   :  { %167 = vst.msk [vmem:[%s351_s3 + $0x18] sm:$0xff] %vm163_vm0, %v144_v31  ;;  %171 = vst.msk [vmem:[%s351_s3 + $0x38] sm:$0xff] %vm163_vm0, %v160_v32 }
  0xfb   :  { %165 = vst.msk [vmem:[%s351_s3 + $0x8] sm:$0xff] %vm163_vm0, %v136_v35  ;;  %169 = vst.msk [vmem:[%s351_s3 + $0x28] sm:$0xff] %vm163_vm0, %v152_v36 }

// kernel: lstm_module_forward.4
= control target key start
LH: loop header
LB: loop body
LE: loop exit
PB: predicated region body
PF: predicated region fallthrough
CT: control target
= control target key end

     0   :  { %v2723_v1 = vmov 0   ;;  %s2714_s3 = inlined_call_operand.vmem [shape: bf16[128,512], index: 3, kind: input, shape index: {}]   ;;  %s2715_s4 = inlined_call_operand.vmem [shape: bf16[128,512], index: 4, kind: input, shape index: {}]   ;;  %s2716_s0 = inlined_call_operand.vmem [shape: f32[64,128], index: 0, kind: input, shape index: {}]   ;;  %s2717_s1 = inlined_call_operand.vmem [shape: f32[8,128], index: 1, kind: input, shape index: {}]   ;;  %s2718_s5 = inlined_call_operand.vmem [shape: f32[1,512], index: 5, kind: input, shape index: {}]   ;;  %s2719_s2 = inlined_call_operand.vmem [shape: f32[8,128], index: 2, kind: input, shape index: {}]   ;;  %s2720_s6 = inlined_call_operand.vmem [shape: f32[64,128], index: 6, kind: output, shape index: {0}]   ;;  %s2721_s8 = inlined_call_operand.vmem [shape: f32[8,128], index: 8, kind: output, shape index: {2}]   ;;  %s2722_s7 = inlined_call_operand.vmem [shape: f32[8,128], index: 7, kind: output, shape index: {1}]  }
   0x1   :  { %v1618_v0 = vld [vmem:[%s2714_s3 + $0x4] ss:$16 sps:$4 sm:$0xff]   ;;  %293 = vmatprep.mubr.bf16.mxu0 %v2723_v1  ;;  %366 = vmatprep.mubr.bf16.mxu1 %v2723_v1  ;;  %v1620_v2 = vld [vmem:[%s2714_s3 + $0xc] ss:$16 sps:$4 sm:$0xff]   ;;  %v1622_v3 = vld [vmem:[%s2714_s3] ss:$16 sps:$4 sm:$0xff]  }
   0x2   :  { %261 = vmatprep.subr.bf16.mxu0 %v1618_v0  ;;  %v1623_v4 = vld [vmem:[%s2714_s3 + $0x8] ss:$16 sps:$4 sm:$0xff]   ;;  %334 = vmatprep.subr.bf16.mxu1 %v1620_v2  ;;  %v1624_v5 = vld [vmem:[%s2714_s3 + $0x24] ss:$16 sps:$4 sm:$0xff]   ;;  %v1626_v6 = vld [vmem:[%s2714_s3 + $0x2c] ss:$16 sps:$4 sm:$0xff]  }
   0x3   :  { %262 = vmatpush1.bf16.msra.mxu0 %v1622_v3  ;;  %335 = vmatpush1.bf16.msra.mxu1 %v1623_v4  ;;  %v1628_v7 = vld [vmem:[%s2714_s3 + $0x20] ss:$16 sps:$4 sm:$0xff]   ;;  %v1629_v8 = vld [vmem:[%s2714_s3 + $0x28] ss:$16 sps:$4 sm:$0xff]   ;;  %v1630_v9 = vld [vmem:[%s2714_s3 + $0x44] ss:$16 sps:$4 sm:$0xff]  }
   0x4   :  { %263 = vmatprep.subr.bf16.mxu0 %v1624_v5  ;;  %336 = vmatprep.subr.bf16.mxu1 %v1626_v6  ;;  %v1632_v10 = vld [vmem:[%s2714_s3 + $0x4c] ss:$16 sps:$4 sm:$0xff]   ;;  %v1634_v11 = vld [vmem:[%s2714_s3 + $0x40] ss:$16 sps:$4 sm:$0xff]   ;;  %v1635_v12 = vld [vmem:[%s2714_s3 + $0x48] ss:$16 sps:$4 sm:$0xff]  }
   0x5   :  { %v1636_v13 = vld [vmem:[%s2714_s3 + $0x64] ss:$16 sps:$4 sm:$0xff]   ;;  %v1638_v14 = vld [vmem:[%s2714_s3 + $0x6c] ss:$16 sps:$4 sm:$0xff]   ;;  %v1640_v15 = vld [vmem:[%s2714_s3 + $0x60] ss:$16 sps:$4 sm:$0xff]  }
   0x6   :  { %v1641_v16 = vld [vmem:[%s2714_s3 + $0x68] ss:$16 sps:$4 sm:$0xff]   ;;  %v1642_v17 = vld [vmem:[%s2714_s3 + $0x84] ss:$16 sps:$4 sm:$0xff]   ;;  %v1644_v18 = vld [vmem:[%s2714_s3 + $0x8c] ss:$16 sps:$4 sm:$0xff]  }
   0x7   :  { %264 = vmatpush1.bf16.msra.mxu0 %v1628_v7  ;;  %337 = vmatpush1.bf16.msra.mxu1 %v1629_v8  ;;  %v1646_v19 = vld [vmem:[%s2714_s3 + $0x80] ss:$16 sps:$4 sm:$0xff]   ;;  %v1647_v20 = vld [vmem:[%s2714_s3 + $0x88] ss:$16 sps:$4 sm:$0xff]   ;;  %v1648_v21 = vld [vmem:[%s2714_s3 + $0xa4] ss:$16 sps:$4 sm:$0xff]  }
   0x8   :  { %265 = vmatprep.subr.bf16.mxu0 %v1630_v9  ;;  %338 = vmatprep.subr.bf16.mxu1 %v1632_v10  ;;  %v1650_v22 = vld [vmem:[%s2714_s3 + $0xac] ss:$16 sps:$4 sm:$0xff]   ;;  %v1652_v23 = vld [vmem:[%s2714_s3 + $0xa0] ss:$16 sps:$4 sm:$0xff]   ;;  %v1653_v24 = vld [vmem:[%s2714_s3 + $0xa8] ss:$16 sps:$4 sm:$0xff]  }
   0x9   :  { %v1654_v25 = vld [vmem:[%s2714_s3 + $0xc4] ss:$16 sps:$4 sm:$0xff]   ;;  %v1656_v26 = vld [vmem:[%s2714_s3 + $0xcc] ss:$16 sps:$4 sm:$0xff]   ;;  %v1658_v27 = vld [vmem:[%s2714_s3 + $0xc0] ss:$16 sps:$4 sm:$0xff]  }
   0xa   :  { %v1659_v28 = vld [vmem:[%s2714_s3 + $0xc8] ss:$16 sps:$4 sm:$0xff]   ;;  %v1660_v29 = vld [vmem:[%s2714_s3 + $0xe4] ss:$16 sps:$4 sm:$0xff]   ;;  %v1662_v30 = vld [vmem:[%s2714_s3 + $0xec] ss:$16 sps:$4 sm:$0xff]  }
   0xb   :  { %266 = vmatpush1.bf16.msra.mxu0 %v1634_v11  ;;  %339 = vmatpush1.bf16.msra.mxu1 %v1635_v12  ;;  %v1664_v31 = vld [vmem:[%s2714_s3 + $0xe0] ss:$16 sps:$4 sm:$0xff]   ;;  %v1665_v32 = vld [vmem:[%s2714_s3 + $0xe8] ss:$16 sps:$4 sm:$0xff]   ;;  %v1979_v35 = vld [vmem:[%s2715_s4 + $0x4] ss:$16 sps:$4 sm:$0xff]  }
   0xc   :  { %267 = vmatprep.subr.bf16.mxu0 %v1636_v13  ;;  %340 = vmatprep.subr.bf16.mxu1 %v1638_v14  ;;  %v35_v33 = vld [vmem:[%s2716_s0] sm:$0xff]  ;;  %v36_v34 = vld [vmem:[%s2716_s0 + $0x8] sm:$0xff]  ;;  %v37_v44 = vld [vmem:[%s2716_s0 + $0x10] sm:$0xff] }
   0xd   :  { %v1984_v36 = vld [vmem:[%s2715_s4 + $0xc] ss:$16 sps:$4 sm:$0xff]   ;;  %v43_v37 = vpack.c.bf16 %v36_v34, %v35_v33  ;;  %v1989_v38 = vld [vmem:[%s2715_s4] ss:$16 sps:$4 sm:$0xff]   ;;  %v1994_v39 = vld [vmem:[%s2715_s4 + $0x8] ss:$16 sps:$4 sm:$0xff]  }
   0xe   :  { %v2001_v40 = vld [vmem:[%s2715_s4 + $0x24] ss:$16 sps:$4 sm:$0xff]   ;;  %v2006_v41 = vld [vmem:[%s2715_s4 + $0x2c] ss:$16 sps:$4 sm:$0xff]   ;;  %v2011_v42 = vld [vmem:[%s2715_s4 + $0x20] ss:$16 sps:$4 sm:$0xff]  }
   0xf   :  { %268 = vmatpush1.bf16.msra.mxu0 %v1640_v15  ;;  %341 = vmatpush1.bf16.msra.mxu1 %v1641_v16  ;;  %v2016_v43 = vld [vmem:[%s2715_s4 + $0x28] ss:$16 sps:$4 sm:$0xff]   ;;  %v2029_v46 = vld [vmem:[%s2715_s4 + $0x44] ss:$16 sps:$4 sm:$0xff]   ;;  %v2036_v47 = vld [vmem:[%s2715_s4 + $0x4c] ss:$16 sps:$4 sm:$0xff]   ;;  %v81_v16 = vlaneseq }
  0x10   :  { %269 = vmatprep.subr.bf16.mxu0 %v1642_v17  ;;  %342 = vmatprep.subr.bf16.mxu1 %v1644_v18  ;;  %v38_v45 = vld [vmem:[%s2716_s0 + $0x18] sm:$0xff]  ;;  %v2043_v49 = vld [vmem:[%s2715_s4 + $0x40] ss:$16 sps:$4 sm:$0xff]   ;;  %v2055_v51 = vld [vmem:[%s2715_s4 + $0x64] ss:$16 sps:$4 sm:$0xff]  }
  0x11   :  { %v44_v48 = vpack.c.bf16 %v38_v45, %v37_v44  ;;  %v2048_v50 = vld [vmem:[%s2715_s4 + $0x48] ss:$16 sps:$4 sm:$0xff]   ;;  %v2062_v52 = vld [vmem:[%s2715_s4 + $0x6c] ss:$16 sps:$4 sm:$0xff]   ;;  %v2067_v53 = vld [vmem:[%s2715_s4 + $0x60] ss:$16 sps:$4 sm:$0xff]  }
  0x12   :  { %v2072_v54 = vld [vmem:[%s2715_s4 + $0x68] ss:$16 sps:$4 sm:$0xff]   ;;  %v39_v55 = vld [vmem:[%s2716_s0 + $0x20] sm:$0xff]  ;;  %v2092_v58 = vld [vmem:[%s2715_s4 + $0x8c] ss:$16 sps:$4 sm:$0xff]   ;;  %v82_v17 = vshrl.u32 %v81_v16, 7 }
  0x13   :  { %270 = vmatpush1.bf16.msra.mxu0 %v1646_v19  ;;  %343 = vmatpush1.bf16.msra.mxu1 %v1647_v20  ;;  %v40_v56 = vld [vmem:[%s2716_s0 + $0x28] sm:$0xff]  ;;  %v2087_v57 = vld [vmem:[%s2715_s4 + $0x84] ss:$16 sps:$4 sm:$0xff]   ;;  %v2101_v60 = vld [vmem:[%s2715_s4 + $0x80] ss:$16 sps:$4 sm:$0xff]  }
  0x14   :  { %271 = vmatprep.subr.bf16.mxu0 %v1648_v21  ;;  %344 = vmatprep.subr.bf16.mxu1 %v1650_v22  ;;  %v45_v59 = vpack.c.bf16 %v40_v56, %v39_v55  ;;  %v2106_v61 = vld [vmem:[%s2715_s4 + $0x88] ss:$16 sps:$4 sm:$0xff]   ;;  %v2113_v62 = vld [vmem:[%s2715_s4 + $0xa4] ss:$16 sps:$4 sm:$0xff]   ;;  %v2118_v63 = vld [vmem:[%s2715_s4 + $0xac] ss:$16 sps:$4 sm:$0xff]  }
  0x15   :  { %v2123_v0 = vld [vmem:[%s2715_s4 + $0xa0] ss:$16 sps:$4 sm:$0xff]   ;;  %v2130_v2 = vld [vmem:[%s2715_s4 + $0xa8] ss:$16 sps:$4 sm:$0xff]   ;;  %v2143_v5 = vld [vmem:[%s2715_s4 + $0xc4] ss:$16 sps:$4 sm:$0xff]  }
  0x16   :  { %v41_v3 = vld [vmem:[%s2716_s0 + $0x30] sm:$0xff]  ;;  %v42_v4 = vld [vmem:[%s2716_s0 + $0x38] sm:$0xff]  ;;  %v31_v14 = vld [vmem:[%s2717_s1] sm:$0xff]  ;;  %v91_v18 = vsub.s32 2, %v82_v17  ;;  %v95_v19 = vsub.s32 3, %v82_v17  ;;  %v83_v20 = vsub.s32 0, %v82_v17 }
  0x17   :  { %272 = vmatpush1.bf16.msra.mxu0 %v1652_v23  ;;  %345 = vmatpush1.bf16.msra.mxu1 %v1653_v24  ;;  %v2148_v6 = vld [vmem:[%s2715_s4 + $0xcc] ss:$16 sps:$4 sm:$0xff]   ;;  %v46_v7 = vpack.c.bf16 %v42_v4, %v41_v3  ;;  %v2157_v8 = vld [vmem:[%s2715_s4 + $0xc0] ss:$16 sps:$4 sm:$0xff]   ;;  %v2162_v9 = vld [vmem:[%s2715_s4 + $0xc8] ss:$16 sps:$4 sm:$0xff]   ;;  %v480_v15 = vpack.c.bf16 %v31_v14, %v31_v14 }
  0x18   :  { %273 = vmatprep.subr.bf16.mxu0 %v1654_v25  ;;  %346 = vmatprep.subr.bf16.mxu1 %v1656_v26  ;;  %v2169_v10 = vld [vmem:[%s2715_s4 + $0xe4] ss:$16 sps:$4 sm:$0xff]   ;;  %v2174_v11 = vld [vmem:[%s2715_s4 + $0xec] ss:$16 sps:$4 sm:$0xff]   ;;  %v2181_v12 = vld [vmem:[%s2715_s4 + $0xe0] ss:$16 sps:$4 sm:$0xff]  }
  0x19   :  { %v2186_v13 = vld [vmem:[%s2715_s4 + $0xe8] ss:$16 sps:$4 sm:$0xff]   ;;  %v79_v21 = vld [vmem:[%s2718_s5] sm:$0xf]  ;;  %v87_v22 = vsub.s32 1, %v82_v17 }
  0x1a   :  { %v2236_v23 = vrot.slane %v79_v21, %v91_v18  ;;  %v2242_v26 = vrot.slane %v79_v21, %v95_v19 }
  0x1b   :  { %274 = vmatpush1.bf16.msra.mxu0 %v1658_v27  ;;  %347 = vmatpush1.bf16.msra.mxu1 %v1659_v28  ;;  %v84_v27 = vrot.slane %v79_v21, %v83_v20 }
  0x1c   :  { %275 = vmatprep.subr.bf16.mxu0 %v1660_v29  ;;  %348 = vmatprep.subr.bf16.mxu1 %v1662_v30  ;;  %v88_v30 = vrot.slane %v79_v21, %v87_v22 }
  0x1f   :  { %276 = vmatpush1.bf16.msra.mxu0 %v1664_v31  ;;  %349 = vmatpush1.bf16.msra.mxu1 %v1665_v32 }
  0x20   :  { %641 = vmatprep.subr.bf16.mxu0 %v1979_v35  ;;  %682 = vmatprep.subr.bf16.mxu1 %v1984_v36 }
  0x22   :  { %294 = vmatmul.mubr.bf16.vlgmr.msra.gmra.mrb[0].mxu0 %v43_v37  ;;  %367 = vmatmul.mubr.bf16.vlgmr.msra.gmra.mrb[0].mxu1 %v43_v37 }
  0x23   :  { %642 = vmatpush1.bf16.msra.mxu0 %v1989_v38  ;;  %683 = vmatpush1.bf16.msra.mxu1 %v1994_v39 }
  0x24   :  { %643 = vmatprep.subr.bf16.mxu0 %v2001_v40  ;;  %684 = vmatprep.subr.bf16.mxu1 %v2006_v41 }
  0x25   :  { %303 = vmatprep.mubr.bf16.mxu0 %v2723_v1  ;;  %376 = vmatprep.mubr.bf16.mxu1 %v2723_v1 }
  0x27   :  { %644 = vmatpush1.bf16.msra.mxu0 %v2011_v42  ;;  %685 = vmatpush1.bf16.msra.mxu1 %v2016_v43 }
  0x28   :  { %645 = vmatprep.subr.bf16.mxu0 %v2029_v46  ;;  %686 = vmatprep.subr.bf16.mxu1 %v2036_v47 }
  0x2a   :  { %304 = vmatmul.mubr.bf16.gmra.mrb[4].mxu0 %v44_v48  ;;  %377 = vmatmul.mubr.bf16.gmra.mrb[4].mxu1 %v44_v48 }
  0x2b   :  { %646 = vmatpush1.bf16.msra.mxu0 %v2043_v49  ;;  %687 = vmatpush1.bf16.msra.mxu1 %v2048_v50 }
  0x2c   :  { %647 = vmatprep.subr.bf16.mxu0 %v2055_v51  ;;  %688 = vmatprep.subr.bf16.mxu1 %v2062_v52 }
  0x2d   :  { %313 = vmatprep.mubr.bf16.mxu0 %v2723_v1  ;;  %386 = vmatprep.mubr.bf16.mxu1 %v2723_v1 }
  0x2f   :  { %648 = vmatpush1.bf16.msra.mxu0 %v2067_v53  ;;  %689 = vmatpush1.bf16.msra.mxu1 %v2072_v54 }
  0x30   :  { %649 = vmatprep.subr.bf16.mxu0 %v2087_v57  ;;  %690 = vmatprep.subr.bf16.mxu1 %v2092_v58 }
  0x32   :  { %314 = vmatmul.mubr.bf16.gmra.mrb[8].mxu0 %v45_v59  ;;  %387 = vmatmul.mubr.bf16.gmra.mrb[8].mxu1 %v45_v59 }
  0x33   :  { %650 = vmatpush1.bf16.msra.mxu0 %v2101_v60  ;;  %691 = vmatpush1.bf16.msra.mxu1 %v2106_v61 }
  0x34   :  { %651 = vmatprep.subr.bf16.mxu0 %v2113_v62  ;;  %692 = vmatprep.subr.bf16.mxu1 %v2118_v63 }
  0x35   :  { %323 = vmatprep.mubr.bf16.mxu0 %v2723_v1  ;;  %396 = vmatprep.mubr.bf16.mxu1 %v2723_v1 }
  0x37   :  { %652 = vmatpush1.bf16.msra.mxu0 %v2123_v0  ;;  %693 = vmatpush1.bf16.msra.mxu1 %v2130_v2 }
  0x38   :  { %653 = vmatprep.subr.bf16.mxu0 %v2143_v5  ;;  %694 = vmatprep.subr.bf16.mxu1 %v2148_v6 }
  0x3a   :  { %324 = vmatmul.mubr.bf16.gmra.mrb[12].mxu0 %v46_v7  ;;  %397 = vmatmul.mubr.bf16.gmra.mrb[12].mxu1 %v46_v7 }
  0x3b   :  { %654 = vmatpush1.bf16.msra.mxu0 %v2157_v8  ;;  %695 = vmatpush1.bf16.msra.mxu1 %v2162_v9 }
  0x3c   :  { %655 = vmatprep.subr.bf16.mxu0 %v2169_v10  ;;  %696 = vmatprep.subr.bf16.mxu1 %v2174_v11 }
  0x3d   :  { %673 = vmatprep.mubr.bf16.mxu0 %v2723_v1  ;;  %714 = vmatprep.mubr.bf16.mxu1 %v2723_v1 }
  0x3f   :  { %656 = vmatpush1.bf16.msra.mxu0 %v2181_v12  ;;  %697 = vmatpush1.bf16.msra.mxu1 %v2186_v13 }
  0x40   :  { %751 = vmatprep.subr.bf16.mxu0 %v1979_v35  ;;  %792 = vmatprep.subr.bf16.mxu1 %v1984_v36 }
  0x42   :  { %674 = vmatmul.mubr.bf16.vlgmr.msra.gmra.mrb[16].mxu0 %v480_v15  ;;  %715 = vmatmul.mubr.bf16.vlgmr.msra.gmra.mrb[16].mxu1 %v480_v15 }
  0x43   :  { %752 = vmatpush1.bf16.msra.mxu0 %v1989_v38  ;;  %793 = vmatpush1.bf16.msra.mxu1 %v1994_v39 }
  0x44   :  { %753 = vmatprep.subr.bf16.mxu0 %v2001_v40  ;;  %794 = vmatprep.subr.bf16.mxu1 %v2006_v41 }
  0x45   :  { %783 = vmatprep.mubr.bf16.mxu0 %v2723_v1  ;;  %824 = vmatprep.mubr.bf16.mxu1 %v2723_v1 }
  0x47   :  { %754 = vmatpush1.bf16.msra.mxu0 %v2011_v42  ;;  %795 = vmatpush1.bf16.msra.mxu1 %v2016_v43 }
  0x48   :  { %755 = vmatprep.subr.bf16.mxu0 %v2029_v46  ;;  %796 = vmatprep.subr.bf16.mxu1 %v2036_v47 }
  0x4b   :  { %756 = vmatpush1.bf16.msra.mxu0 %v2043_v49  ;;  %797 = vmatpush1.bf16.msra.mxu1 %v2048_v50 }
  0x4c   :  { %757 = vmatprep.subr.bf16.mxu0 %v2055_v51  ;;  %798 = vmatprep.subr.bf16.mxu1 %v2062_v52 }
  0x4f   :  { %758 = vmatpush1.bf16.msra.mxu0 %v2067_v53  ;;  %799 = vmatpush1.bf16.msra.mxu1 %v2072_v54 }
  0x50   :  { %759 = vmatprep.subr.bf16.mxu0 %v2087_v57  ;;  %800 = vmatprep.subr.bf16.mxu1 %v2092_v58 }
  0x53   :  { %760 = vmatpush1.bf16.msra.mxu0 %v2101_v60  ;;  %801 = vmatpush1.bf16.msra.mxu1 %v2106_v61 }
  0x54   :  { %761 = vmatprep.subr.bf16.mxu0 %v2113_v62  ;;  %802 = vmatprep.subr.bf16.mxu1 %v2118_v63 }
  0x57   :  { %762 = vmatpush1.bf16.msra.mxu0 %v2123_v0  ;;  %803 = vmatpush1.bf16.msra.mxu1 %v2130_v2 }
  0x58   :  { %763 = vmatprep.subr.bf16.mxu0 %v2143_v5  ;;  %804 = vmatprep.subr.bf16.mxu1 %v2148_v6 }
  0x5b   :  { %764 = vmatpush1.bf16.msra.mxu0 %v2157_v8  ;;  %805 = vmatpush1.bf16.msra.mxu1 %v2162_v9 }
  0x5c   :  { %765 = vmatprep.subr.bf16.mxu0 %v2169_v10  ;;  %806 = vmatprep.subr.bf16.mxu1 %v2174_v11 }
  0x5f   :  { %766 = vmatpush1.bf16.msra.mxu0 %v2181_v12  ;;  %807 = vmatpush1.bf16.msra.mxu1 %v2186_v13 }
  0x60   :  { %862 = vmatprep.subr.bf16.mxu0 %v1979_v35  ;;  %903 = vmatprep.subr.bf16.mxu1 %v1984_v36 }
  0xf5   :  { %v2238_v24 = vpop.f32.mrb[0].mxu0  ;;  %v2240_v25 = vpop.f32.mrb[0].mxu1 }
  0xf6   :  { %v297_v28 = vpop.f32.mrb[1].mxu0  ;;  %v370_v29 = vpop.f32.mrb[1].mxu1 }
  0xf7   :  { %v299_v31 = vpop.f32.mrb[2].mxu0  ;;  %v372_v32 = vpop.f32.mrb[2].mxu1 }
  0xf8   :  { %v2244_v33 = vadd.f32 %v299_v31, %v84_v27  ;;  %v301_v34 = vpop.f32.mrb[3].mxu0  ;;  %v2247_v37 = vadd.f32 %v372_v32, %v2236_v23  ;;  %v374_v44 = vpop.f32.mrb[3].mxu1 }
  0xf9   :  { %v2249_v45 = vadd.f32 %v301_v34, %v88_v30  ;;  %v2252_v48 = vadd.f32 %v374_v44, %v2242_v26 }
  0xfd   :  { %v305_v55 = vpop.f32.mrb[4].mxu0  ;;  %v378_v56 = vpop.f32.mrb[4].mxu1 }
  0xfe   :  { %v2254_v59 = vadd.f32 %v305_v55, %v84_v27  ;;  %v307_v3 = vpop.f32.mrb[5].mxu0  ;;  %v2257_v4 = vadd.f32 %v378_v56, %v2236_v23  ;;  %v380_v7 = vpop.f32.mrb[5].mxu1 }
  0xff   :  { %v2259_v14 = vadd.f32 %v307_v3, %v88_v30  ;;  %v309_v15 = vpop.f32.mrb[6].mxu0  ;;  %v2262_v16 = vadd.f32 %v380_v7, %v2242_v26  ;;  %v382_v17 = vpop.f32.mrb[6].mxu1 }
 0x100   :  { %v2264_v18 = vadd.f32 %v309_v15, %v84_v27  ;;  %v311_v19 = vpop.f32.mrb[7].mxu0  ;;  %v2267_v20 = vadd.f32 %v382_v17, %v2236_v23  ;;  %v384_v21 = vpop.f32.mrb[7].mxu1 }
 0x101   :  { %v2269_v22 = vadd.f32 %v311_v19, %v88_v30  ;;  %v2272_v31 = vadd.f32 %v384_v21, %v2242_v26 }
 0x102   :  { %2725 = vst [vmem:[#allocation5_spill] sm:$0xff] %v2264_v18  ;;  %2726 = vst [vmem:[#allocation6_spill] sm:$0xff] %v2267_v20 }
 0x103   :  { %2727 = vst [vmem:[#allocation7_spill] sm:$0xff] %v2269_v22  ;;  %2728 = vst [vmem:[#allocation8_spill] sm:$0xff] %v2272_v31 }
 0x105   :  { %v315_v32 = vpop.f32.mrb[8].mxu0  ;;  %v388_v34 = vpop.f32.mrb[8].mxu1 }
 0x106   :  { %v2274_v44 = vadd.f32 %v315_v32, %v84_v27  ;;  %v317_v55 = vpop.f32.mrb[9].mxu0  ;;  %v2277_v56 = vadd.f32 %v388_v34, %v2236_v23  ;;  %v390_v3 = vpop.f32.mrb[9].mxu1 }
 0x107   :  { %v2279_v7 = vadd.f32 %v317_v55, %v88_v30  ;;  %v319_v15 = vpop.f32.mrb[10].mxu0  ;;  %v2282_v17 = vadd.f32 %v390_v3, %v2242_v26  ;;  %v392_v19 = vpop.f32.mrb[10].mxu1 }
 0x108   :  { %2729 = vst [vmem:[#allocation9_spill] sm:$0xff] %v2274_v44  ;;  %2730 = vst [vmem:[#allocation10_spill] sm:$0xff] %v2277_v56  ;;  %v2284_v1 = vadd.f32 %v319_v15, %v84_v27  ;;  %v321_v21 = vpop.f32.mrb[11].mxu0  ;;  %v2287_v31 = vadd.f32 %v392_v19, %v2236_v23  ;;  %v394_v32 = vpop.f32.mrb[11].mxu1 }
 0x109   :  { %2731 = vst [vmem:[#allocation11_spill] sm:$0xff] %v2279_v7  ;;  %2732 = vst [vmem:[#allocation12_spill] sm:$0xff] %v2282_v17  ;;  %v2289_v44 = vadd.f32 %v321_v21, %v88_v30  ;;  %v2292_v34 = vadd.f32 %v394_v32, %v2242_v26 }
 0x10a   :  { %2733 = vst [vmem:[#allocation13_spill] sm:$0xff] %v2284_v1  ;;  %2734 = vst [vmem:[#allocation14_spill] sm:$0xff] %v2287_v31 }
 0x10b   :  { %2735 = vst [vmem:[#allocation15_spill] sm:$0xff] %v2289_v44  ;;  %2736 = vst [vmem:[#allocation16_spill] sm:$0xff] %v2292_v34 }
 0x10d   :  { %v325_v56 = vpop.f32.mrb[12].mxu0  ;;  %v398_v55 = vpop.f32.mrb[12].mxu1 }
 0x10e   :  { %v2294_v7 = vadd.f32 %v325_v56, %v84_v27  ;;  %v327_v22 = vpop.f32.mrb[13].mxu0  ;;  %v2297_v3 = vadd.f32 %v398_v55, %v2236_v23  ;;  %v400_v15 = vpop.f32.mrb[13].mxu1 }
 0x10f   :  { %v2299_v1 = vadd.f32 %v327_v22, %v88_v30  ;;  %v329_v17 = vpop.f32.mrb[14].mxu0  ;;  %v2302_v19 = vadd.f32 %v400_v15, %v2242_v26  ;;  %v402_v21 = vpop.f32.mrb[14].mxu1  ;;  %v296_v22 = vadd.f32 %v2238_v24, %v84_v27  ;;  %v298_v15 = vadd.f32 %v297_v28, %v88_v30 }
 0x110   :  { %2737 = vst [vmem:[#allocation17_spill] sm:$0xff] %v2294_v7  ;;  %2738 = vst [vmem:[#allocation18_spill] sm:$0xff] %v2297_v3  ;;  %v2304_v44 = vadd.f32 %v329_v17, %v84_v27  ;;  %v331_v32 = vpop.f32.mrb[15].mxu0  ;;  %v2307_v34 = vadd.f32 %v402_v21, %v2236_v23  ;;  %v404_v56 = vpop.f32.mrb[15].mxu1 }
 0x111   :  { %2739 = vst [vmem:[#allocation19_spill] sm:$0xff] %v2299_v1  ;;  %2740 = vst [vmem:[#allocation20_spill] sm:$0xff] %v2302_v19  ;;  %v2309_v7 = vadd.f32 %v331_v32, %v88_v30  ;;  %v2312_v55 = vadd.f32 %v404_v56, %v2242_v26  ;;  %v369_v1 = vadd.f32 %v2240_v25, %v2236_v23 }
 0x112   :  { %2741 = vst [vmem:[#allocation21_spill] sm:$0xff] %v2304_v44  ;;  %2742 = vst [vmem:[#allocation22_spill] sm:$0xff] %v2307_v34  ;;  %v371_v19 = vadd.f32 %v370_v29, %v2242_v26 }
 0x113   :  { %2743 = vst [vmem:[#allocation23_spill] sm:$0xff] %v2309_v7  ;;  %2744 = vst [vmem:[#allocation24_spill] sm:$0xff] %v2312_v55 }
 0x115   :  { %v675_v17 = vpop.f32.mrb[16].mxu0  ;;  %v716_v44 = vpop.f32.mrb[16].mxu1 }
 0x116   :  { %v723_v3 = vadd.f32 %v675_v17, %v296_v22  ;;  %v725_v31 = vadd.f32 %v716_v44, %v369_v1  ;;  %v677_v21 = vpop.f32.mrb[17].mxu0  ;;  %v718_v34 = vpop.f32.mrb[17].mxu1  ;;  %v33_v1 = vld [vmem:[%s2719_s2] sm:$0xff] }
 0x117   :  { %v724_v20 = vadd.f32 %v677_v21, %v298_v15  ;;  %v726_v32 = vadd.f32 %v718_v34, %v371_v19  ;;  %v679_v7 = vpop.f32.mrb[18].mxu0  ;;  %v720_v18 = vpop.f32.mrb[18].mxu1 }
 0x118   :  { %1714 = vtanh.f32 %v723_v3  ;;  %v680_v56 = vpop.f32.mrb[19].mxu0  ;;  %v721_v55 = vpop.f32.mrb[19].mxu1 }
 0x119   :  { %1716 = vtanh.f32 %v724_v20  ;;  %v2745_v55 = vmov 0  }
 0x11a   :  { %1718 = vtanh.f32 %v726_v32 }
 0x11b   :  { %1720 = vtanh.f32 %v725_v31 }
 0x122   :  { %v1715_v24 = vpop.eup %1714 }
 0x123   :  { %v730_v23 = vmul.f32 0.5, %v1715_v24  ;;  %v1717_v25 = vpop.eup %1716 }
 0x124   :  { %v731_v26 = vmul.f32 0.5, %v1717_v25  ;;  %v1719_v28 = vpop.eup %1718 }
 0x125   :  { %v733_v27 = vadd.f32 0.5, %v730_v23  ;;  %v1721_v20 = vpop.eup %1720 }
 0x126   :  { %v734_v29 = vadd.f32 0.5, %v731_v26  ;;  %v732_v7 = vmul.f32 0.5, %v1721_v20 }
 0x127   :  { %v738_v30 = vmul.f32 %v1719_v28, %v733_v27 }
 0x128   :  { %v737_v44 = vmul.f32 %v734_v29, %v33_v1  ;;  %v735_v34 = vadd.f32 0.5, %v732_v7 }
 0x12a   :  { %v2321_v18 = vadd.f32 %v738_v30, %v737_v44 }
 0x12c   :  { %1722 = vtanh.f32 %v2321_v18 }
 0x136   :  { %v1723_v3 = vpop.eup %1722 }
 0x137   :  { %v741_v19 = vmul.f32 %v1723_v3, %v735_v34 }
 0x139   :  { %742 = vst [vmem:[%s2720_s6] sm:$0xff] %v741_v19  ;;  %v750_v31 = vpack.c.bf16 %v741_v19, %v741_v19 }
 0x13b   :  { %784 = vmatmul.mubr.bf16.vlgmr.msra.gmra.mrb[20].mxu0 %v750_v31  ;;  %825 = vmatmul.mubr.bf16.vlgmr.msra.gmra.mrb[20].mxu1 %v750_v31 }
 0x13c   :  { %863 = vmatpush1.bf16.msra.mxu0 %v1989_v38  ;;  %904 = vmatpush1.bf16.msra.mxu1 %v1994_v39 }
 0x13d   :  { %864 = vmatprep.subr.bf16.mxu0 %v2001_v40  ;;  %905 = vmatprep.subr.bf16.mxu1 %v2006_v41 }
 0x13e   :  { %894 = vmatprep.mubr.bf16.mxu0 %v2745_v55  ;;  %935 = vmatprep.mubr.bf16.mxu1 %v2745_v55 }
 0x140   :  { %865 = vmatpush1.bf16.msra.mxu0 %v2011_v42  ;;  %906 = vmatpush1.bf16.msra.mxu1 %v2016_v43 }
 0x141   :  { %866 = vmatprep.subr.bf16.mxu0 %v2029_v46  ;;  %907 = vmatprep.subr.bf16.mxu1 %v2036_v47 }
 0x144   :  { %867 = vmatpush1.bf16.msra.mxu0 %v2043_v49  ;;  %908 = vmatpush1.bf16.msra.mxu1 %v2048_v50 }
 0x145   :  { %868 = vmatprep.subr.bf16.mxu0 %v2055_v51  ;;  %909 = vmatprep.subr.bf16.mxu1 %v2062_v52 }
 0x148   :  { %869 = vmatpush1.bf16.msra.mxu0 %v2067_v53  ;;  %910 = vmatpush1.bf16.msra.mxu1 %v2072_v54 }
 0x149   :  { %870 = vmatprep.subr.bf16.mxu0 %v2087_v57  ;;  %911 = vmatprep.subr.bf16.mxu1 %v2092_v58 }
 0x14c   :  { %871 = vmatpush1.bf16.msra.mxu0 %v2101_v60  ;;  %912 = vmatpush1.bf16.msra.mxu1 %v2106_v61 }
 0x14d   :  { %872 = vmatprep.subr.bf16.mxu0 %v2113_v62  ;;  %913 = vmatprep.subr.bf16.mxu1 %v2118_v63 }
 0x150   :  { %873 = vmatpush1.bf16.msra.mxu0 %v2123_v0  ;;  %914 = vmatpush1.bf16.msra.mxu1 %v2130_v2 }
 0x151   :  { %874 = vmatprep.subr.bf16.mxu0 %v2143_v5  ;;  %915 = vmatprep.subr.bf16.mxu1 %v2148_v6 }
 0x154   :  { %875 = vmatpush1.bf16.msra.mxu0 %v2157_v8  ;;  %916 = vmatpush1.bf16.msra.mxu1 %v2162_v9 }
 0x155   :  { %876 = vmatprep.subr.bf16.mxu0 %v2169_v10  ;;  %917 = vmatprep.subr.bf16.mxu1 %v2174_v11 }
 0x158   :  { %877 = vmatpush1.bf16.msra.mxu0 %v2181_v12  ;;  %918 = vmatpush1.bf16.msra.mxu1 %v2186_v13 }
 0x159   :  { %973 = vmatprep.subr.bf16.mxu0 %v1979_v35  ;;  %1014 = vmatprep.subr.bf16.mxu1 %v1984_v36 }
 0x20e   :  { %v785_v22 = vpop.f32.mrb[20].mxu0  ;;  %v826_v15 = vpop.f32.mrb[20].mxu1 }
 0x20f   :  { %v833_v17 = vadd.f32 %v785_v22, %v2244_v33  ;;  %v835_v21 = vadd.f32 %v826_v15, %v2247_v37  ;;  %v787_v32 = vpop.f32.mrb[21].mxu0  ;;  %v828_v56 = vpop.f32.mrb[21].mxu1 }
 0x210   :  { %v834_v24 = vadd.f32 %v787_v32, %v2249_v45  ;;  %v836_v23 = vadd.f32 %v828_v56, %v2252_v48  ;;  %v789_v25 = vpop.f32.mrb[22].mxu0  ;;  %v830_v27 = vpop.f32.mrb[22].mxu1 }
 0x211   :  { %1724 = vtanh.f32 %v833_v17  ;;  %v790_v26 = vpop.f32.mrb[23].mxu0  ;;  %v831_v28 = vpop.f32.mrb[23].mxu1 }
 0x212   :  { %1726 = vtanh.f32 %v834_v24 }
 0x213   :  { %1728 = vtanh.f32 %v836_v23 }
 0x214   :  { %1730 = vtanh.f32 %v835_v21 }
 0x21b   :  { %v1725_v1 = vpop.eup %1724 }
 0x21c   :  { %v840_v29 = vmul.f32 0.5, %v1725_v1  ;;  %v1727_v30 = vpop.eup %1726 }
 0x21d   :  { %v841_v33 = vmul.f32 0.5, %v1727_v30  ;;  %v1729_v37 = vpop.eup %1728 }
 0x21e   :  { %v843_v44 = vadd.f32 0.5, %v840_v29  ;;  %v1731_v48 = vpop.eup %1730 }
 0x21f   :  { %v844_v20 = vadd.f32 0.5, %v841_v33  ;;  %v842_v3 = vmul.f32 0.5, %v1731_v48 }
 0x220   :  { %v848_v7 = vmul.f32 %v1729_v37, %v843_v44 }
 0x221   :  { %v847_v45 = vmul.f32 %v844_v20, %v2321_v18  ;;  %v845_v19 = vadd.f32 0.5, %v842_v3 }
 0x223   :  { %v2366_v34 = vadd.f32 %v848_v7, %v847_v45 }
 0x225   :  { %1732 = vtanh.f32 %v2366_v34 }
 0x22f   :  { %v1733_v31 = vpop.eup %1732 }
 0x230   :  { %v851_v22 = vmul.f32 %v1733_v31, %v845_v19 }
 0x232   :  { %1610 = vst [vmem:[%s2720_s6 + $0x8] sm:$0xff] %v851_v22  ;;  %v861_v15 = vpack.c.bf16 %v851_v22, %v851_v22 }
 0x234   :  { %895 = vmatmul.mubr.bf16.vlgmr.msra.gmra.mrb[24].mxu0 %v861_v15  ;;  %936 = vmatmul.mubr.bf16.vlgmr.msra.gmra.mrb[24].mxu1 %v861_v15  ;;  %v2746_v15 = vld [vmem:[#allocation5_spill] sm:$0xff] }
 0x235   :  { %974 = vmatpush1.bf16.msra.mxu0 %v1989_v38  ;;  %1015 = vmatpush1.bf16.msra.mxu1 %v1994_v39 }
 0x236   :  { %975 = vmatprep.subr.bf16.mxu0 %v2001_v40  ;;  %1016 = vmatprep.subr.bf16.mxu1 %v2006_v41 }
 0x237   :  { %1005 = vmatprep.mubr.bf16.mxu0 %v2745_v55  ;;  %1046 = vmatprep.mubr.bf16.mxu1 %v2745_v55 }
 0x239   :  { %976 = vmatpush1.bf16.msra.mxu0 %v2011_v42  ;;  %1017 = vmatpush1.bf16.msra.mxu1 %v2016_v43 }
 0x23a   :  { %977 = vmatprep.subr.bf16.mxu0 %v2029_v46  ;;  %1018 = vmatprep.subr.bf16.mxu1 %v2036_v47 }
 0x23d   :  { %978 = vmatpush1.bf16.msra.mxu0 %v2043_v49  ;;  %1019 = vmatpush1.bf16.msra.mxu1 %v2048_v50 }
 0x23e   :  { %979 = vmatprep.subr.bf16.mxu0 %v2055_v51  ;;  %1020 = vmatprep.subr.bf16.mxu1 %v2062_v52 }
 0x241   :  { %980 = vmatpush1.bf16.msra.mxu0 %v2067_v53  ;;  %1021 = vmatpush1.bf16.msra.mxu1 %v2072_v54 }
 0x242   :  { %981 = vmatprep.subr.bf16.mxu0 %v2087_v57  ;;  %1022 = vmatprep.subr.bf16.mxu1 %v2092_v58 }
 0x245   :  { %982 = vmatpush1.bf16.msra.mxu0 %v2101_v60  ;;  %1023 = vmatpush1.bf16.msra.mxu1 %v2106_v61 }
 0x246   :  { %983 = vmatprep.subr.bf16.mxu0 %v2113_v62  ;;  %1024 = vmatprep.subr.bf16.mxu1 %v2118_v63 }
 0x249   :  { %984 = vmatpush1.bf16.msra.mxu0 %v2123_v0  ;;  %1025 = vmatpush1.bf16.msra.mxu1 %v2130_v2 }
 0x24a   :  { %985 = vmatprep.subr.bf16.mxu0 %v2143_v5  ;;  %1026 = vmatprep.subr.bf16.mxu1 %v2148_v6 }
 0x24d   :  { %986 = vmatpush1.bf16.msra.mxu0 %v2157_v8  ;;  %1027 = vmatpush1.bf16.msra.mxu1 %v2162_v9 }
 0x24e   :  { %987 = vmatprep.subr.bf16.mxu0 %v2169_v10  ;;  %1028 = vmatprep.subr.bf16.mxu1 %v2174_v11 }
 0x251   :  { %988 = vmatpush1.bf16.msra.mxu0 %v2181_v12  ;;  %1029 = vmatpush1.bf16.msra.mxu1 %v2186_v13 }
 0x252   :  { %1084 = vmatprep.subr.bf16.mxu0 %v1979_v35  ;;  %1125 = vmatprep.subr.bf16.mxu1 %v1984_v36 }
 0x307   :  { %v896_v18 = vpop.f32.mrb[24].mxu0  ;;  %v937_v17 = vpop.f32.mrb[24].mxu1 }
 0x308   :  { %v944_v21 = vadd.f32 %v896_v18, %v2254_v59  ;;  %v946_v32 = vadd.f32 %v937_v17, %v2257_v4  ;;  %v898_v56 = vpop.f32.mrb[25].mxu0  ;;  %v939_v24 = vpop.f32.mrb[25].mxu1  ;;  %v2747_v17 = vld [vmem:[#allocation6_spill] sm:$0xff] }
 0x309   :  { %v945_v23 = vadd.f32 %v898_v56, %v2259_v14  ;;  %v947_v25 = vadd.f32 %v939_v24, %v2262_v16  ;;  %v900_v27 = vpop.f32.mrb[26].mxu0  ;;  %v941_v26 = vpop.f32.mrb[26].mxu1  ;;  %v2748_v24 = vld [vmem:[#allocation7_spill] sm:$0xff] }
 0x30a   :  { %1734 = vtanh.f32 %v944_v21  ;;  %v901_v28 = vpop.f32.mrb[27].mxu0  ;;  %v942_v1 = vpop.f32.mrb[27].mxu1 }
 0x30b   :  { %1736 = vtanh.f32 %v945_v23 }
 0x30c   :  { %1738 = vtanh.f32 %v947_v25  ;;  %v2749_v25 = vld [vmem:[#allocation8_spill] sm:$0xff] }
 0x30d   :  { %1740 = vtanh.f32 %v946_v32 }
 0x314   :  { %v1735_v29 = vpop.eup %1734 }
 0x315   :  { %v951_v30 = vmul.f32 0.5, %v1735_v29  ;;  %v1737_v44 = vpop.eup %1736 }
 0x316   :  { %v952_v59 = vmul.f32 0.5, %v1737_v44  ;;  %v1739_v4 = vpop.eup %1738 }
 0x317   :  { %v954_v33 = vadd.f32 0.5, %v951_v30  ;;  %v1741_v16 = vpop.eup %1740 }
 0x318   :  { %v955_v37 = vadd.f32 0.5, %v952_v59  ;;  %v953_v45 = vmul.f32 0.5, %v1741_v16 }
 0x319   :  { %v959_v20 = vmul.f32 %v1739_v4, %v954_v33 }
 0x31a   :  { %v958_v14 = vmul.f32 %v955_v37, %v2366_v34  ;;  %v956_v48 = vadd.f32 0.5, %v953_v45 }
 0x31c   :  { %v2411_v7 = vadd.f32 %v959_v20, %v958_v14 }
 0x31e   :  { %1742 = vtanh.f32 %v2411_v7 }
 0x328   :  { %v1743_v3 = vpop.eup %1742 }
 0x329   :  { %v962_v19 = vmul.f32 %v1743_v3, %v956_v48 }
 0x32b   :  { %1611 = vst [vmem:[%s2720_s6 + $0x10] sm:$0xff] %v962_v19  ;;  %v972_v31 = vpack.c.bf16 %v962_v19, %v962_v19 }
 0x32d   :  { %1006 = vmatmul.mubr.bf16.vlgmr.msra.gmra.mrb[28].mxu0 %v972_v31  ;;  %1047 = vmatmul.mubr.bf16.vlgmr.msra.gmra.mrb[28].mxu1 %v972_v31 }
 0x32e   :  { %1085 = vmatpush1.bf16.msra.mxu0 %v1989_v38  ;;  %1126 = vmatpush1.bf16.msra.mxu1 %v1994_v39 }
 0x32f   :  { %1086 = vmatprep.subr.bf16.mxu0 %v2001_v40  ;;  %1127 = vmatprep.subr.bf16.mxu1 %v2006_v41 }
 0x330   :  { %1116 = vmatprep.mubr.bf16.mxu0 %v2745_v55  ;;  %1157 = vmatprep.mubr.bf16.mxu1 %v2745_v55 }
 0x332   :  { %1087 = vmatpush1.bf16.msra.mxu0 %v2011_v42  ;;  %1128 = vmatpush1.bf16.msra.mxu1 %v2016_v43 }
 0x333   :  { %1088 = vmatprep.subr.bf16.mxu0 %v2029_v46  ;;  %1129 = vmatprep.subr.bf16.mxu1 %v2036_v47 }
 0x336   :  { %1089 = vmatpush1.bf16.msra.mxu0 %v2043_v49  ;;  %1130 = vmatpush1.bf16.msra.mxu1 %v2048_v50 }
 0x337   :  { %1090 = vmatprep.subr.bf16.mxu0 %v2055_v51  ;;  %1131 = vmatprep.subr.bf16.mxu1 %v2062_v52 }
 0x33a   :  { %1091 = vmatpush1.bf16.msra.mxu0 %v2067_v53  ;;  %1132 = vmatpush1.bf16.msra.mxu1 %v2072_v54 }
 0x33b   :  { %1092 = vmatprep.subr.bf16.mxu0 %v2087_v57  ;;  %1133 = vmatprep.subr.bf16.mxu1 %v2092_v58 }
 0x33e   :  { %1093 = vmatpush1.bf16.msra.mxu0 %v2101_v60  ;;  %1134 = vmatpush1.bf16.msra.mxu1 %v2106_v61 }
 0x33f   :  { %1094 = vmatprep.subr.bf16.mxu0 %v2113_v62  ;;  %1135 = vmatprep.subr.bf16.mxu1 %v2118_v63 }
 0x342   :  { %1095 = vmatpush1.bf16.msra.mxu0 %v2123_v0  ;;  %1136 = vmatpush1.bf16.msra.mxu1 %v2130_v2 }
 0x343   :  { %1096 = vmatprep.subr.bf16.mxu0 %v2143_v5  ;;  %1137 = vmatprep.subr.bf16.mxu1 %v2148_v6 }
 0x346   :  { %1097 = vmatpush1.bf16.msra.mxu0 %v2157_v8  ;;  %1138 = vmatpush1.bf16.msra.mxu1 %v2162_v9 }
 0x347   :  { %1098 = vmatprep.subr.bf16.mxu0 %v2169_v10  ;;  %1139 = vmatprep.subr.bf16.mxu1 %v2174_v11 }
 0x34a   :  { %1099 = vmatpush1.bf16.msra.mxu0 %v2181_v12  ;;  %1140 = vmatpush1.bf16.msra.mxu1 %v2186_v13 }
 0x34b   :  { %1195 = vmatprep.subr.bf16.mxu0 %v1979_v35  ;;  %1236 = vmatprep.subr.bf16.mxu1 %v1984_v36 }
 0x400   :  { %v1007_v34 = vpop.f32.mrb[28].mxu0  ;;  %v1048_v22 = vpop.f32.mrb[28].mxu1 }
 0x401   :  { %v1055_v18 = vadd.f32 %v1007_v34, %v2746_v15  ;;  %v1057_v21 = vadd.f32 %v1048_v22, %v2747_v17  ;;  %v1009_v32 = vpop.f32.mrb[29].mxu0  ;;  %v1050_v56 = vpop.f32.mrb[29].mxu1 }
 0x402   :  { %v1056_v23 = vadd.f32 %v1009_v32, %v2748_v24  ;;  %v1058_v27 = vadd.f32 %v1050_v56, %v2749_v25  ;;  %v1011_v26 = vpop.f32.mrb[30].mxu0  ;;  %v1052_v28 = vpop.f32.mrb[30].mxu1 }
 0x403   :  { %1744 = vtanh.f32 %v1055_v18  ;;  %v1012_v1 = vpop.f32.mrb[31].mxu0  ;;  %v1053_v29 = vpop.f32.mrb[31].mxu1 }
 0x404   :  { %1746 = vtanh.f32 %v1056_v23 }
 0x405   :  { %1748 = vtanh.f32 %v1058_v27 }
 0x406   :  { %1750 = vtanh.f32 %v1057_v21 }
 0x40d   :  { %v1745_v35 = vpop.eup %1744 }
 0x40e   :  { %v1062_v36 = vmul.f32 0.5, %v1745_v35  ;;  %v1747_v30 = vpop.eup %1746 }
 0x40f   :  { %v1063_v33 = vmul.f32 0.5, %v1747_v30  ;;  %v1749_v59 = vpop.eup %1748 }
 0x410   :  { %v1065_v44 = vadd.f32 0.5, %v1062_v36  ;;  %v1751_v16 = vpop.eup %1750 }
 0x411   :  { %v1066_v4 = vadd.f32 0.5, %v1063_v33  ;;  %v1064_v45 = vmul.f32 0.5, %v1751_v16  ;;  %v2520_v33 = vld [vmem:[%s2715_s4] ss:$16 sps:$4 sm:$0xff]   ;;  %v2558_v16 = vld [vmem:[%s2715_s4 + $0x44] ss:$16 sps:$4 sm:$0xff]  }
 0x412   :  { %v1070_v37 = vmul.f32 %v1749_v59, %v1065_v44  ;;  %v2526_v59 = vld [vmem:[%s2715_s4 + $0x8] ss:$16 sps:$4 sm:$0xff]  }
 0x413   :  { %v1069_v20 = vmul.f32 %v1066_v4, %v2411_v7  ;;  %v1067_v48 = vadd.f32 0.5, %v1064_v45  ;;  %v2532_v4 = vld [vmem:[%s2715_s4 + $0x24] ss:$16 sps:$4 sm:$0xff]   ;;  %v2564_v45 = vld [vmem:[%s2715_s4 + $0x4c] ss:$16 sps:$4 sm:$0xff]  }
 0x415   :  { %v2456_v14 = vadd.f32 %v1070_v37, %v1069_v20  ;;  %v2538_v37 = vld [vmem:[%s2715_s4 + $0x2c] ss:$16 sps:$4 sm:$0xff]   ;;  %v2546_v20 = vld [vmem:[%s2715_s4 + $0x20] ss:$16 sps:$4 sm:$0xff]  }
 0x417   :  { %1752 = vtanh.f32 %v2456_v14 }
 0x421   :  { %v1753_v3 = vpop.eup %1752 }
 0x422   :  { %v1073_v19 = vmul.f32 %v1753_v3, %v1067_v48  ;;  %v2570_v48 = vld [vmem:[%s2715_s4 + $0x40] ss:$16 sps:$4 sm:$0xff]   ;;  %v2576_v3 = vld [vmem:[%s2715_s4 + $0x48] ss:$16 sps:$4 sm:$0xff]  }
 0x424   :  { %1612 = vst [vmem:[%s2720_s6 + $0x18] sm:$0xff] %v1073_v19  ;;  %v1083_v31 = vpack.c.bf16 %v1073_v19, %v1073_v19  ;;  %v2582_v19 = vld [vmem:[%s2715_s4 + $0x64] ss:$16 sps:$4 sm:$0xff]  }
 0x426   :  { %1117 = vmatmul.mubr.bf16.vlgmr.msra.gmra.mrb[32].mxu0 %v1083_v31  ;;  %1158 = vmatmul.mubr.bf16.vlgmr.msra.gmra.mrb[32].mxu1 %v1083_v31  ;;  %v2588_v31 = vld [vmem:[%s2715_s4 + $0x6c] ss:$16 sps:$4 sm:$0xff]  }
 0x427   :  { %1196 = vmatpush1.bf16.msra.mxu0 %v1989_v38  ;;  %1237 = vmatpush1.bf16.msra.mxu1 %v1994_v39  ;;  %v2497_v38 = vld [vmem:[%s2715_s4 + $0x4] ss:$16 sps:$4 sm:$0xff]   ;;  %v2503_v39 = vld [vmem:[%s2715_s4 + $0xc] ss:$16 sps:$4 sm:$0xff]  }
 0x428   :  { %1197 = vmatprep.subr.bf16.mxu0 %v2001_v40  ;;  %1238 = vmatprep.subr.bf16.mxu1 %v2006_v41 }
 0x429   :  { %1227 = vmatprep.mubr.bf16.mxu0 %v2745_v55  ;;  %1268 = vmatprep.mubr.bf16.mxu1 %v2745_v55 }
 0x42b   :  { %1198 = vmatpush1.bf16.msra.mxu0 %v2011_v42  ;;  %1239 = vmatpush1.bf16.msra.mxu1 %v2016_v43  ;;  %v2750_v42 = vld [vmem:[#allocation9_spill] sm:$0xff] }
 0x42c   :  { %1199 = vmatprep.subr.bf16.mxu0 %v2029_v46  ;;  %1240 = vmatprep.subr.bf16.mxu1 %v2036_v47  ;;  %v2751_v46 = vld [vmem:[#allocation10_spill] sm:$0xff] }
 0x42f   :  { %1200 = vmatpush1.bf16.msra.mxu0 %v2043_v49  ;;  %1241 = vmatpush1.bf16.msra.mxu1 %v2048_v50 }
 0x430   :  { %1201 = vmatprep.subr.bf16.mxu0 %v2055_v51  ;;  %1242 = vmatprep.subr.bf16.mxu1 %v2062_v52  ;;  %v2752_v51 = vld [vmem:[#allocation11_spill] sm:$0xff] }
 0x433   :  { %1202 = vmatpush1.bf16.msra.mxu0 %v2067_v53  ;;  %1243 = vmatpush1.bf16.msra.mxu1 %v2072_v54  ;;  %v2753_v53 = vld [vmem:[#allocation12_spill] sm:$0xff] }
 0x434   :  { %1203 = vmatprep.subr.bf16.mxu0 %v2087_v57  ;;  %1244 = vmatprep.subr.bf16.mxu1 %v2092_v58 }
 0x437   :  { %1204 = vmatpush1.bf16.msra.mxu0 %v2101_v60  ;;  %1245 = vmatpush1.bf16.msra.mxu1 %v2106_v61 }
 0x438   :  { %1205 = vmatprep.subr.bf16.mxu0 %v2113_v62  ;;  %1246 = vmatprep.subr.bf16.mxu1 %v2118_v63 }
 0x43b   :  { %1206 = vmatpush1.bf16.msra.mxu0 %v2123_v0  ;;  %1247 = vmatpush1.bf16.msra.mxu1 %v2130_v2 }
 0x43c   :  { %1207 = vmatprep.subr.bf16.mxu0 %v2143_v5  ;;  %1248 = vmatprep.subr.bf16.mxu1 %v2148_v6 }
 0x43f   :  { %1208 = vmatpush1.bf16.msra.mxu0 %v2157_v8  ;;  %1249 = vmatpush1.bf16.msra.mxu1 %v2162_v9 }
 0x440   :  { %1209 = vmatprep.subr.bf16.mxu0 %v2169_v10  ;;  %1250 = vmatprep.subr.bf16.mxu1 %v2174_v11 }
 0x443   :  { %1210 = vmatpush1.bf16.msra.mxu0 %v2181_v12  ;;  %1251 = vmatpush1.bf16.msra.mxu1 %v2186_v13 }
 0x444   :  { %1306 = vmatprep.subr.bf16.mxu0 %v2497_v38  ;;  %1347 = vmatprep.subr.bf16.mxu1 %v2503_v39 }
 0x4f9   :  { %v1118_v40 = vpop.f32.mrb[32].mxu0  ;;  %v1159_v41 = vpop.f32.mrb[32].mxu1 }
 0x4fa   :  { %v1166_v43 = vadd.f32 %v1118_v40, %v2750_v42  ;;  %v1168_v47 = vadd.f32 %v1159_v41, %v2751_v46  ;;  %v1120_v49 = vpop.f32.mrb[33].mxu0  ;;  %v1161_v50 = vpop.f32.mrb[33].mxu1  ;;  %v2594_v40 = vld [vmem:[%s2715_s4 + $0x60] ss:$16 sps:$4 sm:$0xff]  }
 0x4fb   :  { %v1167_v52 = vadd.f32 %v1120_v49, %v2752_v51  ;;  %v1169_v7 = vadd.f32 %v1161_v50, %v2753_v53  ;;  %v1122_v34 = vpop.f32.mrb[34].mxu0  ;;  %v1163_v22 = vpop.f32.mrb[34].mxu1 }
 0x4fc   :  { %1754 = vtanh.f32 %v1166_v43  ;;  %v1123_v15 = vpop.f32.mrb[35].mxu0  ;;  %v1164_v18 = vpop.f32.mrb[35].mxu1 }
 0x4fd   :  { %1756 = vtanh.f32 %v1167_v52  ;;  %v1810_v15 = vld [vmem:[%s2715_s4 + $0x84] ss:$16 sps:$4 sm:$0xff]   ;;  %v1811_v18 = vld [vmem:[%s2715_s4 + $0x8c] ss:$16 sps:$4 sm:$0xff]  }
 0x4fe   :  { %1758 = vtanh.f32 %v1169_v7 }
 0x4ff   :  { %1760 = vtanh.f32 %v1168_v47 }
 0x506   :  { %v1755_v17 = vpop.eup %1754 }
 0x507   :  { %v1173_v21 = vmul.f32 0.5, %v1755_v17  ;;  %v1757_v32 = vpop.eup %1756  ;;  %v1812_v17 = vld [vmem:[%s2715_s4 + $0x80] ss:$16 sps:$4 sm:$0xff]  }
 0x508   :  { %v1174_v24 = vmul.f32 0.5, %v1757_v32  ;;  %v1759_v23 = vpop.eup %1758  ;;  %v1814_v32 = vld [vmem:[%s2715_s4 + $0xa4] ss:$16 sps:$4 sm:$0xff]  }
 0x509   :  { %v1176_v56 = vadd.f32 0.5, %v1173_v21  ;;  %v1761_v1 = vpop.eup %1760  ;;  %v1813_v21 = vld [vmem:[%s2715_s4 + $0x88] ss:$16 sps:$4 sm:$0xff]  }
 0x50a   :  { %v1177_v25 = vadd.f32 0.5, %v1174_v24  ;;  %v1175_v29 = vmul.f32 0.5, %v1761_v1  ;;  %v1816_v24 = vld [vmem:[%s2715_s4 + $0xa0] ss:$16 sps:$4 sm:$0xff]   ;;  %v1822_v1 = vld [vmem:[%s2715_s4 + $0xe4] ss:$16 sps:$4 sm:$0xff]  }
 0x50b   :  { %v1181_v27 = vmul.f32 %v1759_v23, %v1176_v56  ;;  %v1815_v56 = vld [vmem:[%s2715_s4 + $0xac] ss:$16 sps:$4 sm:$0xff]   ;;  %v1817_v23 = vld [vmem:[%s2715_s4 + $0xa8] ss:$16 sps:$4 sm:$0xff]  }
 0x50c   :  { %v1180_v26 = vmul.f32 %v1177_v25, %v2456_v14  ;;  %v1178_v35 = vadd.f32 0.5, %v1175_v29  ;;  %v2552_v14 = vld [vmem:[%s2715_s4 + $0x28] ss:$16 sps:$4 sm:$0xff]   ;;  %v1818_v25 = vld [vmem:[%s2715_s4 + $0xc4] ss:$16 sps:$4 sm:$0xff]  }
 0x50d   :  { %v1823_v29 = vld [vmem:[%s2715_s4 + $0xec] ss:$16 sps:$4 sm:$0xff]  }
 0x50e   :  { %v2511_v28 = vadd.f32 %v1181_v27, %v1180_v26  ;;  %v1819_v27 = vld [vmem:[%s2715_s4 + $0xcc] ss:$16 sps:$4 sm:$0xff]   ;;  %v1820_v26 = vld [vmem:[%s2715_s4 + $0xc0] ss:$16 sps:$4 sm:$0xff]  }
 0x510   :  { %1762 = vtanh.f32 %v2511_v28 }
 0x51a   :  { %v1763_v36 = vpop.eup %1762 }
 0x51b   :  { %v1184_v30 = vmul.f32 %v1763_v36, %v1178_v35  ;;  %v1824_v35 = vld [vmem:[%s2715_s4 + $0xe0] ss:$16 sps:$4 sm:$0xff]   ;;  %v1825_v36 = vld [vmem:[%s2715_s4 + $0xe8] ss:$16 sps:$4 sm:$0xff]  }
 0x51d   :  { %1613 = vst [vmem:[%s2720_s6 + $0x20] sm:$0xff] %v1184_v30  ;;  %v1194_v44 = vpack.c.bf16 %v1184_v30, %v1184_v30 }
 0x51f   :  { %1228 = vmatmul.mubr.bf16.vlgmr.msra.gmra.mrb[36].mxu0 %v1194_v44  ;;  %1269 = vmatmul.mubr.bf16.vlgmr.msra.gmra.mrb[36].mxu1 %v1194_v44 }
 0x520   :  { %1307 = vmatpush1.bf16.msra.mxu0 %v2520_v33  ;;  %1348 = vmatpush1.bf16.msra.mxu1 %v2526_v59 }
 0x521   :  { %1308 = vmatprep.subr.bf16.mxu0 %v2532_v4  ;;  %1349 = vmatprep.subr.bf16.mxu1 %v2538_v37 }
 0x522   :  { %1338 = vmatprep.mubr.bf16.mxu0 %v2745_v55  ;;  %1379 = vmatprep.mubr.bf16.mxu1 %v2745_v55 }
 0x524   :  { %1309 = vmatpush1.bf16.msra.mxu0 %v2546_v20  ;;  %1350 = vmatpush1.bf16.msra.mxu1 %v2552_v14 }
 0x525   :  { %1310 = vmatprep.subr.bf16.mxu0 %v2558_v16  ;;  %1351 = vmatprep.subr.bf16.mxu1 %v2564_v45 }
 0x528   :  { %1311 = vmatpush1.bf16.msra.mxu0 %v2570_v48  ;;  %1352 = vmatpush1.bf16.msra.mxu1 %v2576_v3 }
 0x529   :  { %1312 = vmatprep.subr.bf16.mxu0 %v2582_v19  ;;  %1353 = vmatprep.subr.bf16.mxu1 %v2588_v31 }
 0x52c   :  { %1313 = vmatpush1.bf16.msra.mxu0 %v2594_v40  ;;  %1354 = vmatpush1.bf16.msra.mxu1 %v2072_v54 }
 0x52d   :  { %1314 = vmatprep.subr.bf16.mxu0 %v2087_v57  ;;  %1355 = vmatprep.subr.bf16.mxu1 %v2092_v58  ;;  %v2754_v58 = vld [vmem:[#allocation13_spill] sm:$0xff] }
 0x530   :  { %1315 = vmatpush1.bf16.msra.mxu0 %v2101_v60  ;;  %1356 = vmatpush1.bf16.msra.mxu1 %v2106_v61  ;;  %v2755_v61 = vld [vmem:[#allocation14_spill] sm:$0xff] }
 0x531   :  { %1316 = vmatprep.subr.bf16.mxu0 %v2113_v62  ;;  %1357 = vmatprep.subr.bf16.mxu1 %v2118_v63 }
 0x534   :  { %1317 = vmatpush1.bf16.msra.mxu0 %v2123_v0  ;;  %1358 = vmatpush1.bf16.msra.mxu1 %v2130_v2  ;;  %v2756_v2 = vld [vmem:[#allocation15_spill] sm:$0xff] }
 0x535   :  { %1318 = vmatprep.subr.bf16.mxu0 %v2143_v5  ;;  %1359 = vmatprep.subr.bf16.mxu1 %v2148_v6  ;;  %v2757_v6 = vld [vmem:[#allocation16_spill] sm:$0xff] }
 0x538   :  { %1319 = vmatpush1.bf16.msra.mxu0 %v2157_v8  ;;  %1360 = vmatpush1.bf16.msra.mxu1 %v2162_v9 }
 0x539   :  { %1320 = vmatprep.subr.bf16.mxu0 %v2169_v10  ;;  %1361 = vmatprep.subr.bf16.mxu1 %v2174_v11 }
 0x53c   :  { %1321 = vmatpush1.bf16.msra.mxu0 %v2181_v12  ;;  %1362 = vmatpush1.bf16.msra.mxu1 %v2186_v13 }
 0x53d   :  { %1417 = vmatprep.subr.bf16.mxu0 %v2497_v38  ;;  %1458 = vmatprep.subr.bf16.mxu1 %v2503_v39 }
 0x5f2   :  { %v1229_v54 = vpop.f32.mrb[36].mxu0  ;;  %v1270_v57 = vpop.f32.mrb[36].mxu1 }
 0x5f3   :  { %v1277_v60 = vadd.f32 %v1229_v54, %v2754_v58  ;;  %v1279_v62 = vadd.f32 %v1270_v57, %v2755_v61  ;;  %v1231_v63 = vpop.f32.mrb[37].mxu0  ;;  %v1272_v0 = vpop.f32.mrb[37].mxu1 }
 0x5f4   :  { %v1278_v5 = vadd.f32 %v1231_v63, %v2756_v2  ;;  %v1280_v8 = vadd.f32 %v1272_v0, %v2757_v6  ;;  %v1233_v9 = vpop.f32.mrb[38].mxu0  ;;  %v1274_v10 = vpop.f32.mrb[38].mxu1 }
 0x5f5   :  { %1764 = vtanh.f32 %v1277_v60  ;;  %v1234_v11 = vpop.f32.mrb[39].mxu0  ;;  %v1275_v12 = vpop.f32.mrb[39].mxu1 }
 0x5f6   :  { %1766 = vtanh.f32 %v1278_v5 }
 0x5f7   :  { %1768 = vtanh.f32 %v1280_v8 }
 0x5f8   :  { %1770 = vtanh.f32 %v1279_v62 }
 0x5ff   :  { %v1765_v13 = vpop.eup %1764 }
 0x600   :  { %v1284_v38 = vmul.f32 0.5, %v1765_v13  ;;  %v1767_v39 = vpop.eup %1766 }
 0x601   :  { %v1285_v42 = vmul.f32 0.5, %v1767_v39  ;;  %v1769_v43 = vpop.eup %1768 }
 0x602   :  { %v1287_v41 = vadd.f32 0.5, %v1284_v38  ;;  %v1771_v51 = vpop.eup %1770 }
 0x603   :  { %v1288_v46 = vadd.f32 0.5, %v1285_v42  ;;  %v1286_v52 = vmul.f32 0.5, %v1771_v51 }
 0x604   :  { %v1292_v47 = vmul.f32 %v1769_v43, %v1287_v41  ;;  %v2762_v41 = vld [vmem:[#allocation21_spill] sm:$0xff]  ;;  %v2763_v43 = vld [vmem:[#allocation22_spill] sm:$0xff] }
 0x605   :  { %v1291_v49 = vmul.f32 %v1288_v46, %v2511_v28  ;;  %v1289_v53 = vadd.f32 0.5, %v1286_v52  ;;  %v1821_v28 = vld [vmem:[%s2715_s4 + $0xc8] ss:$16 sps:$4 sm:$0xff]  }
 0x606   :  { %v2765_v52 = vld [vmem:[#allocation24_spill] sm:$0xff] }
 0x607   :  { %v2621_v50 = vadd.f32 %v1292_v47, %v1291_v49 }
 0x609   :  { %1772 = vtanh.f32 %v2621_v50 }
 0x613   :  { %v1773_v7 = vpop.eup %1772 }
 0x614   :  { %v1295_v34 = vmul.f32 %v1773_v7, %v1289_v53 }
 0x616   :  { %1614 = vst [vmem:[%s2720_s6 + $0x28] sm:$0xff] %v1295_v34  ;;  %v1305_v22 = vpack.c.bf16 %v1295_v34, %v1295_v34 }
 0x618   :  { %1339 = vmatmul.mubr.bf16.vlgmr.msra.gmra.mrb[40].mxu0 %v1305_v22  ;;  %1380 = vmatmul.mubr.bf16.vlgmr.msra.gmra.mrb[40].mxu1 %v1305_v22 }
 0x619   :  { %1418 = vmatpush1.bf16.msra.mxu0 %v2520_v33  ;;  %1459 = vmatpush1.bf16.msra.mxu1 %v2526_v59  ;;  %v2758_v33 = vld [vmem:[#allocation17_spill] sm:$0xff] }
 0x61a   :  { %1419 = vmatprep.subr.bf16.mxu0 %v2532_v4  ;;  %1460 = vmatprep.subr.bf16.mxu1 %v2538_v37  ;;  %v2759_v4 = vld [vmem:[#allocation18_spill] sm:$0xff] }
 0x61b   :  { %1449 = vmatprep.mubr.bf16.mxu0 %v2745_v55  ;;  %1490 = vmatprep.mubr.bf16.mxu1 %v2745_v55  ;;  %v1809_v55 = vld [vmem:[%s2715_s4 + $0x68] ss:$16 sps:$4 sm:$0xff]  }
 0x61d   :  { %1420 = vmatpush1.bf16.msra.mxu0 %v2546_v20  ;;  %1461 = vmatpush1.bf16.msra.mxu1 %v2552_v14 }
 0x61e   :  { %1421 = vmatprep.subr.bf16.mxu0 %v2558_v16  ;;  %1462 = vmatprep.subr.bf16.mxu1 %v2564_v45  ;;  %v2760_v16 = vld [vmem:[#allocation19_spill] sm:$0xff] }
 0x621   :  { %1422 = vmatpush1.bf16.msra.mxu0 %v2570_v48  ;;  %1463 = vmatpush1.bf16.msra.mxu1 %v2576_v3  ;;  %v2761_v48 = vld [vmem:[#allocation20_spill] sm:$0xff] }
 0x622   :  { %1423 = vmatprep.subr.bf16.mxu0 %v2582_v19  ;;  %1464 = vmatprep.subr.bf16.mxu1 %v2588_v31 }
 0x625   :  { %1424 = vmatpush1.bf16.msra.mxu0 %v2594_v40  ;;  %1465 = vmatpush1.bf16.msra.mxu1 %v1809_v55 }
 0x626   :  { %1425 = vmatprep.subr.bf16.mxu0 %v1810_v15  ;;  %1466 = vmatprep.subr.bf16.mxu1 %v1811_v18 }
 0x629   :  { %1426 = vmatpush1.bf16.msra.mxu0 %v1812_v17  ;;  %1467 = vmatpush1.bf16.msra.mxu1 %v1813_v21 }
 0x62a   :  { %1427 = vmatprep.subr.bf16.mxu0 %v1814_v32  ;;  %1468 = vmatprep.subr.bf16.mxu1 %v1815_v56 }
 0x62d   :  { %1428 = vmatpush1.bf16.msra.mxu0 %v1816_v24  ;;  %1469 = vmatpush1.bf16.msra.mxu1 %v1817_v23 }
 0x62e   :  { %1429 = vmatprep.subr.bf16.mxu0 %v1818_v25  ;;  %1470 = vmatprep.subr.bf16.mxu1 %v1819_v27 }
 0x631   :  { %1430 = vmatpush1.bf16.msra.mxu0 %v1820_v26  ;;  %1471 = vmatpush1.bf16.msra.mxu1 %v1821_v28 }
 0x632   :  { %1431 = vmatprep.subr.bf16.mxu0 %v1822_v1  ;;  %1472 = vmatprep.subr.bf16.mxu1 %v1823_v29 }
 0x635   :  { %1432 = vmatpush1.bf16.msra.mxu0 %v1824_v35  ;;  %1473 = vmatpush1.bf16.msra.mxu1 %v1825_v36 }
 0x6eb   :  { %v1340_v30 = vpop.f32.mrb[40].mxu0  ;;  %v1381_v44 = vpop.f32.mrb[40].mxu1 }
 0x6ec   :  { %v1388_v59 = vadd.f32 %v1340_v30, %v2758_v33  ;;  %v1390_v37 = vadd.f32 %v1381_v44, %v2759_v4  ;;  %v1342_v20 = vpop.f32.mrb[41].mxu0  ;;  %v1383_v14 = vpop.f32.mrb[41].mxu1 }
 0x6ed   :  { %v1389_v45 = vadd.f32 %v1342_v20, %v2760_v16  ;;  %v1391_v3 = vadd.f32 %v1383_v14, %v2761_v48  ;;  %v1344_v19 = vpop.f32.mrb[42].mxu0  ;;  %v1385_v31 = vpop.f32.mrb[42].mxu1 }
 0x6ee   :  { %1774 = vtanh.f32 %v1388_v59  ;;  %v1345_v40 = vpop.f32.mrb[43].mxu0  ;;  %v1386_v54 = vpop.f32.mrb[43].mxu1 }
 0x6ef   :  { %1776 = vtanh.f32 %v1389_v45 }
 0x6f0   :  { %1778 = vtanh.f32 %v1391_v3 }
 0x6f1   :  { %1780 = vtanh.f32 %v1390_v37 }
 0x6f8   :  { %v1775_v57 = vpop.eup %1774 }
 0x6f9   :  { %v1395_v58 = vmul.f32 0.5, %v1775_v57  ;;  %v1777_v60 = vpop.eup %1776 }
 0x6fa   :  { %v1396_v62 = vmul.f32 0.5, %v1777_v60  ;;  %v1779_v63 = vpop.eup %1778 }
 0x6fb   :  { %v1398_v61 = vadd.f32 0.5, %v1395_v58  ;;  %v1781_v8 = vpop.eup %1780 }
 0x6fc   :  { %v1399_v0 = vadd.f32 0.5, %v1396_v62  ;;  %v1397_v9 = vmul.f32 0.5, %v1781_v8 }
 0x6fd   :  { %v1403_v2 = vmul.f32 %v1779_v63, %v1398_v61 }
 0x6fe   :  { %v1402_v5 = vmul.f32 %v1399_v0, %v2621_v50  ;;  %v1400_v10 = vadd.f32 0.5, %v1397_v9  ;;  %v2764_v50 = vld [vmem:[#allocation23_spill] sm:$0xff] }
 0x700   :  { %v1404_v6 = vadd.f32 %v1403_v2, %v1402_v5 }
 0x702   :  { %1782 = vtanh.f32 %v1404_v6 }
 0x70c   :  { %v1783_v11 = vpop.eup %1782 }
 0x70d   :  { %v1406_v12 = vmul.f32 %v1783_v11, %v1400_v10 }
 0x70f   :  { %1615 = vst [vmem:[%s2720_s6 + $0x30] sm:$0xff] %v1406_v12  ;;  %v1416_v13 = vpack.c.bf16 %v1406_v12, %v1406_v12 }
 0x711   :  { %1450 = vmatmul.mubr.bf16.vlgmr.msra.gmra.mrb[44].mxu0 %v1416_v13  ;;  %1491 = vmatmul.mubr.bf16.vlgmr.msra.gmra.mrb[44].mxu1 %v1416_v13 }
 0x7e4   :  { %v1451_v38 = vpop.f32.mrb[44].mxu0  ;;  %v1492_v39 = vpop.f32.mrb[44].mxu1 }
 0x7e5   :  { %v1499_v42 = vadd.f32 %v1451_v38, %v2762_v41  ;;  %v1501_v46 = vadd.f32 %v1492_v39, %v2763_v43  ;;  %v1453_v47 = vpop.f32.mrb[45].mxu0  ;;  %v1494_v49 = vpop.f32.mrb[45].mxu1 }
 0x7e6   :  { %v1500_v51 = vadd.f32 %v1453_v47, %v2764_v50  ;;  %v1502_v53 = vadd.f32 %v1494_v49, %v2765_v52  ;;  %v1455_v7 = vpop.f32.mrb[46].mxu0  ;;  %v1496_v34 = vpop.f32.mrb[46].mxu1 }
 0x7e7   :  { %1784 = vtanh.f32 %v1499_v42  ;;  %v1456_v22 = vpop.f32.mrb[47].mxu0  ;;  %v1497_v55 = vpop.f32.mrb[47].mxu1 }
 0x7e8   :  { %1786 = vtanh.f32 %v1500_v51 }
 0x7e9   :  { %1788 = vtanh.f32 %v1502_v53 }
 0x7ea   :  { %1790 = vtanh.f32 %v1501_v46 }
 0x7f1   :  { %v1785_v15 = vpop.eup %1784 }
 0x7f2   :  { %v1506_v18 = vmul.f32 0.5, %v1785_v15  ;;  %v1787_v17 = vpop.eup %1786 }
 0x7f3   :  { %v1507_v32 = vmul.f32 0.5, %v1787_v17  ;;  %v1789_v56 = vpop.eup %1788 }
 0x7f4   :  { %v1509_v21 = vadd.f32 0.5, %v1506_v18  ;;  %v1791_v26 = vpop.eup %1790 }
 0x7f5   :  { %v1510_v24 = vadd.f32 0.5, %v1507_v32  ;;  %v1508_v28 = vmul.f32 0.5, %v1791_v26 }
 0x7f6   :  { %v1514_v23 = vmul.f32 %v1789_v56, %v1509_v21 }
 0x7f7   :  { %v1513_v25 = vmul.f32 %v1510_v24, %v1404_v6  ;;  %v1511_v1 = vadd.f32 0.5, %v1508_v28 }
 0x7f9   :  { %v1515_v27 = vadd.f32 %v1514_v23, %v1513_v25 }
 0x7fb   :  { %1792 = vtanh.f32 %v1515_v27  ;;  %1526 = vst [vmem:[%s2721_s8] sm:$0xff] %v1515_v27 }
 0x805   :  { %v1793_v29 = vpop.eup %1792 }
 0x806   :  { %v1517_v35 = vmul.f32 %v1793_v29, %v1511_v1 }
 0x808   :  { %1616 = vst [vmem:[%s2720_s6 + $0x38] sm:$0xff] %v1517_v35  ;;  %1525 = vst [vmem:[%s2722_s7] sm:$0xff] %v1517_v35 }

// kernel: lstm_module_forward.3
= control target key start
LH: loop header
LB: loop body
LE: loop exit
PB: predicated region body
PF: predicated region fallthrough
CT: control target
= control target key end

     0   :  { %v2436_v1 = vmov 0   ;;  %vm93_vm0 = vcmask 130048   ;;  %v53_v51 = vlaneseq  ;;  %s2427_s3 = inlined_call_operand.vmem [shape: bf16[16,512], index: 3, kind: input, shape index: {}]   ;;  %s2428_s0 = inlined_call_operand.vmem [shape: f32[64,16], index: 0, kind: input, shape index: {}]   ;;  %s2429_s4 = inlined_call_operand.vmem [shape: bf16[128,512], index: 4, kind: input, shape index: {}]   ;;  %s2430_s1 = inlined_call_operand.vmem [shape: f32[8,128], index: 1, kind: input, shape index: {}]   ;;  %s2431_s5 = inlined_call_operand.vmem [shape: f32[1,512], index: 5, kind: input, shape index: {}]   ;;  %s2432_s2 = inlined_call_operand.vmem [shape: f32[8,128], index: 2, kind: input, shape index: {}]   ;;  %s2433_s6 = inlined_call_operand.vmem [shape: f32[64,128], index: 6, kind: output, shape index: {0}]   ;;  %s2434_s8 = inlined_call_operand.vmem [shape: f32[8,128], index: 8, kind: output, shape index: {2}]   ;;  %s2435_s7 = inlined_call_operand.vmem [shape: f32[8,128], index: 7, kind: output, shape index: {1}]  }
   0x1   :  { %v1443_v0 = vld [vmem:[%s2427_s3 + $0x4] ss:$16 sps:$4 sm:$0xff]   ;;  %138 = vmatprep.mubr.bf16.mxu0 %v2436_v1  ;;  %211 = vmatprep.mubr.bf16.mxu1 %v2436_v1  ;;  %v1445_v2 = vld [vmem:[%s2427_s3 + $0xc] ss:$16 sps:$4 sm:$0xff]   ;;  %v1447_v3 = vld [vmem:[%s2427_s3] ss:$16 sps:$4 sm:$0xff]  }
   0x2   :  { %106 = vmatprep.subr.bf16.mxu0 %v1443_v0  ;;  %v1448_v4 = vld [vmem:[%s2427_s3 + $0x8] ss:$16 sps:$4 sm:$0xff]   ;;  %v35_v5 = vld [vmem:[%s2428_s0] sm:$0xff]  ;;  %179 = vmatprep.subr.bf16.mxu1 %v1445_v2  ;;  %v1683_v9 = vld [vmem:[%s2429_s4 + $0xc] ss:$16 sps:$4 sm:$0xff]   ;;  %v54_v52 = vshrl.u32 %v53_v51, 7 }
   0x3   :  { %v36_v6 = vld [vmem:[%s2428_s0 + $0x8] sm:$0xff]  ;;  %107 = vmatpush1.bf16.msra.mxu0 %v1447_v3  ;;  %180 = vmatpush1.bf16.msra.mxu1 %v1448_v4  ;;  %v1678_v8 = vld [vmem:[%s2429_s4 + $0x4] ss:$16 sps:$4 sm:$0xff]   ;;  %v1688_v10 = vld [vmem:[%s2429_s4] ss:$16 sps:$4 sm:$0xff]  }
   0x4   :  { %v43_v7 = vpack.c.bf16 %v36_v6, %v35_v5  ;;  %v1693_v11 = vld [vmem:[%s2429_s4 + $0x8] ss:$16 sps:$4 sm:$0xff]   ;;  %486 = vmatprep.subr.bf16.mxu0 %v1678_v8  ;;  %v1699_v12 = vld [vmem:[%s2429_s4 + $0x24] ss:$16 sps:$4 sm:$0xff]   ;;  %v1706_v13 = vld [vmem:[%s2429_s4 + $0x2c] ss:$16 sps:$4 sm:$0xff]   ;;  %527 = vmatprep.subr.bf16.mxu1 %v1683_v9 }
   0x5   :  { %v1713_v14 = vld [vmem:[%s2429_s4 + $0x20] ss:$16 sps:$4 sm:$0xff]   ;;  %v1718_v15 = vld [vmem:[%s2429_s4 + $0x28] ss:$16 sps:$4 sm:$0xff]   ;;  %v1733_v18 = vld [vmem:[%s2429_s4 + $0x44] ss:$16 sps:$4 sm:$0xff]  }
   0x6   :  { %1395 = vmatmul.mubr.msk.bf16.vlgmr.msra.gmra.mrb[0].mxu0 %vm93_vm0, %v43_v7  ;;  %1399 = vmatmul.mubr.msk.bf16.vlgmr.msra.gmra.mrb[0].mxu1 %vm93_vm0, %v43_v7  ;;  %v37_v16 = vld [vmem:[%s2428_s0 + $0x10] sm:$0xff]  ;;  %v38_v17 = vld [vmem:[%s2428_s0 + $0x18] sm:$0xff]  ;;  %v39_v26 = vld [vmem:[%s2428_s0 + $0x20] sm:$0xff]  ;;  %v63_v53 = vsub.s32 2, %v54_v52  ;;  %v67_v54 = vsub.s32 3, %v54_v52  ;;  %v55_v55 = vsub.s32 0, %v54_v52 }
   0x7   :  { %487 = vmatpush1.bf16.msra.mxu0 %v1688_v10  ;;  %528 = vmatpush1.bf16.msra.mxu1 %v1693_v11  ;;  %v44_v19 = vpack.c.bf16 %v38_v17, %v37_v16  ;;  %v1739_v20 = vld [vmem:[%s2429_s4 + $0x4c] ss:$16 sps:$4 sm:$0xff]   ;;  %v1744_v21 = vld [vmem:[%s2429_s4 + $0x40] ss:$16 sps:$4 sm:$0xff]   ;;  %v1750_v22 = vld [vmem:[%s2429_s4 + $0x48] ss:$16 sps:$4 sm:$0xff]  }
   0x8   :  { %488 = vmatprep.subr.bf16.mxu0 %v1699_v12  ;;  %529 = vmatprep.subr.bf16.mxu1 %v1706_v13  ;;  %v1757_v23 = vld [vmem:[%s2429_s4 + $0x64] ss:$16 sps:$4 sm:$0xff]   ;;  %v1763_v24 = vld [vmem:[%s2429_s4 + $0x6c] ss:$16 sps:$4 sm:$0xff]   ;;  %v1768_v25 = vld [vmem:[%s2429_s4 + $0x60] ss:$16 sps:$4 sm:$0xff]  }
   0x9   :  { %148 = vmatprep.mubr.bf16.mxu0 %v2436_v1  ;;  %221 = vmatprep.mubr.bf16.mxu1 %v2436_v1  ;;  %v40_v27 = vld [vmem:[%s2428_s0 + $0x28] sm:$0xff]  ;;  %v1790_v29 = vld [vmem:[%s2429_s4 + $0x84] ss:$16 sps:$4 sm:$0xff]   ;;  %v1803_v32 = vld [vmem:[%s2429_s4 + $0x80] ss:$16 sps:$4 sm:$0xff]   ;;  %v59_v57 = vsub.s32 1, %v54_v52 }
   0xa   :  { %v1785_v28 = vld [vmem:[%s2429_s4 + $0x68] ss:$16 sps:$4 sm:$0xff]   ;;  %v1797_v30 = vld [vmem:[%s2429_s4 + $0x8c] ss:$16 sps:$4 sm:$0xff]   ;;  %v45_v31 = vpack.c.bf16 %v40_v27, %v39_v26  ;;  %v1815_v34 = vld [vmem:[%s2429_s4 + $0xa4] ss:$16 sps:$4 sm:$0xff]  }
   0xb   :  { %489 = vmatpush1.bf16.msra.mxu0 %v1713_v14  ;;  %530 = vmatpush1.bf16.msra.mxu1 %v1718_v15  ;;  %v1808_v33 = vld [vmem:[%s2429_s4 + $0x88] ss:$16 sps:$4 sm:$0xff]   ;;  %v1821_v35 = vld [vmem:[%s2429_s4 + $0xac] ss:$16 sps:$4 sm:$0xff]   ;;  %v1828_v36 = vld [vmem:[%s2429_s4 + $0xa0] ss:$16 sps:$4 sm:$0xff]  }
   0xc   :  { %490 = vmatprep.subr.bf16.mxu0 %v1733_v18  ;;  %531 = vmatprep.subr.bf16.mxu1 %v1739_v20  ;;  %v1833_v37 = vld [vmem:[%s2429_s4 + $0xa8] ss:$16 sps:$4 sm:$0xff]   ;;  %v41_v38 = vld [vmem:[%s2428_s0 + $0x30] sm:$0xff]  ;;  %v1855_v41 = vld [vmem:[%s2429_s4 + $0xcc] ss:$16 sps:$4 sm:$0xff]  }
   0xd   :  { %v42_v39 = vld [vmem:[%s2428_s0 + $0x38] sm:$0xff]  ;;  %v1848_v40 = vld [vmem:[%s2429_s4 + $0xc4] ss:$16 sps:$4 sm:$0xff]   ;;  %v1861_v43 = vld [vmem:[%s2429_s4 + $0xc0] ss:$16 sps:$4 sm:$0xff]  }
   0xe   :  { %1396 = vmatmul.mubr.msk.bf16.gmra.mrb[4].mxu0 %vm93_vm0, %v44_v19  ;;  %1400 = vmatmul.mubr.msk.bf16.gmra.mrb[4].mxu1 %vm93_vm0, %v44_v19  ;;  %v46_v42 = vpack.c.bf16 %v42_v39, %v41_v38  ;;  %v1868_v44 = vld [vmem:[%s2429_s4 + $0xc8] ss:$16 sps:$4 sm:$0xff]   ;;  %v1873_v45 = vld [vmem:[%s2429_s4 + $0xe4] ss:$16 sps:$4 sm:$0xff]   ;;  %v1879_v46 = vld [vmem:[%s2429_s4 + $0xec] ss:$16 sps:$4 sm:$0xff]  }
   0xf   :  { %491 = vmatpush1.bf16.msra.mxu0 %v1744_v21  ;;  %158 = vmatprep.mubr.bf16.mxu0 %v2436_v1  ;;  %v1887_v47 = vld [vmem:[%s2429_s4 + $0xe0] ss:$16 sps:$4 sm:$0xff]   ;;  %v1898_v49 = vld [vmem:[%s2429_s4 + $0xe8] ss:$16 sps:$4 sm:$0xff]  }
  0x10   :  { %532 = vmatpush1.bf16.msra.mxu1 %v1750_v22  ;;  %492 = vmatprep.subr.bf16.mxu0 %v1757_v23  ;;  %v31_v48 = vld [vmem:[%s2430_s1] sm:$0xff] }
  0x11   :  { %533 = vmatprep.subr.bf16.mxu1 %v1763_v24  ;;  %231 = vmatprep.mubr.bf16.mxu1 %v2436_v1  ;;  %v325_v50 = vpack.c.bf16 %v31_v48, %v31_v48  ;;  %v51_v56 = vld [vmem:[%s2431_s5] sm:$0xf] }
  0x12   :  { %v1943_v58 = vrot.slane %v51_v56, %v63_v53  ;;  %v1949_v61 = vrot.slane %v51_v56, %v67_v54  ;;  %v56_v62 = vrot.slane %v51_v56, %v55_v55  ;;  %v60_v2 = vrot.slane %v51_v56, %v59_v57 }
  0x13   :  { %493 = vmatpush1.bf16.msra.mxu0 %v1768_v25 }
  0x14   :  { %534 = vmatpush1.bf16.msra.mxu1 %v1785_v28  ;;  %494 = vmatprep.subr.bf16.mxu0 %v1790_v29 }
  0x15   :  { %535 = vmatprep.subr.bf16.mxu1 %v1797_v30 }
  0x16   :  { %1397 = vmatmul.mubr.msk.bf16.gmra.mrb[8].mxu0 %vm93_vm0, %v45_v31  ;;  %1401 = vmatmul.mubr.msk.bf16.gmra.mrb[8].mxu1 %vm93_vm0, %v45_v31 }
  0x17   :  { %495 = vmatpush1.bf16.msra.mxu0 %v1803_v32  ;;  %168 = vmatprep.mubr.bf16.mxu0 %v2436_v1 }
  0x18   :  { %536 = vmatpush1.bf16.msra.mxu1 %v1808_v33  ;;  %496 = vmatprep.subr.bf16.mxu0 %v1815_v34 }
  0x19   :  { %537 = vmatprep.subr.bf16.mxu1 %v1821_v35  ;;  %241 = vmatprep.mubr.bf16.mxu1 %v2436_v1 }
  0x1b   :  { %497 = vmatpush1.bf16.msra.mxu0 %v1828_v36 }
  0x1c   :  { %538 = vmatpush1.bf16.msra.mxu1 %v1833_v37  ;;  %498 = vmatprep.subr.bf16.mxu0 %v1848_v40 }
  0x1d   :  { %539 = vmatprep.subr.bf16.mxu1 %v1855_v41 }
  0x1e   :  { %1398 = vmatmul.mubr.msk.bf16.gmra.mrb[12].mxu0 %vm93_vm0, %v46_v42  ;;  %1402 = vmatmul.mubr.msk.bf16.gmra.mrb[12].mxu1 %vm93_vm0, %v46_v42 }
  0x1f   :  { %499 = vmatpush1.bf16.msra.mxu0 %v1861_v43  ;;  %518 = vmatprep.mubr.bf16.mxu0 %v2436_v1 }
  0x20   :  { %540 = vmatpush1.bf16.msra.mxu1 %v1868_v44  ;;  %500 = vmatprep.subr.bf16.mxu0 %v1873_v45 }
  0x21   :  { %541 = vmatprep.subr.bf16.mxu1 %v1879_v46  ;;  %559 = vmatprep.mubr.bf16.mxu1 %v2436_v1 }
  0x23   :  { %501 = vmatpush1.bf16.msra.mxu0 %v1887_v47 }
  0x24   :  { %542 = vmatpush1.bf16.msra.mxu1 %v1898_v49  ;;  %596 = vmatprep.subr.bf16.mxu0 %v1678_v8 }
  0x25   :  { %637 = vmatprep.subr.bf16.mxu1 %v1683_v9 }
  0x26   :  { %519 = vmatmul.mubr.bf16.vlgmr.msra.gmra.mrb[16].mxu0 %v325_v50 }
  0x27   :  { %560 = vmatmul.mubr.bf16.vlgmr.msra.gmra.mrb[16].mxu1 %v325_v50  ;;  %597 = vmatpush1.bf16.msra.mxu0 %v1688_v10 }
  0x28   :  { %638 = vmatpush1.bf16.msra.mxu1 %v1693_v11  ;;  %598 = vmatprep.subr.bf16.mxu0 %v1699_v12 }
  0x29   :  { %639 = vmatprep.subr.bf16.mxu1 %v1706_v13  ;;  %628 = vmatprep.mubr.bf16.mxu0 %v2436_v1 }
  0x2a   :  { %669 = vmatprep.mubr.bf16.mxu1 %v2436_v1 }
  0x2b   :  { %599 = vmatpush1.bf16.msra.mxu0 %v1713_v14 }
  0x2c   :  { %640 = vmatpush1.bf16.msra.mxu1 %v1718_v15  ;;  %600 = vmatprep.subr.bf16.mxu0 %v1733_v18 }
  0x2d   :  { %641 = vmatprep.subr.bf16.mxu1 %v1739_v20 }
  0x2f   :  { %601 = vmatpush1.bf16.msra.mxu0 %v1744_v21 }
  0x30   :  { %642 = vmatpush1.bf16.msra.mxu1 %v1750_v22  ;;  %602 = vmatprep.subr.bf16.mxu0 %v1757_v23 }
  0x31   :  { %643 = vmatprep.subr.bf16.mxu1 %v1763_v24 }
  0x33   :  { %603 = vmatpush1.bf16.msra.mxu0 %v1768_v25 }
  0x34   :  { %644 = vmatpush1.bf16.msra.mxu1 %v1785_v28  ;;  %604 = vmatprep.subr.bf16.mxu0 %v1790_v29 }
  0x35   :  { %645 = vmatprep.subr.bf16.mxu1 %v1797_v30 }
  0x37   :  { %605 = vmatpush1.bf16.msra.mxu0 %v1803_v32 }
  0x38   :  { %646 = vmatpush1.bf16.msra.mxu1 %v1808_v33  ;;  %606 = vmatprep.subr.bf16.mxu0 %v1815_v34 }
  0x39   :  { %647 = vmatprep.subr.bf16.mxu1 %v1821_v35 }
  0x3b   :  { %607 = vmatpush1.bf16.msra.mxu0 %v1828_v36 }
  0x3c   :  { %648 = vmatpush1.bf16.msra.mxu1 %v1833_v37  ;;  %608 = vmatprep.subr.bf16.mxu0 %v1848_v40 }
  0x3d   :  { %649 = vmatprep.subr.bf16.mxu1 %v1855_v41 }
  0x3f   :  { %609 = vmatpush1.bf16.msra.mxu0 %v1861_v43 }
  0x40   :  { %650 = vmatpush1.bf16.msra.mxu1 %v1868_v44  ;;  %610 = vmatprep.subr.bf16.mxu0 %v1873_v45 }
  0x41   :  { %651 = vmatprep.subr.bf16.mxu1 %v1879_v46 }
  0x43   :  { %611 = vmatpush1.bf16.msra.mxu0 %v1887_v47 }
  0x44   :  { %652 = vmatpush1.bf16.msra.mxu1 %v1898_v49  ;;  %707 = vmatprep.subr.bf16.mxu0 %v1678_v8 }
  0x45   :  { %748 = vmatprep.subr.bf16.mxu1 %v1683_v9 }
  0xd9   :  { %v1945_v59 = vpop.f32.mrb[0].mxu0  ;;  %v1947_v60 = vpop.f32.mrb[0].mxu1 }
  0xda   :  { %v142_v63 = vpop.f32.mrb[1].mxu0  ;;  %v215_v0 = vpop.f32.mrb[1].mxu1 }
  0xdb   :  { %v144_v3 = vpop.f32.mrb[2].mxu0  ;;  %v217_v4 = vpop.f32.mrb[2].mxu1 }
  0xdc   :  { %v1951_v5 = vadd.f32 %v144_v3, %v56_v62  ;;  %v146_v6 = vpop.f32.mrb[3].mxu0  ;;  %v1954_v7 = vadd.f32 %v217_v4, %v1943_v58  ;;  %v219_v16 = vpop.f32.mrb[3].mxu1 }
  0xdd   :  { %v1956_v17 = vadd.f32 %v146_v6, %v60_v2  ;;  %v1959_v19 = vadd.f32 %v219_v16, %v1949_v61 }
  0xe1   :  { %v150_v26 = vpop.f32.mrb[4].mxu0  ;;  %v223_v27 = vpop.f32.mrb[4].mxu1 }
  0xe2   :  { %v1961_v31 = vadd.f32 %v150_v26, %v56_v62  ;;  %v152_v38 = vpop.f32.mrb[5].mxu0  ;;  %v1964_v39 = vadd.f32 %v223_v27, %v1943_v58  ;;  %v225_v42 = vpop.f32.mrb[5].mxu1 }
  0xe3   :  { %v1966_v48 = vadd.f32 %v152_v38, %v60_v2  ;;  %v154_v50 = vpop.f32.mrb[6].mxu0  ;;  %v1969_v51 = vadd.f32 %v225_v42, %v1949_v61  ;;  %v227_v52 = vpop.f32.mrb[6].mxu1 }
  0xe4   :  { %v1971_v53 = vadd.f32 %v154_v50, %v56_v62  ;;  %v156_v54 = vpop.f32.mrb[7].mxu0  ;;  %v1974_v55 = vadd.f32 %v227_v52, %v1943_v58  ;;  %v229_v56 = vpop.f32.mrb[7].mxu1 }
  0xe5   :  { %v1976_v57 = vadd.f32 %v156_v54, %v60_v2  ;;  %v1979_v3 = vadd.f32 %v229_v56, %v1949_v61 }
  0xe6   :  { %2438 = vst [vmem:[#allocation5_spill] sm:$0xff] %v1971_v53  ;;  %2439 = vst [vmem:[#allocation6_spill] sm:$0xff] %v1974_v55 }
  0xe7   :  { %2440 = vst [vmem:[#allocation7_spill] sm:$0xff] %v1976_v57  ;;  %2441 = vst [vmem:[#allocation8_spill] sm:$0xff] %v1979_v3 }
  0xe9   :  { %v160_v4 = vpop.f32.mrb[8].mxu0  ;;  %v233_v6 = vpop.f32.mrb[8].mxu1 }
  0xea   :  { %v1981_v16 = vadd.f32 %v160_v4, %v56_v62  ;;  %v162_v26 = vpop.f32.mrb[9].mxu0  ;;  %v1984_v27 = vadd.f32 %v233_v6, %v1943_v58  ;;  %v235_v38 = vpop.f32.mrb[9].mxu1 }
  0xeb   :  { %v1986_v42 = vadd.f32 %v162_v26, %v60_v2  ;;  %v164_v50 = vpop.f32.mrb[10].mxu0  ;;  %v1989_v52 = vadd.f32 %v235_v38, %v1949_v61  ;;  %v237_v54 = vpop.f32.mrb[10].mxu1 }
  0xec   :  { %2442 = vst [vmem:[#allocation9_spill] sm:$0xff] %v1981_v16  ;;  %2443 = vst [vmem:[#allocation10_spill] sm:$0xff] %v1984_v27  ;;  %v1991_v1 = vadd.f32 %v164_v50, %v56_v62  ;;  %v166_v56 = vpop.f32.mrb[11].mxu0  ;;  %v1994_v3 = vadd.f32 %v237_v54, %v1943_v58  ;;  %v239_v4 = vpop.f32.mrb[11].mxu1 }
  0xed   :  { %2444 = vst [vmem:[#allocation11_spill] sm:$0xff] %v1986_v42  ;;  %2445 = vst [vmem:[#allocation12_spill] sm:$0xff] %v1989_v52  ;;  %v1996_v16 = vadd.f32 %v166_v56, %v60_v2  ;;  %v1999_v6 = vadd.f32 %v239_v4, %v1949_v61 }
  0xee   :  { %2446 = vst [vmem:[#allocation13_spill] sm:$0xff] %v1991_v1  ;;  %2447 = vst [vmem:[#allocation14_spill] sm:$0xff] %v1994_v3 }
  0xef   :  { %2448 = vst [vmem:[#allocation15_spill] sm:$0xff] %v1996_v16  ;;  %2449 = vst [vmem:[#allocation16_spill] sm:$0xff] %v1999_v6 }
  0xf1   :  { %v170_v27 = vpop.f32.mrb[12].mxu0  ;;  %v243_v26 = vpop.f32.mrb[12].mxu1 }
  0xf2   :  { %v2001_v42 = vadd.f32 %v170_v27, %v56_v62  ;;  %v172_v57 = vpop.f32.mrb[13].mxu0  ;;  %v2004_v38 = vadd.f32 %v243_v26, %v1943_v58  ;;  %v245_v50 = vpop.f32.mrb[13].mxu1 }
  0xf3   :  { %v2006_v1 = vadd.f32 %v172_v57, %v60_v2  ;;  %v174_v52 = vpop.f32.mrb[14].mxu0  ;;  %v2009_v54 = vadd.f32 %v245_v50, %v1949_v61  ;;  %v247_v56 = vpop.f32.mrb[14].mxu1  ;;  %v141_v57 = vadd.f32 %v1945_v59, %v56_v62  ;;  %v214_v50 = vadd.f32 %v1947_v60, %v1943_v58 }
  0xf4   :  { %2450 = vst [vmem:[#allocation17_spill] sm:$0xff] %v2001_v42  ;;  %2451 = vst [vmem:[#allocation18_spill] sm:$0xff] %v2004_v38  ;;  %v2011_v16 = vadd.f32 %v174_v52, %v56_v62  ;;  %v176_v4 = vpop.f32.mrb[15].mxu0  ;;  %v2014_v6 = vadd.f32 %v247_v56, %v1943_v58  ;;  %v249_v27 = vpop.f32.mrb[15].mxu1  ;;  %v216_v52 = vadd.f32 %v215_v0, %v1949_v61 }
  0xf5   :  { %2452 = vst [vmem:[#allocation19_spill] sm:$0xff] %v2006_v1  ;;  %2453 = vst [vmem:[#allocation20_spill] sm:$0xff] %v2009_v54  ;;  %v2016_v42 = vadd.f32 %v176_v4, %v60_v2  ;;  %v2019_v26 = vadd.f32 %v249_v27, %v1949_v61  ;;  %v143_v1 = vadd.f32 %v142_v63, %v60_v2 }
  0xf6   :  { %2454 = vst [vmem:[#allocation21_spill] sm:$0xff] %v2011_v16  ;;  %2455 = vst [vmem:[#allocation22_spill] sm:$0xff] %v2014_v6 }
  0xf7   :  { %2456 = vst [vmem:[#allocation23_spill] sm:$0xff] %v2016_v42  ;;  %2457 = vst [vmem:[#allocation24_spill] sm:$0xff] %v2019_v26 }
  0xf9   :  { %v520_v54 = vpop.f32.mrb[16].mxu0 }
  0xfa   :  { %v568_v16 = vadd.f32 %v520_v54, %v141_v57  ;;  %v561_v38 = vpop.f32.mrb[16].mxu1  ;;  %v522_v3 = vpop.f32.mrb[17].mxu0 }
  0xfb   :  { %v570_v56 = vadd.f32 %v561_v38, %v214_v50  ;;  %v569_v6 = vadd.f32 %v522_v3, %v143_v1  ;;  %v563_v55 = vpop.f32.mrb[17].mxu1  ;;  %v524_v4 = vpop.f32.mrb[18].mxu0  ;;  %v33_v1 = vld [vmem:[%s2432_s2] sm:$0xff] }
  0xfc   :  { %1497 = vtanh.f32 %v568_v16  ;;  %v571_v42 = vadd.f32 %v563_v55, %v216_v52  ;;  %v525_v27 = vpop.f32.mrb[19].mxu0  ;;  %v565_v26 = vpop.f32.mrb[18].mxu1 }
  0xfd   :  { %v566_v53 = vpop.f32.mrb[19].mxu1  ;;  %1499 = vtanh.f32 %v569_v6  ;;  %v2458_v26 = vmov 0  }
  0xfe   :  { %1501 = vtanh.f32 %v571_v42 }
  0xff   :  { %1503 = vtanh.f32 %v570_v56 }
 0x106   :  { %v1498_v59 = vpop.eup %1497 }
 0x107   :  { %v575_v62 = vmul.f32 0.5, %v1498_v59  ;;  %v1500_v58 = vpop.eup %1499 }
 0x108   :  { %v576_v61 = vmul.f32 0.5, %v1500_v58  ;;  %v1502_v63 = vpop.eup %1501 }
 0x109   :  { %v578_v60 = vadd.f32 0.5, %v575_v62  ;;  %v1504_v53 = vpop.eup %1503 }
 0x10a   :  { %v579_v0 = vadd.f32 0.5, %v576_v61  ;;  %v577_v16 = vmul.f32 0.5, %v1504_v53 }
 0x10b   :  { %v583_v2 = vmul.f32 %v1502_v63, %v578_v60 }
 0x10c   :  { %v582_v3 = vmul.f32 %v579_v0, %v33_v1  ;;  %v580_v42 = vadd.f32 0.5, %v577_v16 }
 0x10e   :  { %v2028_v55 = vadd.f32 %v583_v2, %v582_v3 }
 0x110   :  { %1505 = vtanh.f32 %v2028_v55 }
 0x11a   :  { %v1506_v6 = vpop.eup %1505 }
 0x11b   :  { %v586_v38 = vmul.f32 %v1506_v6, %v580_v42 }
 0x11d   :  { %587 = vst [vmem:[%s2433_s6] sm:$0xff] %v586_v38  ;;  %v595_v54 = vpack.c.bf16 %v586_v38, %v586_v38 }
 0x11f   :  { %629 = vmatmul.mubr.bf16.vlgmr.msra.gmra.mrb[20].mxu0 %v595_v54  ;;  %670 = vmatmul.mubr.bf16.vlgmr.msra.gmra.mrb[20].mxu1 %v595_v54 }
 0x120   :  { %708 = vmatpush1.bf16.msra.mxu0 %v1688_v10  ;;  %749 = vmatpush1.bf16.msra.mxu1 %v1693_v11 }
 0x121   :  { %709 = vmatprep.subr.bf16.mxu0 %v1699_v12  ;;  %750 = vmatprep.subr.bf16.mxu1 %v1706_v13 }
 0x122   :  { %739 = vmatprep.mubr.bf16.mxu0 %v2458_v26  ;;  %780 = vmatprep.mubr.bf16.mxu1 %v2458_v26 }
 0x124   :  { %710 = vmatpush1.bf16.msra.mxu0 %v1713_v14  ;;  %751 = vmatpush1.bf16.msra.mxu1 %v1718_v15 }
 0x125   :  { %711 = vmatprep.subr.bf16.mxu0 %v1733_v18  ;;  %752 = vmatprep.subr.bf16.mxu1 %v1739_v20 }
 0x128   :  { %712 = vmatpush1.bf16.msra.mxu0 %v1744_v21  ;;  %753 = vmatpush1.bf16.msra.mxu1 %v1750_v22 }
 0x129   :  { %713 = vmatprep.subr.bf16.mxu0 %v1757_v23  ;;  %754 = vmatprep.subr.bf16.mxu1 %v1763_v24 }
 0x12c   :  { %714 = vmatpush1.bf16.msra.mxu0 %v1768_v25  ;;  %755 = vmatpush1.bf16.msra.mxu1 %v1785_v28 }
 0x12d   :  { %715 = vmatprep.subr.bf16.mxu0 %v1790_v29  ;;  %756 = vmatprep.subr.bf16.mxu1 %v1797_v30 }
 0x130   :  { %716 = vmatpush1.bf16.msra.mxu0 %v1803_v32  ;;  %757 = vmatpush1.bf16.msra.mxu1 %v1808_v33 }
 0x131   :  { %717 = vmatprep.subr.bf16.mxu0 %v1815_v34  ;;  %758 = vmatprep.subr.bf16.mxu1 %v1821_v35 }
 0x134   :  { %718 = vmatpush1.bf16.msra.mxu0 %v1828_v36  ;;  %759 = vmatpush1.bf16.msra.mxu1 %v1833_v37 }
 0x135   :  { %719 = vmatprep.subr.bf16.mxu0 %v1848_v40  ;;  %760 = vmatprep.subr.bf16.mxu1 %v1855_v41 }
 0x138   :  { %720 = vmatpush1.bf16.msra.mxu0 %v1861_v43  ;;  %761 = vmatpush1.bf16.msra.mxu1 %v1868_v44 }
 0x139   :  { %721 = vmatprep.subr.bf16.mxu0 %v1873_v45  ;;  %762 = vmatprep.subr.bf16.mxu1 %v1879_v46 }
 0x13c   :  { %722 = vmatpush1.bf16.msra.mxu0 %v1887_v47  ;;  %763 = vmatpush1.bf16.msra.mxu1 %v1898_v49 }
 0x13d   :  { %818 = vmatprep.subr.bf16.mxu0 %v1678_v8  ;;  %859 = vmatprep.subr.bf16.mxu1 %v1683_v9 }
 0x1f2   :  { %v630_v57 = vpop.f32.mrb[20].mxu0  ;;  %v671_v50 = vpop.f32.mrb[20].mxu1 }
 0x1f3   :  { %v678_v52 = vadd.f32 %v630_v57, %v1951_v5  ;;  %v680_v56 = vadd.f32 %v671_v50, %v1954_v7  ;;  %v632_v4 = vpop.f32.mrb[21].mxu0  ;;  %v673_v27 = vpop.f32.mrb[21].mxu1 }
 0x1f4   :  { %v679_v59 = vadd.f32 %v632_v4, %v1956_v17  ;;  %v681_v62 = vadd.f32 %v673_v27, %v1959_v19  ;;  %v634_v58 = vpop.f32.mrb[22].mxu0  ;;  %v675_v60 = vpop.f32.mrb[22].mxu1 }
 0x1f5   :  { %1507 = vtanh.f32 %v678_v52  ;;  %v635_v61 = vpop.f32.mrb[23].mxu0  ;;  %v676_v63 = vpop.f32.mrb[23].mxu1 }
 0x1f6   :  { %1509 = vtanh.f32 %v679_v59 }
 0x1f7   :  { %1511 = vtanh.f32 %v681_v62 }
 0x1f8   :  { %1513 = vtanh.f32 %v680_v56 }
 0x1ff   :  { %v1508_v1 = vpop.eup %1507 }
 0x200   :  { %v685_v0 = vmul.f32 0.5, %v1508_v1  ;;  %v1510_v2 = vpop.eup %1509 }
 0x201   :  { %v686_v5 = vmul.f32 0.5, %v1510_v2  ;;  %v1512_v7 = vpop.eup %1511 }
 0x202   :  { %v688_v3 = vadd.f32 0.5, %v685_v0  ;;  %v1514_v19 = vpop.eup %1513 }
 0x203   :  { %v689_v53 = vadd.f32 0.5, %v686_v5  ;;  %v687_v6 = vmul.f32 0.5, %v1514_v19 }
 0x204   :  { %v693_v16 = vmul.f32 %v1512_v7, %v688_v3 }
 0x205   :  { %v692_v17 = vmul.f32 %v689_v53, %v2028_v55  ;;  %v690_v38 = vadd.f32 0.5, %v687_v6 }
 0x207   :  { %v2073_v42 = vadd.f32 %v693_v16, %v692_v17 }
 0x209   :  { %1515 = vtanh.f32 %v2073_v42 }
 0x213   :  { %v1516_v54 = vpop.eup %1515 }
 0x214   :  { %v696_v57 = vmul.f32 %v1516_v54, %v690_v38 }
 0x216   :  { %1435 = vst [vmem:[%s2433_s6 + $0x8] sm:$0xff] %v696_v57  ;;  %v706_v50 = vpack.c.bf16 %v696_v57, %v696_v57 }
 0x218   :  { %740 = vmatmul.mubr.bf16.vlgmr.msra.gmra.mrb[24].mxu0 %v706_v50  ;;  %781 = vmatmul.mubr.bf16.vlgmr.msra.gmra.mrb[24].mxu1 %v706_v50  ;;  %v2459_v50 = vld [vmem:[#allocation5_spill] sm:$0xff] }
 0x219   :  { %819 = vmatpush1.bf16.msra.mxu0 %v1688_v10  ;;  %860 = vmatpush1.bf16.msra.mxu1 %v1693_v11 }
 0x21a   :  { %820 = vmatprep.subr.bf16.mxu0 %v1699_v12  ;;  %861 = vmatprep.subr.bf16.mxu1 %v1706_v13 }
 0x21b   :  { %850 = vmatprep.mubr.bf16.mxu0 %v2458_v26  ;;  %891 = vmatprep.mubr.bf16.mxu1 %v2458_v26 }
 0x21d   :  { %821 = vmatpush1.bf16.msra.mxu0 %v1713_v14  ;;  %862 = vmatpush1.bf16.msra.mxu1 %v1718_v15 }
 0x21e   :  { %822 = vmatprep.subr.bf16.mxu0 %v1733_v18  ;;  %863 = vmatprep.subr.bf16.mxu1 %v1739_v20 }
 0x221   :  { %823 = vmatpush1.bf16.msra.mxu0 %v1744_v21  ;;  %864 = vmatpush1.bf16.msra.mxu1 %v1750_v22 }
 0x222   :  { %824 = vmatprep.subr.bf16.mxu0 %v1757_v23  ;;  %865 = vmatprep.subr.bf16.mxu1 %v1763_v24 }
 0x225   :  { %825 = vmatpush1.bf16.msra.mxu0 %v1768_v25  ;;  %866 = vmatpush1.bf16.msra.mxu1 %v1785_v28 }
 0x226   :  { %826 = vmatprep.subr.bf16.mxu0 %v1790_v29  ;;  %867 = vmatprep.subr.bf16.mxu1 %v1797_v30 }
 0x229   :  { %827 = vmatpush1.bf16.msra.mxu0 %v1803_v32  ;;  %868 = vmatpush1.bf16.msra.mxu1 %v1808_v33 }
 0x22a   :  { %828 = vmatprep.subr.bf16.mxu0 %v1815_v34  ;;  %869 = vmatprep.subr.bf16.mxu1 %v1821_v35 }
 0x22d   :  { %829 = vmatpush1.bf16.msra.mxu0 %v1828_v36  ;;  %870 = vmatpush1.bf16.msra.mxu1 %v1833_v37 }
 0x22e   :  { %830 = vmatprep.subr.bf16.mxu0 %v1848_v40  ;;  %871 = vmatprep.subr.bf16.mxu1 %v1855_v41 }
 0x231   :  { %831 = vmatpush1.bf16.msra.mxu0 %v1861_v43  ;;  %872 = vmatpush1.bf16.msra.mxu1 %v1868_v44 }
 0x232   :  { %832 = vmatprep.subr.bf16.mxu0 %v1873_v45  ;;  %873 = vmatprep.subr.bf16.mxu1 %v1879_v46 }
 0x235   :  { %833 = vmatpush1.bf16.msra.mxu0 %v1887_v47  ;;  %874 = vmatpush1.bf16.msra.mxu1 %v1898_v49 }
 0x236   :  { %929 = vmatprep.subr.bf16.mxu0 %v1678_v8  ;;  %970 = vmatprep.subr.bf16.mxu1 %v1683_v9 }
 0x2eb   :  { %v741_v55 = vpop.f32.mrb[24].mxu0  ;;  %v782_v52 = vpop.f32.mrb[24].mxu1 }
 0x2ec   :  { %v789_v56 = vadd.f32 %v741_v55, %v1961_v31  ;;  %v791_v4 = vadd.f32 %v782_v52, %v1964_v39  ;;  %v743_v27 = vpop.f32.mrb[25].mxu0  ;;  %v784_v59 = vpop.f32.mrb[25].mxu1  ;;  %v2460_v52 = vld [vmem:[#allocation6_spill] sm:$0xff] }
 0x2ed   :  { %v790_v62 = vadd.f32 %v743_v27, %v1966_v48  ;;  %v792_v58 = vadd.f32 %v784_v59, %v1969_v51  ;;  %v745_v60 = vpop.f32.mrb[26].mxu0  ;;  %v786_v61 = vpop.f32.mrb[26].mxu1  ;;  %v2461_v59 = vld [vmem:[#allocation7_spill] sm:$0xff] }
 0x2ee   :  { %1517 = vtanh.f32 %v789_v56  ;;  %v746_v63 = vpop.f32.mrb[27].mxu0  ;;  %v787_v1 = vpop.f32.mrb[27].mxu1 }
 0x2ef   :  { %1519 = vtanh.f32 %v790_v62 }
 0x2f0   :  { %1521 = vtanh.f32 %v792_v58  ;;  %v2462_v58 = vld [vmem:[#allocation8_spill] sm:$0xff] }
 0x2f1   :  { %1523 = vtanh.f32 %v791_v4 }
 0x2f8   :  { %v1518_v0 = vpop.eup %1517 }
 0x2f9   :  { %v796_v2 = vmul.f32 0.5, %v1518_v0  ;;  %v1520_v3 = vpop.eup %1519 }
 0x2fa   :  { %v797_v31 = vmul.f32 0.5, %v1520_v3  ;;  %v1522_v39 = vpop.eup %1521 }
 0x2fb   :  { %v799_v5 = vadd.f32 0.5, %v796_v2  ;;  %v1524_v51 = vpop.eup %1523 }
 0x2fc   :  { %v800_v7 = vadd.f32 0.5, %v797_v31  ;;  %v798_v17 = vmul.f32 0.5, %v1524_v51 }
 0x2fd   :  { %v804_v53 = vmul.f32 %v1522_v39, %v799_v5 }
 0x2fe   :  { %v803_v48 = vmul.f32 %v800_v7, %v2073_v42  ;;  %v801_v19 = vadd.f32 0.5, %v798_v17 }
 0x300   :  { %v2118_v16 = vadd.f32 %v804_v53, %v803_v48 }
 0x302   :  { %1525 = vtanh.f32 %v2118_v16 }
 0x30c   :  { %v1526_v6 = vpop.eup %1525 }
 0x30d   :  { %v807_v38 = vmul.f32 %v1526_v6, %v801_v19 }
 0x30f   :  { %1436 = vst [vmem:[%s2433_s6 + $0x10] sm:$0xff] %v807_v38  ;;  %v817_v54 = vpack.c.bf16 %v807_v38, %v807_v38 }
 0x311   :  { %851 = vmatmul.mubr.bf16.vlgmr.msra.gmra.mrb[28].mxu0 %v817_v54  ;;  %892 = vmatmul.mubr.bf16.vlgmr.msra.gmra.mrb[28].mxu1 %v817_v54 }
 0x312   :  { %930 = vmatpush1.bf16.msra.mxu0 %v1688_v10  ;;  %971 = vmatpush1.bf16.msra.mxu1 %v1693_v11 }
 0x313   :  { %931 = vmatprep.subr.bf16.mxu0 %v1699_v12  ;;  %972 = vmatprep.subr.bf16.mxu1 %v1706_v13 }
 0x314   :  { %961 = vmatprep.mubr.bf16.mxu0 %v2458_v26  ;;  %1002 = vmatprep.mubr.bf16.mxu1 %v2458_v26 }
 0x316   :  { %932 = vmatpush1.bf16.msra.mxu0 %v1713_v14  ;;  %973 = vmatpush1.bf16.msra.mxu1 %v1718_v15 }
 0x317   :  { %933 = vmatprep.subr.bf16.mxu0 %v1733_v18  ;;  %974 = vmatprep.subr.bf16.mxu1 %v1739_v20 }
 0x31a   :  { %934 = vmatpush1.bf16.msra.mxu0 %v1744_v21  ;;  %975 = vmatpush1.bf16.msra.mxu1 %v1750_v22 }
 0x31b   :  { %935 = vmatprep.subr.bf16.mxu0 %v1757_v23  ;;  %976 = vmatprep.subr.bf16.mxu1 %v1763_v24 }
 0x31e   :  { %936 = vmatpush1.bf16.msra.mxu0 %v1768_v25  ;;  %977 = vmatpush1.bf16.msra.mxu1 %v1785_v28 }
 0x31f   :  { %937 = vmatprep.subr.bf16.mxu0 %v1790_v29  ;;  %978 = vmatprep.subr.bf16.mxu1 %v1797_v30 }
 0x322   :  { %938 = vmatpush1.bf16.msra.mxu0 %v1803_v32  ;;  %979 = vmatpush1.bf16.msra.mxu1 %v1808_v33 }
 0x323   :  { %939 = vmatprep.subr.bf16.mxu0 %v1815_v34  ;;  %980 = vmatprep.subr.bf16.mxu1 %v1821_v35 }
 0x326   :  { %940 = vmatpush1.bf16.msra.mxu0 %v1828_v36  ;;  %981 = vmatpush1.bf16.msra.mxu1 %v1833_v37 }
 0x327   :  { %941 = vmatprep.subr.bf16.mxu0 %v1848_v40  ;;  %982 = vmatprep.subr.bf16.mxu1 %v1855_v41 }
 0x32a   :  { %942 = vmatpush1.bf16.msra.mxu0 %v1861_v43  ;;  %983 = vmatpush1.bf16.msra.mxu1 %v1868_v44 }
 0x32b   :  { %943 = vmatprep.subr.bf16.mxu0 %v1873_v45  ;;  %984 = vmatprep.subr.bf16.mxu1 %v1879_v46 }
 0x32e   :  { %944 = vmatpush1.bf16.msra.mxu0 %v1887_v47  ;;  %985 = vmatpush1.bf16.msra.mxu1 %v1898_v49 }
 0x32f   :  { %1040 = vmatprep.subr.bf16.mxu0 %v1678_v8  ;;  %1081 = vmatprep.subr.bf16.mxu1 %v1683_v9 }
 0x3e4   :  { %v852_v42 = vpop.f32.mrb[28].mxu0  ;;  %v893_v57 = vpop.f32.mrb[28].mxu1 }
 0x3e5   :  { %v900_v55 = vadd.f32 %v852_v42, %v2459_v50  ;;  %v902_v56 = vadd.f32 %v893_v57, %v2460_v52  ;;  %v854_v4 = vpop.f32.mrb[29].mxu0  ;;  %v895_v27 = vpop.f32.mrb[29].mxu1 }
 0x3e6   :  { %v901_v62 = vadd.f32 %v854_v4, %v2461_v59  ;;  %v903_v60 = vadd.f32 %v895_v27, %v2462_v58  ;;  %v856_v61 = vpop.f32.mrb[30].mxu0  ;;  %v897_v63 = vpop.f32.mrb[30].mxu1 }
 0x3e7   :  { %1527 = vtanh.f32 %v900_v55  ;;  %v857_v1 = vpop.f32.mrb[31].mxu0  ;;  %v898_v0 = vpop.f32.mrb[31].mxu1 }
 0x3e8   :  { %1529 = vtanh.f32 %v901_v62 }
 0x3e9   :  { %1531 = vtanh.f32 %v903_v60 }
 0x3ea   :  { %1533 = vtanh.f32 %v902_v56 }
 0x3f1   :  { %v1528_v8 = vpop.eup %1527 }
 0x3f2   :  { %v907_v9 = vmul.f32 0.5, %v1528_v8  ;;  %v1530_v2 = vpop.eup %1529 }
 0x3f3   :  { %v908_v5 = vmul.f32 0.5, %v1530_v2  ;;  %v1532_v31 = vpop.eup %1531  ;;  %v2227_v2 = vld [vmem:[%s2429_s4] ss:$16 sps:$4 sm:$0xff]  }
 0x3f4   :  { %v910_v3 = vadd.f32 0.5, %v907_v9  ;;  %v1534_v51 = vpop.eup %1533 }
 0x3f5   :  { %v911_v39 = vadd.f32 0.5, %v908_v5  ;;  %v909_v17 = vmul.f32 0.5, %v1534_v51  ;;  %v2239_v5 = vld [vmem:[%s2429_s4 + $0x24] ss:$16 sps:$4 sm:$0xff]   ;;  %v2277_v51 = vld [vmem:[%s2429_s4 + $0x40] ss:$16 sps:$4 sm:$0xff]  }
 0x3f6   :  { %v915_v7 = vmul.f32 %v1532_v31, %v910_v3  ;;  %v2233_v3 = vld [vmem:[%s2429_s4 + $0x8] ss:$16 sps:$4 sm:$0xff]   ;;  %v2245_v31 = vld [vmem:[%s2429_s4 + $0x2c] ss:$16 sps:$4 sm:$0xff]  }
 0x3f7   :  { %v914_v53 = vmul.f32 %v911_v39, %v2118_v16  ;;  %v912_v19 = vadd.f32 0.5, %v909_v17  ;;  %v2253_v39 = vld [vmem:[%s2429_s4 + $0x20] ss:$16 sps:$4 sm:$0xff]   ;;  %v2283_v17 = vld [vmem:[%s2429_s4 + $0x48] ss:$16 sps:$4 sm:$0xff]  }
 0x3f9   :  { %v2163_v48 = vadd.f32 %v915_v7, %v914_v53  ;;  %v2259_v7 = vld [vmem:[%s2429_s4 + $0x28] ss:$16 sps:$4 sm:$0xff]   ;;  %v2265_v53 = vld [vmem:[%s2429_s4 + $0x44] ss:$16 sps:$4 sm:$0xff]  }
 0x3fb   :  { %1535 = vtanh.f32 %v2163_v48 }
 0x405   :  { %v1536_v6 = vpop.eup %1535 }
 0x406   :  { %v918_v38 = vmul.f32 %v1536_v6, %v912_v19  ;;  %v2289_v19 = vld [vmem:[%s2429_s4 + $0x64] ss:$16 sps:$4 sm:$0xff]   ;;  %v2295_v6 = vld [vmem:[%s2429_s4 + $0x6c] ss:$16 sps:$4 sm:$0xff]  }
 0x408   :  { %1437 = vst [vmem:[%s2433_s6 + $0x18] sm:$0xff] %v918_v38  ;;  %v928_v54 = vpack.c.bf16 %v918_v38, %v918_v38  ;;  %v2301_v38 = vld [vmem:[%s2429_s4 + $0x60] ss:$16 sps:$4 sm:$0xff]  }
 0x40a   :  { %962 = vmatmul.mubr.bf16.vlgmr.msra.gmra.mrb[32].mxu0 %v928_v54  ;;  %1003 = vmatmul.mubr.bf16.vlgmr.msra.gmra.mrb[32].mxu1 %v928_v54  ;;  %v2307_v54 = vld [vmem:[%s2429_s4 + $0x68] ss:$16 sps:$4 sm:$0xff]  }
 0x40b   :  { %1041 = vmatpush1.bf16.msra.mxu0 %v1688_v10  ;;  %1082 = vmatpush1.bf16.msra.mxu1 %v1693_v11  ;;  %v2204_v10 = vld [vmem:[%s2429_s4 + $0x4] ss:$16 sps:$4 sm:$0xff]   ;;  %v2210_v11 = vld [vmem:[%s2429_s4 + $0xc] ss:$16 sps:$4 sm:$0xff]  }
 0x40c   :  { %1042 = vmatprep.subr.bf16.mxu0 %v1699_v12  ;;  %1083 = vmatprep.subr.bf16.mxu1 %v1706_v13 }
 0x40d   :  { %1072 = vmatprep.mubr.bf16.mxu0 %v2458_v26  ;;  %1113 = vmatprep.mubr.bf16.mxu1 %v2458_v26 }
 0x40f   :  { %1043 = vmatpush1.bf16.msra.mxu0 %v1713_v14  ;;  %1084 = vmatpush1.bf16.msra.mxu1 %v1718_v15  ;;  %v2463_v14 = vld [vmem:[#allocation9_spill] sm:$0xff] }
 0x410   :  { %1044 = vmatprep.subr.bf16.mxu0 %v1733_v18  ;;  %1085 = vmatprep.subr.bf16.mxu1 %v1739_v20  ;;  %v2464_v18 = vld [vmem:[#allocation10_spill] sm:$0xff] }
 0x413   :  { %1045 = vmatpush1.bf16.msra.mxu0 %v1744_v21  ;;  %1086 = vmatpush1.bf16.msra.mxu1 %v1750_v22 }
 0x414   :  { %1046 = vmatprep.subr.bf16.mxu0 %v1757_v23  ;;  %1087 = vmatprep.subr.bf16.mxu1 %v1763_v24  ;;  %v2465_v23 = vld [vmem:[#allocation11_spill] sm:$0xff] }
 0x417   :  { %1047 = vmatpush1.bf16.msra.mxu0 %v1768_v25  ;;  %1088 = vmatpush1.bf16.msra.mxu1 %v1785_v28  ;;  %v2466_v25 = vld [vmem:[#allocation12_spill] sm:$0xff] }
 0x418   :  { %1048 = vmatprep.subr.bf16.mxu0 %v1790_v29  ;;  %1089 = vmatprep.subr.bf16.mxu1 %v1797_v30 }
 0x41b   :  { %1049 = vmatpush1.bf16.msra.mxu0 %v1803_v32  ;;  %1090 = vmatpush1.bf16.msra.mxu1 %v1808_v33 }
 0x41c   :  { %1050 = vmatprep.subr.bf16.mxu0 %v1815_v34  ;;  %1091 = vmatprep.subr.bf16.mxu1 %v1821_v35 }
 0x41f   :  { %1051 = vmatpush1.bf16.msra.mxu0 %v1828_v36  ;;  %1092 = vmatpush1.bf16.msra.mxu1 %v1833_v37 }
 0x420   :  { %1052 = vmatprep.subr.bf16.mxu0 %v1848_v40  ;;  %1093 = vmatprep.subr.bf16.mxu1 %v1855_v41 }
 0x423   :  { %1053 = vmatpush1.bf16.msra.mxu0 %v1861_v43  ;;  %1094 = vmatpush1.bf16.msra.mxu1 %v1868_v44 }
 0x424   :  { %1054 = vmatprep.subr.bf16.mxu0 %v1873_v45  ;;  %1095 = vmatprep.subr.bf16.mxu1 %v1879_v46 }
 0x427   :  { %1055 = vmatpush1.bf16.msra.mxu0 %v1887_v47  ;;  %1096 = vmatpush1.bf16.msra.mxu1 %v1898_v49 }
 0x428   :  { %1151 = vmatprep.subr.bf16.mxu0 %v2204_v10  ;;  %1192 = vmatprep.subr.bf16.mxu1 %v2210_v11 }
 0x4dd   :  { %v963_v12 = vpop.f32.mrb[32].mxu0  ;;  %v1004_v13 = vpop.f32.mrb[32].mxu1 }
 0x4de   :  { %v1011_v15 = vadd.f32 %v963_v12, %v2463_v14  ;;  %v1013_v20 = vadd.f32 %v1004_v13, %v2464_v18  ;;  %v965_v21 = vpop.f32.mrb[33].mxu0  ;;  %v1006_v22 = vpop.f32.mrb[33].mxu1  ;;  %v2313_v12 = vld [vmem:[%s2429_s4 + $0x84] ss:$16 sps:$4 sm:$0xff]  }
 0x4df   :  { %v1012_v24 = vadd.f32 %v965_v21, %v2465_v23  ;;  %v1014_v28 = vadd.f32 %v1006_v22, %v2466_v25  ;;  %v967_v29 = vpop.f32.mrb[34].mxu0  ;;  %v1008_v16 = vpop.f32.mrb[34].mxu1 }
 0x4e0   :  { %1537 = vtanh.f32 %v1011_v15  ;;  %v968_v42 = vpop.f32.mrb[35].mxu0  ;;  %v1009_v57 = vpop.f32.mrb[35].mxu1 }
 0x4e1   :  { %1539 = vtanh.f32 %v1012_v24 }
 0x4e2   :  { %1541 = vtanh.f32 %v1014_v28 }
 0x4e3   :  { %1543 = vtanh.f32 %v1013_v20 }
 0x4ea   :  { %v1538_v50 = vpop.eup %1537 }
 0x4eb   :  { %v1018_v55 = vmul.f32 0.5, %v1538_v50  ;;  %v1540_v52 = vpop.eup %1539  ;;  %v1595_v50 = vld [vmem:[%s2429_s4 + $0x80] ss:$16 sps:$4 sm:$0xff]  }
 0x4ec   :  { %v1019_v4 = vmul.f32 0.5, %v1540_v52  ;;  %v1542_v27 = vpop.eup %1541  ;;  %v1597_v52 = vld [vmem:[%s2429_s4 + $0xa4] ss:$16 sps:$4 sm:$0xff]  }
 0x4ed   :  { %v1021_v56 = vadd.f32 0.5, %v1018_v55  ;;  %v1544_v61 = vpop.eup %1543  ;;  %v1596_v55 = vld [vmem:[%s2429_s4 + $0x88] ss:$16 sps:$4 sm:$0xff]  }
 0x4ee   :  { %v1022_v59 = vadd.f32 0.5, %v1019_v4  ;;  %v1020_v63 = vmul.f32 0.5, %v1544_v61  ;;  %v1599_v4 = vld [vmem:[%s2429_s4 + $0xa0] ss:$16 sps:$4 sm:$0xff]   ;;  %v1605_v61 = vld [vmem:[%s2429_s4 + $0xe4] ss:$16 sps:$4 sm:$0xff]  }
 0x4ef   :  { %v1026_v62 = vmul.f32 %v1542_v27, %v1021_v56  ;;  %v1598_v56 = vld [vmem:[%s2429_s4 + $0xac] ss:$16 sps:$4 sm:$0xff]   ;;  %v1600_v27 = vld [vmem:[%s2429_s4 + $0xa8] ss:$16 sps:$4 sm:$0xff]  }
 0x4f0   :  { %v1025_v58 = vmul.f32 %v1022_v59, %v2163_v48  ;;  %v1023_v1 = vadd.f32 0.5, %v1020_v63  ;;  %v2271_v48 = vld [vmem:[%s2429_s4 + $0x4c] ss:$16 sps:$4 sm:$0xff]   ;;  %v1601_v59 = vld [vmem:[%s2429_s4 + $0xc4] ss:$16 sps:$4 sm:$0xff]  }
 0x4f1   :  { %v1606_v63 = vld [vmem:[%s2429_s4 + $0xec] ss:$16 sps:$4 sm:$0xff]  }
 0x4f2   :  { %v2218_v60 = vadd.f32 %v1026_v62, %v1025_v58  ;;  %v1602_v62 = vld [vmem:[%s2429_s4 + $0xcc] ss:$16 sps:$4 sm:$0xff]   ;;  %v1603_v58 = vld [vmem:[%s2429_s4 + $0xc0] ss:$16 sps:$4 sm:$0xff]  }
 0x4f4   :  { %1545 = vtanh.f32 %v2218_v60 }
 0x4fe   :  { %v1546_v0 = vpop.eup %1545 }
 0x4ff   :  { %v1029_v8 = vmul.f32 %v1546_v0, %v1023_v1  ;;  %v1607_v1 = vld [vmem:[%s2429_s4 + $0xe0] ss:$16 sps:$4 sm:$0xff]   ;;  %v1608_v0 = vld [vmem:[%s2429_s4 + $0xe8] ss:$16 sps:$4 sm:$0xff]  }
 0x501   :  { %1438 = vst [vmem:[%s2433_s6 + $0x20] sm:$0xff] %v1029_v8  ;;  %v1039_v9 = vpack.c.bf16 %v1029_v8, %v1029_v8 }
 0x503   :  { %1073 = vmatmul.mubr.bf16.vlgmr.msra.gmra.mrb[36].mxu0 %v1039_v9  ;;  %1114 = vmatmul.mubr.bf16.vlgmr.msra.gmra.mrb[36].mxu1 %v1039_v9 }
 0x504   :  { %1152 = vmatpush1.bf16.msra.mxu0 %v2227_v2  ;;  %1193 = vmatpush1.bf16.msra.mxu1 %v2233_v3 }
 0x505   :  { %1153 = vmatprep.subr.bf16.mxu0 %v2239_v5  ;;  %1194 = vmatprep.subr.bf16.mxu1 %v2245_v31 }
 0x506   :  { %1183 = vmatprep.mubr.bf16.mxu0 %v2458_v26  ;;  %1224 = vmatprep.mubr.bf16.mxu1 %v2458_v26 }
 0x508   :  { %1154 = vmatpush1.bf16.msra.mxu0 %v2253_v39  ;;  %1195 = vmatpush1.bf16.msra.mxu1 %v2259_v7 }
 0x509   :  { %1155 = vmatprep.subr.bf16.mxu0 %v2265_v53  ;;  %1196 = vmatprep.subr.bf16.mxu1 %v2271_v48 }
 0x50c   :  { %1156 = vmatpush1.bf16.msra.mxu0 %v2277_v51  ;;  %1197 = vmatpush1.bf16.msra.mxu1 %v2283_v17 }
 0x50d   :  { %1157 = vmatprep.subr.bf16.mxu0 %v2289_v19  ;;  %1198 = vmatprep.subr.bf16.mxu1 %v2295_v6 }
 0x510   :  { %1158 = vmatpush1.bf16.msra.mxu0 %v2301_v38  ;;  %1199 = vmatpush1.bf16.msra.mxu1 %v2307_v54 }
 0x511   :  { %1159 = vmatprep.subr.bf16.mxu0 %v2313_v12  ;;  %1200 = vmatprep.subr.bf16.mxu1 %v1797_v30 }
 0x514   :  { %1160 = vmatpush1.bf16.msra.mxu0 %v1803_v32  ;;  %1201 = vmatpush1.bf16.msra.mxu1 %v1808_v33  ;;  %v2467_v33 = vld [vmem:[#allocation13_spill] sm:$0xff] }
 0x515   :  { %1161 = vmatprep.subr.bf16.mxu0 %v1815_v34  ;;  %1202 = vmatprep.subr.bf16.mxu1 %v1821_v35  ;;  %v2468_v35 = vld [vmem:[#allocation14_spill] sm:$0xff] }
 0x518   :  { %1162 = vmatpush1.bf16.msra.mxu0 %v1828_v36  ;;  %1203 = vmatpush1.bf16.msra.mxu1 %v1833_v37 }
 0x519   :  { %1163 = vmatprep.subr.bf16.mxu0 %v1848_v40  ;;  %1204 = vmatprep.subr.bf16.mxu1 %v1855_v41  ;;  %v2469_v41 = vld [vmem:[#allocation15_spill] sm:$0xff] }
 0x51c   :  { %1164 = vmatpush1.bf16.msra.mxu0 %v1861_v43  ;;  %1205 = vmatpush1.bf16.msra.mxu1 %v1868_v44  ;;  %v2470_v44 = vld [vmem:[#allocation16_spill] sm:$0xff] }
 0x51d   :  { %1165 = vmatprep.subr.bf16.mxu0 %v1873_v45  ;;  %1206 = vmatprep.subr.bf16.mxu1 %v1879_v46 }
 0x520   :  { %1166 = vmatpush1.bf16.msra.mxu0 %v1887_v47  ;;  %1207 = vmatpush1.bf16.msra.mxu1 %v1898_v49 }
 0x521   :  { %1262 = vmatprep.subr.bf16.mxu0 %v2204_v10  ;;  %1303 = vmatprep.subr.bf16.mxu1 %v2210_v11 }
 0x5d6   :  { %v1074_v30 = vpop.f32.mrb[36].mxu0  ;;  %v1115_v32 = vpop.f32.mrb[36].mxu1 }
 0x5d7   :  { %v1122_v34 = vadd.f32 %v1074_v30, %v2467_v33  ;;  %v1124_v36 = vadd.f32 %v1115_v32, %v2468_v35  ;;  %v1076_v37 = vpop.f32.mrb[37].mxu0  ;;  %v1117_v40 = vpop.f32.mrb[37].mxu1 }
 0x5d8   :  { %v1123_v43 = vadd.f32 %v1076_v37, %v2469_v41  ;;  %v1125_v45 = vadd.f32 %v1117_v40, %v2470_v44  ;;  %v1078_v46 = vpop.f32.mrb[38].mxu0  ;;  %v1119_v47 = vpop.f32.mrb[38].mxu1 }
 0x5d9   :  { %1547 = vtanh.f32 %v1122_v34  ;;  %v1079_v49 = vpop.f32.mrb[39].mxu0  ;;  %v1120_v13 = vpop.f32.mrb[39].mxu1 }
 0x5da   :  { %1549 = vtanh.f32 %v1123_v43 }
 0x5db   :  { %1551 = vtanh.f32 %v1125_v45 }
 0x5dc   :  { %1553 = vtanh.f32 %v1124_v36 }
 0x5e3   :  { %v1548_v10 = vpop.eup %1547 }
 0x5e4   :  { %v1129_v11 = vmul.f32 0.5, %v1548_v10  ;;  %v1550_v14 = vpop.eup %1549 }
 0x5e5   :  { %v1130_v18 = vmul.f32 0.5, %v1550_v14  ;;  %v1552_v20 = vpop.eup %1551 }
 0x5e6   :  { %v1132_v15 = vadd.f32 0.5, %v1129_v11  ;;  %v1554_v25 = vpop.eup %1553  ;;  %v2475_v11 = vld [vmem:[#allocation21_spill] sm:$0xff] }
 0x5e7   :  { %v1133_v21 = vadd.f32 0.5, %v1130_v18  ;;  %v1131_v28 = vmul.f32 0.5, %v1554_v25 }
 0x5e8   :  { %v1137_v22 = vmul.f32 %v1552_v20, %v1132_v15  ;;  %v2476_v15 = vld [vmem:[#allocation22_spill] sm:$0xff] }
 0x5e9   :  { %v1136_v23 = vmul.f32 %v1133_v21, %v2218_v60  ;;  %v1134_v29 = vadd.f32 0.5, %v1131_v28  ;;  %v1604_v60 = vld [vmem:[%s2429_s4 + $0xc8] ss:$16 sps:$4 sm:$0xff]  }
 0x5eb   :  { %v2338_v24 = vadd.f32 %v1137_v22, %v1136_v23  ;;  %v2477_v22 = vld [vmem:[#allocation23_spill] sm:$0xff] }
 0x5ed   :  { %1555 = vtanh.f32 %v2338_v24 }
 0x5f7   :  { %v1556_v16 = vpop.eup %1555 }
 0x5f8   :  { %v1140_v42 = vmul.f32 %v1556_v16, %v1134_v29 }
 0x5fa   :  { %1439 = vst [vmem:[%s2433_s6 + $0x28] sm:$0xff] %v1140_v42  ;;  %v1150_v57 = vpack.c.bf16 %v1140_v42, %v1140_v42 }
 0x5fc   :  { %1184 = vmatmul.mubr.bf16.vlgmr.msra.gmra.mrb[40].mxu0 %v1150_v57  ;;  %1225 = vmatmul.mubr.bf16.vlgmr.msra.gmra.mrb[40].mxu1 %v1150_v57 }
 0x5fd   :  { %1263 = vmatpush1.bf16.msra.mxu0 %v2227_v2  ;;  %1304 = vmatpush1.bf16.msra.mxu1 %v2233_v3  ;;  %v2471_v2 = vld [vmem:[#allocation17_spill] sm:$0xff] }
 0x5fe   :  { %1264 = vmatprep.subr.bf16.mxu0 %v2239_v5  ;;  %1305 = vmatprep.subr.bf16.mxu1 %v2245_v31  ;;  %v2472_v5 = vld [vmem:[#allocation18_spill] sm:$0xff] }
 0x5ff   :  { %1294 = vmatprep.mubr.bf16.mxu0 %v2458_v26  ;;  %1335 = vmatprep.mubr.bf16.mxu1 %v2458_v26  ;;  %v1594_v26 = vld [vmem:[%s2429_s4 + $0x8c] ss:$16 sps:$4 sm:$0xff]  }
 0x601   :  { %1265 = vmatpush1.bf16.msra.mxu0 %v2253_v39  ;;  %1306 = vmatpush1.bf16.msra.mxu1 %v2259_v7 }
 0x602   :  { %1266 = vmatprep.subr.bf16.mxu0 %v2265_v53  ;;  %1307 = vmatprep.subr.bf16.mxu1 %v2271_v48  ;;  %v2473_v53 = vld [vmem:[#allocation19_spill] sm:$0xff] }
 0x605   :  { %1267 = vmatpush1.bf16.msra.mxu0 %v2277_v51  ;;  %1308 = vmatpush1.bf16.msra.mxu1 %v2283_v17  ;;  %v2474_v51 = vld [vmem:[#allocation20_spill] sm:$0xff] }
 0x606   :  { %1268 = vmatprep.subr.bf16.mxu0 %v2289_v19  ;;  %1309 = vmatprep.subr.bf16.mxu1 %v2295_v6 }
 0x609   :  { %1269 = vmatpush1.bf16.msra.mxu0 %v2301_v38  ;;  %1310 = vmatpush1.bf16.msra.mxu1 %v2307_v54 }
 0x60a   :  { %1270 = vmatprep.subr.bf16.mxu0 %v2313_v12  ;;  %1311 = vmatprep.subr.bf16.mxu1 %v1594_v26 }
 0x60d   :  { %1271 = vmatpush1.bf16.msra.mxu0 %v1595_v50  ;;  %1312 = vmatpush1.bf16.msra.mxu1 %v1596_v55 }
 0x60e   :  { %1272 = vmatprep.subr.bf16.mxu0 %v1597_v52  ;;  %1313 = vmatprep.subr.bf16.mxu1 %v1598_v56 }
 0x611   :  { %1273 = vmatpush1.bf16.msra.mxu0 %v1599_v4  ;;  %1314 = vmatpush1.bf16.msra.mxu1 %v1600_v27 }
 0x612   :  { %1274 = vmatprep.subr.bf16.mxu0 %v1601_v59  ;;  %1315 = vmatprep.subr.bf16.mxu1 %v1602_v62 }
 0x615   :  { %1275 = vmatpush1.bf16.msra.mxu0 %v1603_v58  ;;  %1316 = vmatpush1.bf16.msra.mxu1 %v1604_v60 }
 0x616   :  { %1276 = vmatprep.subr.bf16.mxu0 %v1605_v61  ;;  %1317 = vmatprep.subr.bf16.mxu1 %v1606_v63 }
 0x619   :  { %1277 = vmatpush1.bf16.msra.mxu0 %v1607_v1  ;;  %1318 = vmatpush1.bf16.msra.mxu1 %v1608_v0 }
 0x6cf   :  { %v1185_v8 = vpop.f32.mrb[40].mxu0  ;;  %v1226_v9 = vpop.f32.mrb[40].mxu1 }
 0x6d0   :  { %v1233_v3 = vadd.f32 %v1185_v8, %v2471_v2  ;;  %v1235_v31 = vadd.f32 %v1226_v9, %v2472_v5  ;;  %v1187_v39 = vpop.f32.mrb[41].mxu0  ;;  %v1228_v7 = vpop.f32.mrb[41].mxu1 }
 0x6d1   :  { %v1234_v48 = vadd.f32 %v1187_v39, %v2473_v53  ;;  %v1236_v17 = vadd.f32 %v1228_v7, %v2474_v51  ;;  %v1189_v19 = vpop.f32.mrb[42].mxu0  ;;  %v1230_v6 = vpop.f32.mrb[42].mxu1 }
 0x6d2   :  { %1557 = vtanh.f32 %v1233_v3  ;;  %v1190_v38 = vpop.f32.mrb[43].mxu0  ;;  %v1231_v54 = vpop.f32.mrb[43].mxu1 }
 0x6d3   :  { %1559 = vtanh.f32 %v1234_v48 }
 0x6d4   :  { %1561 = vtanh.f32 %v1236_v17 }
 0x6d5   :  { %1563 = vtanh.f32 %v1235_v31 }
 0x6dc   :  { %v1558_v12 = vpop.eup %1557 }
 0x6dd   :  { %v1240_v30 = vmul.f32 0.5, %v1558_v12  ;;  %v1560_v32 = vpop.eup %1559 }
 0x6de   :  { %v1241_v34 = vmul.f32 0.5, %v1560_v32  ;;  %v1562_v35 = vpop.eup %1561 }
 0x6df   :  { %v1243_v33 = vadd.f32 0.5, %v1240_v30  ;;  %v1564_v43 = vpop.eup %1563 }
 0x6e0   :  { %v1244_v36 = vadd.f32 0.5, %v1241_v34  ;;  %v1242_v44 = vmul.f32 0.5, %v1564_v43 }
 0x6e1   :  { %v1248_v37 = vmul.f32 %v1562_v35, %v1243_v33 }
 0x6e2   :  { %v1247_v40 = vmul.f32 %v1244_v36, %v2338_v24  ;;  %v1245_v45 = vadd.f32 0.5, %v1242_v44  ;;  %v2478_v24 = vld [vmem:[#allocation24_spill] sm:$0xff] }
 0x6e4   :  { %v1249_v41 = vadd.f32 %v1248_v37, %v1247_v40 }
 0x6e6   :  { %1565 = vtanh.f32 %v1249_v41 }
 0x6f0   :  { %v1566_v46 = vpop.eup %1565 }
 0x6f1   :  { %v1251_v47 = vmul.f32 %v1566_v46, %v1245_v45 }
 0x6f3   :  { %1440 = vst [vmem:[%s2433_s6 + $0x30] sm:$0xff] %v1251_v47  ;;  %v1261_v49 = vpack.c.bf16 %v1251_v47, %v1251_v47 }
 0x6f5   :  { %1295 = vmatmul.mubr.bf16.vlgmr.msra.gmra.mrb[44].mxu0 %v1261_v49  ;;  %1336 = vmatmul.mubr.bf16.vlgmr.msra.gmra.mrb[44].mxu1 %v1261_v49 }
 0x7c8   :  { %v1296_v13 = vpop.f32.mrb[44].mxu0  ;;  %v1337_v10 = vpop.f32.mrb[44].mxu1 }
 0x7c9   :  { %v1344_v14 = vadd.f32 %v1296_v13, %v2475_v11  ;;  %v1346_v18 = vadd.f32 %v1337_v10, %v2476_v15  ;;  %v1298_v20 = vpop.f32.mrb[45].mxu0  ;;  %v1339_v21 = vpop.f32.mrb[45].mxu1 }
 0x7ca   :  { %v1345_v23 = vadd.f32 %v1298_v20, %v2477_v22  ;;  %v1347_v25 = vadd.f32 %v1339_v21, %v2478_v24  ;;  %v1300_v28 = vpop.f32.mrb[46].mxu0  ;;  %v1341_v29 = vpop.f32.mrb[46].mxu1 }
 0x7cb   :  { %1567 = vtanh.f32 %v1344_v14  ;;  %v1301_v16 = vpop.f32.mrb[47].mxu0  ;;  %v1342_v42 = vpop.f32.mrb[47].mxu1 }
 0x7cc   :  { %1569 = vtanh.f32 %v1345_v23 }
 0x7cd   :  { %1571 = vtanh.f32 %v1347_v25 }
 0x7ce   :  { %1573 = vtanh.f32 %v1346_v18 }
 0x7d5   :  { %v1568_v57 = vpop.eup %1567 }
 0x7d6   :  { %v1351_v26 = vmul.f32 0.5, %v1568_v57  ;;  %v1570_v50 = vpop.eup %1569 }
 0x7d7   :  { %v1352_v52 = vmul.f32 0.5, %v1570_v50  ;;  %v1572_v56 = vpop.eup %1571 }
 0x7d8   :  { %v1354_v55 = vadd.f32 0.5, %v1351_v26  ;;  %v1574_v58 = vpop.eup %1573 }
 0x7d9   :  { %v1355_v4 = vadd.f32 0.5, %v1352_v52  ;;  %v1353_v60 = vmul.f32 0.5, %v1574_v58 }
 0x7da   :  { %v1359_v27 = vmul.f32 %v1572_v56, %v1354_v55 }
 0x7db   :  { %v1358_v59 = vmul.f32 %v1355_v4, %v1249_v41  ;;  %v1356_v61 = vadd.f32 0.5, %v1353_v60 }
 0x7dd   :  { %v1360_v62 = vadd.f32 %v1359_v27, %v1358_v59 }
 0x7df   :  { %1575 = vtanh.f32 %v1360_v62  ;;  %1371 = vst [vmem:[%s2434_s8] sm:$0xff] %v1360_v62 }
 0x7e9   :  { %v1576_v63 = vpop.eup %1575 }
 0x7ea   :  { %v1362_v1 = vmul.f32 %v1576_v63, %v1356_v61 }
 0x7ec   :  { %1441 = vst [vmem:[%s2433_s6 + $0x38] sm:$0xff] %v1362_v1  ;;  %1370 = vst [vmem:[%s2435_s7] sm:$0xff] %v1362_v1 }

</bundles_post_ra>
